<compile_context>
chip_gen: v7x
topology: tpu7x:2x2x1
jax: 0.10.0
libtpu: 0.0.40
codegen_flags: <defaults>
</compile_context>

<pallas_src>
import functools
import math

import jax
import jax.numpy as jnp
from jax import lax
from jax.experimental import pallas as pl
from jax.experimental.pallas import tpu as pltpu

SCALED_SILU_FACTOR = 1.0 / 0.6
INV_SQRT2 = 1.0 / math.sqrt(2.0)


def _round_up(x, m):
    return (x + m - 1) // m * m


def _scaled_silu(x):
    # GemNet ScaledSiLU: silu(x) * (1 / 0.6).
    # TODO(synk): on v6e/v7x run the sigmoid+mul in bf16 (bf16 EUP); keep f32 on v5e.
    # TODO(synk): fold the 1/0.6 constant into the following Dense weights (VALU filler).
    return x * jax.nn.sigmoid(x) * SCALED_SILU_FACTOR


def _bf16_dot(a, b):
    # MXU matmul in bf16 with f32 accumulation.
    return jnp.dot(a.astype(jnp.bfloat16), b.astype(jnp.bfloat16),
                   preferred_element_type=jnp.float32)


def _mlp(x, w1_ref, wres_ref, n_hidden):
    """Dense(act) followed by n_hidden ResidualLayers (2 x Dense(act) each)."""
    x = _scaled_silu(_bf16_dot(x, w1_ref[...]))
    for i in range(n_hidden):
        y = _scaled_silu(_bf16_dot(x, wres_ref[2 * i]))
        y = _scaled_silu(_bf16_dot(y, wres_ref[2 * i + 1]))
        x = (x + y) * INV_SQRT2          # residual math in f32
    return x


# --------------------------------------------------------------------------- #
# Kernel 1: edge kernel (grid over edge tiles, 'arbitrary' -- carried scatter) #
# --------------------------------------------------------------------------- #
def _edge_kernel(rowoff_ref, rows_ref, m_ref, rbf_ref,
                 w_rbf_cat_ref, w_f1_ref, w_res_f_ref, w_out_f_ref,
                 f_out_ref, se_ref, sl_ref, *, n_hidden, atom_window):
    et = pl.program_id(0)
    tile_e, emb_edge = m_ref.shape

    @pl.when(et == 0)
    def _init():
        se_ref[...] = jnp.zeros_like(se_ref)
        sl_ref[...] = jnp.zeros_like(sl_ref)

    m = m_ref[...]                                              # (tile_e, emb_edge) bf16
    # Fused dense_rbf / dense_rbf_F / dense_rbf_L : one MXU call, N = 3*emb_edge.
    rbf_emb = _bf16_dot(rbf_ref[...], w_rbf_cat_ref[...])       # (tile_e, 3*emb) f32
    m_f32 = m.astype(jnp.float32)
    x_e_edge = (m_f32 * rbf_emb[:, :emb_edge]).astype(jnp.bfloat16)      # energy path
    x_l_edge = (m_f32 * rbf_emb[:, 2 * emb_edge:]).astype(jnp.bfloat16)  # lattice path
    # ScalingFactor(scale_file=None) == 1.0 -> no-op multiplies removed.

    # ---- windowed scatter-sum (edges -> dense atom ranks) --------------------
    # rows_ref holds the rank of each edge's atom; within a sorted-edge tile the
    # rank spread is <= tile_e-1, so the (atom_window, tile_e) one-hot covers it.
    row_off = pl.multiple_of(rowoff_ref[et], 8)
    rows = rows_ref[...]                                        # (1, tile_e) int32
    local = lax.broadcasted_iota(jnp.int32, (atom_window, tile_e), 0) + row_off
    seg = (local == rows).astype(jnp.bfloat16)                  # (atom_window, tile_e)
    contrib_e = jnp.dot(seg, x_e_edge, preferred_element_type=jnp.float32)
    contrib_l = jnp.dot(seg, x_l_edge, preferred_element_type=jnp.float32)
    if atom_window == se_ref.shape[0]:        # static: window spans the whole acc
        se_ref[...] += contrib_e
        sl_ref[...] += contrib_l
    else:
        win = pl.ds(row_off, atom_window)
        se_ref[win, :] = se_ref[win, :] + contrib_e
        sl_ref[win, :] = sl_ref[win, :] + contrib_l

    # ---- force path (direct_forces=True): fully streamed per edge tile -------
    # TODO(synk): on v7x split this streamed force path into its own pallas_call
    #             with a 'parallel' edge axis so both TensorCores are used (the
    #             carried scatter forces 'arbitrary' here).
    x_f = _mlp(m, w_f1_ref, w_res_f_ref, n_hidden)              # seq_forces
    x_f = x_f * rbf_emb[:, emb_edge:2 * emb_edge]               # scale_rbf_F == 1.0
    f_out_ref[...] = _bf16_dot(x_f, w_out_f_ref[...]).astype(f_out_ref.dtype)


# --------------------------------------------------------------------------- #
# Kernel 2: atom kernel (grid over atom/rank tiles, 'parallel')                #
# --------------------------------------------------------------------------- #
def _atom_kernel(se_ref, sl_ref,
                 w_e1_ref, w_res_e_ref, w_out_e_ref,
                 w_l1_ref, w_res_l_ref, w_out_l_ref,
                 e_out_ref, l_out_ref, *, n_hidden):
    x_e = _mlp(se_ref[...], w_e1_ref, w_res_e_ref, n_hidden)
    e_out_ref[...] = _bf16_dot(x_e, w_out_e_ref[...]).astype(e_out_ref.dtype)
    x_l = _mlp(sl_ref[...], w_l1_ref, w_res_l_ref, n_hidden)
    l_out_ref[...] = _bf16_dot(x_l, w_out_l_ref[...]).astype(l_out_ref.dtype)


def output_block(h, m, rbf, id_j, params, *, n_hidden, num_targets,
                 tile_e=None, tile_a=None):
    """Returns (x_E, x_A, x_F, x_L) like OutputBlock.forward."""
    n_atoms = h.shape[0]                  # h only contributes its leading dim
    n_edges, emb_edge = m.shape
    emb_rbf = rbf.shape[1]
    emb_atom = params["w_e1"].shape[1]

    # ---- device VMEM (for tile sizing / vmem_limit clamping) -----------------
    try:
        vmem_cap = int(pltpu.get_tpu_info().vmem_capacity_bytes)
    except Exception:
        vmem_cap = 64 * 2**20             # conservative (v7x per-core)

    # ---- padded / tiled geometry ----------------------------------------------
    if tile_e is None:
        tile_e = 1024 if vmem_cap >= 96 * 2**20 else 512
    tile_e = min(tile_e, _round_up(n_edges, 128))        # multiple of 128
    n_edges_pad = _round_up(n_edges, tile_e)
    n_tiles = n_edges_pad // tile_e

    if tile_a is None:
        tile_a = 256
    tile_a = min(tile_a, _round_up(n_atoms, 8))          # multiple of 8
    n_atoms_pad = _round_up(n_atoms, tile_a)
    n_atom_tiles = n_atoms_pad // tile_a

    # A tile of tile_e sorted edges covers <= tile_e ranks; +8 for the 8-aligned
    # window start. Multiple of 8 by construction.
    atom_window = min(n_atoms_pad, tile_e + 8)

    pad_t = _round_up(num_targets, 128)                  # lane-dense output heads
    pad_l = _round_up(9, 128)

    bf16, f32 = jnp.bfloat16, jnp.float32

    # ---- sort edges by destination atom; dense-rank scatter rows -------------
    id_j = id_j.astype(jnp.int32)
    perm = jnp.argsort(id_j)
    inv_perm = jnp.argsort(perm)                         # original edge -> sorted pos
    id_s = id_j[perm]
    m_s = m[perm].astype(bf16)
    rbf_s = rbf[perm].astype(bf16)

    # rank[i] = #distinct ids among id_s[0..i] - 1 : non-decreasing, steps <= 1,
    # so the rank spread inside any tile is <= tile_e - 1 regardless of the graph.
    newgrp = jnp.concatenate(
        [jnp.zeros((1,), jnp.int32), (id_s[1:] != id_s[:-1]).astype(jnp.int32)])
    rank = jnp.cumsum(newgrp)                            # (n_edges,) int32
    rank_to_atom = jnp.full((n_atoms_pad,), n_atoms, jnp.int32).at[rank].set(id_s)

    pad_e = n_edges_pad - n_edges
    m_p = jnp.pad(m_s, ((0, pad_e), (0, 0)))
    rbf_p = jnp.pad(rbf_s, ((0, pad_e), (0, 0)))
    # padded edges get rank == n_atoms_pad -> outside every window (and m == 0).
    rank_p = jnp.pad(rank, (0, pad_e), constant_values=n_atoms_pad)
    rows_2d = rank_p.reshape(1, n_edges_pad)

    # per-tile scatter-window offsets (scalar-prefetched into SMEM)
    tile_min = jnp.min(rank_p.reshape(n_tiles, tile_e), axis=1)
    row_off = jnp.clip((tile_min // 8) * 8, 0, n_atoms_pad - atom_window)
    row_off = row_off.astype(jnp.int32)

    # ---- weights ---------------------------------------------------------------
    w_rbf_cat = jnp.concatenate(
        [params["w_rbf_e"], params["w_rbf_f"], params["w_rbf_l"]], axis=1).astype(bf16)

    def pad_cols(w, n):
        return jnp.pad(w, ((0, 0), (0, n - w.shape[1]))).astype(bf16)

    edge_weights = [
        w_rbf_cat,
        params["w_f1"].astype(bf16), params["w_res_f"].astype(bf16),
        pad_cols(params["w_out_f"], pad_t),
    ]
    atom_weights = [
        params["w_e1"].astype(bf16), params["w_res_e"].astype(bf16),
        pad_cols(params["w_out_e"], pad_t),
        params["w_l1"].astype(bf16), params["w_res_l"].astype(bf16),
        pad_cols(params["w_out_l"], pad_l),
    ]

    def const_spec(shape, pipeline_mode):
        idx = lambda *args: (0,) * len(shape)
        if pipeline_mode is None:
            return pl.BlockSpec(shape, idx)
        return pl.BlockSpec(shape, idx, pipeline_mode=pipeline_mode)

    def vmem_limit(nbytes):
        return int(min(0.9 * vmem_cap, max(32 * 2**20, nbytes)))

    def launch(weight_mode):
        # ------------------ edge kernel: streamed over edge tiles --------------
        edge_in_specs = [
            pl.BlockSpec((1, tile_e), lambda e, off: (0, e)),           # rank rows
            pl.BlockSpec((tile_e, emb_edge), lambda e, off: (e, 0)),    # m
            pl.BlockSpec((tile_e, emb_rbf), lambda e, off: (e, 0)),     # rbf
        ] + [const_spec(tuple(w.shape), weight_mode) for w in edge_weights]
        # TODO(synk): single-buffer the two resident scatter outputs as well once
        #             output-side pipeline_mode semantics are verified.
        edge_out_specs = (
            pl.BlockSpec((tile_e, pad_t), lambda e, off: (e, 0)),          # forces (bf16)
            pl.BlockSpec((n_atoms_pad, emb_edge), lambda e, off: (0, 0)),  # scatter E
            pl.BlockSpec((n_atoms_pad, emb_edge), lambda e, off: (0, 0)),  # scatter L
        )
        edge_weight_bytes = sum(int(w.size) * 2 for w in edge_weights)
        edge_bytes = (
            edge_weight_bytes * (1 if weight_mode is not None else 2)
            + 2 * tile_e * (2 * emb_edge + 2 * emb_rbf + 4)   # m, rbf, rows (x2 buf)
            + 2 * tile_e * pad_t * 2                          # f_out (x2 buf, bf16)
            + 2 * n_atoms_pad * emb_edge * 4 * 2              # resident scatter outs
            + atom_window * tile_e * 2                        # seg
            + tile_e * 3 * emb_edge * 4                       # rbf_emb
            + 6 * tile_e * emb_edge * 4)                      # MLP transients
        edge_flops = (
            2 * n_edges_pad * emb_rbf * 3 * emb_edge
            + 2 * n_edges_pad * atom_window * 2 * emb_edge
            + 2 * n_edges_pad * emb_edge * emb_edge * (1 + 2 * n_hidden)
            + 2 * n_edges_pad * emb_edge * pad_t)
        f_out, sc_e, sc_l = pl.pallas_call(
            functools.partial(_edge_kernel, n_hidden=n_hidden,
                              atom_window=atom_window),
            grid_spec=pltpu.PrefetchScalarGridSpec(
                num_scalar_prefetch=1,
                grid=(n_tiles,),
                in_specs=edge_in_specs,
                out_specs=edge_out_specs),
            out_shape=(
                jax.ShapeDtypeStruct((n_edges_pad, pad_t), bf16),
                jax.ShapeDtypeStruct((n_atoms_pad, emb_edge), f32),
                jax.ShapeDtypeStruct((n_atoms_pad, emb_edge), f32),
            ),
            compiler_params=pltpu.CompilerParams(
                dimension_semantics=("arbitrary",),   # scatter carries across tiles
                vmem_limit_bytes=vmem_limit(edge_bytes)),
            cost_estimate=pl.CostEstimate(
                flops=int(edge_flops),
                transcendentals=int(n_edges_pad * emb_edge * (1 + 2 * n_hidden)),
                bytes_accessed=int(
                    n_edges_pad * (2 * emb_edge + 2 * emb_rbf + 4 + 2 * pad_t)
                    + edge_weight_bytes + 8 * n_atoms_pad * emb_edge)),
        )(row_off, rows_2d, m_p, rbf_p, *edge_weights)

        # ------------------ atom kernel: parallel over atom/rank tiles ---------
        atom_in_specs = [
            pl.BlockSpec((tile_a, emb_edge), lambda a: (a, 0)),
            pl.BlockSpec((tile_a, emb_edge), lambda a: (a, 0)),
        ] + [const_spec(tuple(w.shape), weight_mode) for w in atom_weights]
        atom_out_specs = (
            pl.BlockSpec((tile_a, pad_t), lambda a: (a, 0)),
            pl.BlockSpec((tile_a, pad_l), lambda a: (a, 0)),
        )
        atom_weight_bytes = sum(int(w.size) * 2 for w in atom_weights)
        atom_bytes = (atom_weight_bytes * (1 if weight_mode is not None else 2)
                      + 2 * tile_a * (2 * emb_edge + pad_t + pad_l) * 4
                      + 6 * tile_a * max(emb_atom, emb_edge) * 4)
        atom_flops = (
            2 * n_atoms_pad * (emb_edge * emb_atom
                               + 2 * n_hidden * emb_atom * emb_atom
                               + emb_atom * pad_t)
            + 2 * n_atoms_pad * (emb_edge * emb_edge * (1 + 2 * n_hidden)
                                 + emb_edge * pad_l))
        e_out, l_out = pl.pallas_call(
            functools.partial(_atom_kernel, n_hidden=n_hidden),
            grid=(n_atom_tiles,),
            in_specs=atom_in_specs,
            out_specs=atom_out_specs,
            out_shape=(
                jax.ShapeDtypeStruct((n_atoms_pad, pad_t), f32),
                jax.ShapeDtypeStruct((n_atoms_pad, pad_l), f32),
            ),
            compiler_params=pltpu.CompilerParams(
                dimension_semantics=("parallel",),
                vmem_limit_bytes=vmem_limit(atom_bytes)),
            cost_estimate=pl.CostEstimate(
                flops=int(atom_flops),
                transcendentals=int(n_atoms_pad * (emb_atom + emb_edge)
                                    * (1 + 2 * n_hidden)),
                bytes_accessed=int(n_atoms_pad * (2 * emb_edge + pad_t + pad_l) * 4
                                   + atom_weight_bytes)),
        )(sc_e, sc_l, *atom_weights)
        return e_out, f_out, l_out

    try:
        # single-buffer the resident weights (constant index maps)
        e_out, f_out, l_out = launch(pl.Buffered(1))
    except Exception:
        # fallback: default (double-buffered) specs
        e_out, f_out, l_out = launch(None)

    # ---- wrapper epilogue: rank -> atom re-expansion, undo the edge sort -------
    x_e = jnp.zeros((n_atoms, num_targets), f32).at[rank_to_atom, :].set(
        e_out[:, :num_targets], mode="drop")
    x_l = jnp.zeros((n_atoms, 9), f32).at[rank_to_atom, :].set(
        l_out[:, :9], mode="drop")
    x_f = f_out[inv_perm, :num_targets].astype(f32)
    x_a = 0   # regress_atoms=False (default)
    return x_e, x_a, x_f, x_l


def init_params(key, emb_atom, emb_edge, emb_rbf, n_hidden, num_targets):
    """Deterministic synthetic weights (He-like scaling, no checkpoint load)."""
    def dense(k, fan_in, fan_out):
        return jax.random.normal(k, (fan_in, fan_out), jnp.float32) / math.sqrt(fan_in)

    ks = jax.random.split(key, 12)
    return {
        "w_rbf_e": dense(ks[0], emb_rbf, emb_edge),
        "w_e1":    dense(ks[1], emb_edge, emb_atom),
        "w_res_e": jax.random.normal(ks[2], (2 * n_hidden, emb_atom, emb_atom),
                                     jnp.float32) / math.sqrt(emb_atom),
        "w_out_e": dense(ks[3], emb_atom, num_targets),
        "w_f1":    dense(ks[4], emb_edge, emb_edge),
        "w_res_f": jax.random.normal(ks[5], (2 * n_hidden, emb_edge, emb_edge),
                                     jnp.float32) / math.sqrt(emb_edge),
        "w_rbf_f": dense(ks[6], emb_rbf, emb_edge),
        "w_out_f": dense(ks[7], emb_edge, num_targets),
        "w_rbf_l": dense(ks[8], emb_rbf, emb_edge),
        "w_l1":    dense(ks[9], emb_edge, emb_edge),
        "w_res_l": jax.random.normal(ks[10], (2 * n_hidden, emb_edge, emb_edge),
                                     jnp.float32) / math.sqrt(emb_edge),
        "w_out_l": dense(ks[11], emb_edge, 9),
    }


def reference(h, m, rbf, id_j, params, n_hidden, compute_dtype=jnp.float32):
    """Pure-JAX reference matching the PyTorch forward.
    With compute_dtype=bfloat16 it rounds matmul operands like the kernel does
    (accumulation stays f32)."""
    cast = lambda a: a.astype(compute_dtype)

    def dot(a, b):
        return jnp.dot(cast(a), cast(b), preferred_element_type=jnp.float32)

    def mlp(x, w1, wres):
        x = _scaled_silu(dot(x, w1))
        for i in range(n_hidden):
            y = _scaled_silu(dot(x, wres[2 * i]))
            y = _scaled_silu(dot(y, wres[2 * i + 1]))
            x = (x + y) * INV_SQRT2
        return x

    n_atoms = h.shape[0]
    m_c = cast(m).astype(jnp.float32)

    x = m_c * dot(rbf, params["w_rbf_e"])
    x_e = jax.ops.segment_sum(cast(x).astype(jnp.float32), id_j, num_segments=n_atoms)
    x_e = mlp(x_e, params["w_e1"], params["w_res_e"])
    x_e = dot(x_e, params["w_out_e"])

    x_f = mlp(m_c, params["w_f1"], params["w_res_f"])
    x_f = x_f * dot(rbf, params["w_rbf_f"])
    x_f = dot(x_f, params["w_out_f"])

    x_l = m_c * dot(rbf, params["w_rbf_l"])
    x_l = jax.ops.segment_sum(cast(x_l).astype(jnp.float32), id_j, num_segments=n_atoms)
    x_l = mlp(x_l, params["w_l1"], params["w_res_l"])
    x_l = dot(x_l, params["w_out_l"])
    return x_e, x_f, x_l


def _run_case(n_atoms, n_edges, emb_atom, emb_edge, emb_rbf, n_hidden,
              num_targets, tile_e, seed):
    key = jax.random.PRNGKey(seed)
    k_h, k_m, k_rbf, k_id, k_p = jax.random.split(key, 5)
    h = jax.random.normal(k_h, (n_atoms, emb_atom), jnp.float32)
    m = jax.random.normal(k_m, (n_edges, emb_edge), jnp.float32)
    rbf = jax.random.normal(k_rbf, (n_edges, emb_rbf), jnp.float32)
    id_j = jax.random.randint(k_id, (n_edges,), 0, n_atoms, jnp.int32)
    params = init_params(k_p, emb_atom, emb_edge, emb_rbf, n_hidden, num_targets)

    x_e, x_a, x_f, x_l = output_block(h, m, rbf, id_j, params,
                                      n_hidden=n_hidden, num_targets=num_targets,
                                      tile_e=tile_e)
    jax.block_until_ready((x_e, x_f, x_l))

    assert x_e.shape == (n_atoms, num_targets)
    assert x_f.shape == (n_edges, num_targets)
    assert x_l.shape == (n_atoms, 9)
    assert x_a == 0

    # Tight check vs. a reference using the same bf16-on-MXU rounding.
    rb_e, rb_f, rb_l = reference(h, m, rbf, id_j, params, n_hidden,
                                 compute_dtype=jnp.bfloat16)
    assert jnp.allclose(x_e, rb_e, rtol=2e-2, atol=2e-3)
    assert jnp.allclose(x_f, rb_f, rtol=2e-2, atol=2e-3)
    assert jnp.allclose(x_l, rb_l, rtol=2e-2, atol=2e-3)

    # Loose check vs. the full-f32 reference (bounds the bf16 precision drift).
    r_e, r_f, r_l = reference(h, m, rbf, id_j, params, n_hidden)
    assert jnp.allclose(x_e, r_e, rtol=1e-1, atol=1e-1)
    assert jnp.allclose(x_f, r_f, rtol=1e-1, atol=1e-1)
    assert jnp.allclose(x_l, r_l, rtol=1e-1, atol=1e-1)


if __name__ == "__main__":
    # small case: single edge tile (grid = 1), window spans the whole accumulator
    _run_case(n_atoms=8, n_edges=32, emb_atom=32, emb_edge=32, emb_rbf=16,
              n_hidden=2, num_targets=1, tile_e=512, seed=0)
    # multi-edge-tile case: exercises the accumulator init / carried scatter
    # across 3 edge tiles plus edge/atom padding.
    _run_case(n_atoms=20, n_edges=300, emb_atom=64, emb_edge=64, emb_rbf=16,
              n_hidden=1, num_targets=2, tile_e=128, seed=1)
    # windowed-scatter case: n_atoms_pad (512) > atom window (136), nonzero
    # scalar-prefetched row offsets, 2 atom tiles in the 'parallel' atom kernel.
    _run_case(n_atoms=300, n_edges=600, emb_atom=32, emb_edge=64, emb_rbf=16,
              n_hidden=1, num_targets=1, tile_e=128, seed=2)
    print("KERNEL_OK")
</pallas_src>

<mosaic_0001>
module attributes {stable_mosaic.version = 11 : i64} {
  func.func @_edge_kernel(%arg0: i32, %arg1: memref<1xi32, #tpu.memory_space<smem>>, %arg2: memref<1x128xi32, #tpu.memory_space<vmem>>, %arg3: memref<128x32xbf16, #tpu.memory_space<vmem>>, %arg4: memref<128x16xbf16, #tpu.memory_space<vmem>>, %arg5: memref<16x96xbf16, #tpu.memory_space<vmem>>, %arg6: memref<32x32xbf16, #tpu.memory_space<vmem>>, %arg7: memref<4x32x32xbf16, #tpu.memory_space<vmem>>, %arg8: memref<32x128xbf16, #tpu.memory_space<vmem>>, %arg9: memref<128x128xbf16, #tpu.memory_space<vmem>>, %arg10: memref<8x32xf32, #tpu.memory_space<vmem>>, %arg11: memref<8x32xf32, #tpu.memory_space<vmem>>) attributes {dimension_semantics = [#tpu.dimension_semantics<arbitrary>], iteration_bounds = array<i64: 1>, scalar_prefetch = 1 : i64, scratch_operands = 0 : i64, tpu.core_type = #tpu.core_type<tc>, window_params = [{transform_indices = @transform_0, window_bounds = array<i64: 1, 128>}, {transform_indices = @transform_1, window_bounds = array<i64: 128, 32>}, {transform_indices = @transform_2, window_bounds = array<i64: 128, 16>}, {pipeline_mode = #tpu.pipeline_mode<synchronous>, transform_indices = @transform_3, window_bounds = array<i64: 16, 96>}, {pipeline_mode = #tpu.pipeline_mode<synchronous>, transform_indices = @transform_4, window_bounds = array<i64: 32, 32>}, {pipeline_mode = #tpu.pipeline_mode<synchronous>, transform_indices = @transform_5, window_bounds = array<i64: 4, 32, 32>}, {pipeline_mode = #tpu.pipeline_mode<synchronous>, transform_indices = @transform_6, window_bounds = array<i64: 32, 128>}, {transform_indices = @transform_7, window_bounds = array<i64: 128, 128>}, {pipeline_mode = #tpu.pipeline_mode<synchronous>, transform_indices = @transform_8, window_bounds = array<i64: 8, 32>}, {pipeline_mode = #tpu.pipeline_mode<synchronous>, transform_indices = @transform_9, window_bounds = array<i64: 8, 32>}]} {
    %c0_i32 = arith.constant 0 : i32
    %0 = arith.cmpi eq, %arg0, %c0_i32 : i32
    %1 = arith.extui %0 : i1 to i32
    %c0_i32_0 = arith.constant 0 : i32
    %2 = arith.cmpi ne, %1, %c0_i32_0 : i32
    scf.if %2 {
      %cst_51 = arith.constant 0.000000e+00 : f32
      %105 = vector.broadcast %cst_51 : f32 to vector<8x32xf32>
      %c0_52 = arith.constant 0 : index
      %c0_53 = arith.constant 0 : index
      %106 = vector.load %arg10[%c0_52, %c0_53] : memref<8x32xf32, #tpu.memory_space<vmem>>, vector<8x32xf32>
      tpu.vector_store %arg10[%c0_52, %c0_53], %105 {strides = array<i32>} : memref<8x32xf32, #tpu.memory_space<vmem>>, vector<8x32xf32>,
      %cst_54 = arith.constant 0.000000e+00 : f32
      %107 = vector.broadcast %cst_54 : f32 to vector<8x32xf32>
      %c0_55 = arith.constant 0 : index
      %c0_56 = arith.constant 0 : index
      %108 = vector.load %arg11[%c0_55, %c0_56] : memref<8x32xf32, #tpu.memory_space<vmem>>, vector<8x32xf32>
      tpu.vector_store %arg11[%c0_55, %c0_56], %107 {strides = array<i32>} : memref<8x32xf32, #tpu.memory_space<vmem>>, vector<8x32xf32>,
    } else {
    }
    %c0 = arith.constant 0 : index
    %c0_1 = arith.constant 0 : index
    %3 = vector.load %arg3[%c0, %c0_1] : memref<128x32xbf16, #tpu.memory_space<vmem>>, vector<128x32xbf16>
    %c0_2 = arith.constant 0 : index
    %c0_3 = arith.constant 0 : index
    %4 = vector.load %arg4[%c0_2, %c0_3] : memref<128x16xbf16, #tpu.memory_space<vmem>>, vector<128x16xbf16>
    %c0_4 = arith.constant 0 : index
    %c0_5 = arith.constant 0 : index
    %5 = vector.load %arg5[%c0_4, %c0_5] : memref<16x96xbf16, #tpu.memory_space<vmem>>, vector<16x96xbf16>
    %cst = arith.constant dense<0.000000e+00> : vector<128x96xf32>
    %6 = tpu.matmul %4, %5, %cst {dimension_numbers = #tpu.dot_dimension_numbers<[1], [0], [0], [1], [0, 0, 1, 1], [], []>} : vector<128x16xbf16>, vector<16x96xbf16>, vector<128x96xf32> -> vector<128x96xf32>
    %7 = arith.extf %3 : vector<128x32xbf16> to vector<128x32xf32>
    %8 = vector.extract_strided_slice %6 {offsets = [0, 0], sizes = [128, 32], strides = [1, 1]} : vector<128x96xf32> to vector<128x32xf32>
    %9 = arith.mulf %7, %8 : vector<128x32xf32>
    %10 = arith.truncf %9 : vector<128x32xf32> to vector<128x32xbf16>
    %11 = vector.extract_strided_slice %6 {offsets = [0, 64], sizes = [128, 32], strides = [1, 1]} : vector<128x96xf32> to vector<128x32xf32>
    %12 = arith.mulf %7, %11 : vector<128x32xf32>
    %13 = arith.truncf %12 : vector<128x32xf32> to vector<128x32xbf16>
    %14 = arith.index_cast %arg0 : i32 to index
    %15 = memref.load %arg1[%14] : memref<1xi32, #tpu.memory_space<smem>>
    %16 = tpu.assume_multiple %15, 8 : i32
    %c0_6 = arith.constant 0 : index
    %c0_7 = arith.constant 0 : index
    %17 = vector.load %arg2[%c0_6, %c0_7] : memref<1x128xi32, #tpu.memory_space<vmem>>, vector<1x128xi32>
    %18 = tpu.iota {dimensions = array<i32: 0>} : vector<8x128xi32>
    %19 = vector.broadcast %16 : i32 to vector<8x128xi32>
    %20 = arith.addi %18, %19 : vector<8x128xi32>
    %21 = vector.broadcast %17 : vector<1x128xi32> to vector<8x128xi32>
    %22 = arith.cmpi eq, %20, %21 : vector<8x128xi32>
    %23 = arith.extui %22 : vector<8x128xi1> to vector<8x128xi32>
    %24 = arith.sitofp %23 : vector<8x128xi32> to vector<8x128xf32>
    %25 = arith.truncf %24 : vector<8x128xf32> to vector<8x128xbf16>
    %cst_8 = arith.constant dense<0.000000e+00> : vector<8x32xf32>
    %26 = tpu.matmul %25, %10, %cst_8 {dimension_numbers = #tpu.dot_dimension_numbers<[1], [0], [0], [1], [0, 0, 1, 1], [], []>} : vector<8x128xbf16>, vector<128x32xbf16>, vector<8x32xf32> -> vector<8x32xf32>
    %cst_9 = arith.constant dense<0.000000e+00> : vector<8x32xf32>
    %27 = tpu.matmul %25, %13, %cst_9 {dimension_numbers = #tpu.dot_dimension_numbers<[1], [0], [0], [1], [0, 0, 1, 1], [], []>} : vector<8x128xbf16>, vector<128x32xbf16>, vector<8x32xf32> -> vector<8x32xf32>
    %c0_10 = arith.constant 0 : index
    %c0_11 = arith.constant 0 : index
    %28 = vector.load %arg10[%c0_10, %c0_11] : memref<8x32xf32, #tpu.memory_space<vmem>>, vector<8x32xf32>
    %29 = arith.addf %28, %26 : vector<8x32xf32>
    %c0_12 = arith.constant 0 : index
    %c0_13 = arith.constant 0 : index
    %30 = vector.load %arg10[%c0_12, %c0_13] : memref<8x32xf32, #tpu.memory_space<vmem>>, vector<8x32xf32>
    tpu.vector_store %arg10[%c0_12, %c0_13], %29 {strides = array<i32>} : memref<8x32xf32, #tpu.memory_space<vmem>>, vector<8x32xf32>,
    %c0_14 = arith.constant 0 : index
    %c0_15 = arith.constant 0 : index
    %31 = vector.load %arg11[%c0_14, %c0_15] : memref<8x32xf32, #tpu.memory_space<vmem>>, vector<8x32xf32>
    %32 = arith.addf %31, %27 : vector<8x32xf32>
    %c0_16 = arith.constant 0 : index
    %c0_17 = arith.constant 0 : index
    %33 = vector.load %arg11[%c0_16, %c0_17] : memref<8x32xf32, #tpu.memory_space<vmem>>, vector<8x32xf32>
    tpu.vector_store %arg11[%c0_16, %c0_17], %32 {strides = array<i32>} : memref<8x32xf32, #tpu.memory_space<vmem>>, vector<8x32xf32>,
    %c0_18 = arith.constant 0 : index
    %c0_19 = arith.constant 0 : index
    %34 = vector.load %arg6[%c0_18, %c0_19] : memref<32x32xbf16, #tpu.memory_space<vmem>>, vector<32x32xbf16>
    %cst_20 = arith.constant dense<0.000000e+00> : vector<128x32xf32>
    %35 = tpu.matmul %3, %34, %cst_20 {dimension_numbers = #tpu.dot_dimension_numbers<[1], [0], [0], [1], [0, 0, 1, 1], [], []>} : vector<128x32xbf16>, vector<32x32xbf16>, vector<128x32xf32> -> vector<128x32xf32>
    %36 = arith.negf %35 : vector<128x32xf32>
    %37 = math.exp %36 : vector<128x32xf32>
    %cst_21 = arith.constant 1.000000e+00 : f32
    %38 = vector.broadcast %cst_21 : f32 to vector<128x32xf32>
    %39 = arith.addf %38, %37 : vector<128x32xf32>
    %40 = arith.divf %38, %39 : vector<128x32xf32>
    %41 = arith.mulf %35, %40 : vector<128x32xf32>
    %cst_22 = arith.constant 1.66666663 : f32
    %42 = vector.broadcast %cst_22 : f32 to vector<128x32xf32>
    %43 = arith.mulf %41, %42 : vector<128x32xf32>
    %c0_23 = arith.constant 0 : index
    %c0_24 = arith.constant 0 : index
    %c0_25 = arith.constant 0 : index
    %44 = vector.load %arg7[%c0_23, %c0_24, %c0_25] : memref<4x32x32xbf16, #tpu.memory_space<vmem>>, vector<1x32x32xbf16>
    %45 = vector.shape_cast %44 : vector<1x32x32xbf16> to vector<32x32xbf16>
    %46 = arith.truncf %43 : vector<128x32xf32> to vector<128x32xbf16>
    %cst_26 = arith.constant dense<0.000000e+00> : vector<128x32xf32>
    %47 = tpu.matmul %46, %45, %cst_26 {dimension_numbers = #tpu.dot_dimension_numbers<[1], [0], [0], [1], [0, 0, 1, 1], [], []>} : vector<128x32xbf16>, vector<32x32xbf16>, vector<128x32xf32> -> vector<128x32xf32>
    %48 = arith.negf %47 : vector<128x32xf32>
    %49 = math.exp %48 : vector<128x32xf32>
    %cst_27 = arith.constant 1.000000e+00 : f32
    %50 = vector.broadcast %cst_27 : f32 to vector<128x32xf32>
    %51 = arith.addf %50, %49 : vector<128x32xf32>
    %52 = arith.divf %50, %51 : vector<128x32xf32>
    %53 = arith.mulf %47, %52 : vector<128x32xf32>
    %cst_28 = arith.constant 1.66666663 : f32
    %54 = vector.broadcast %cst_28 : f32 to vector<128x32xf32>
    %55 = arith.mulf %53, %54 : vector<128x32xf32>
    %c1 = arith.constant 1 : index
    %c0_29 = arith.constant 0 : index
    %c0_30 = arith.constant 0 : index
    %56 = vector.load %arg7[%c1, %c0_29, %c0_30] : memref<4x32x32xbf16, #tpu.memory_space<vmem>>, vector<1x32x32xbf16>
    %57 = vector.shape_cast %56 : vector<1x32x32xbf16> to vector<32x32xbf16>
    %58 = arith.truncf %55 : vector<128x32xf32> to vector<128x32xbf16>
    %cst_31 = arith.constant dense<0.000000e+00> : vector<128x32xf32>
    %59 = tpu.matmul %58, %57, %cst_31 {dimension_numbers = #tpu.dot_dimension_numbers<[1], [0], [0], [1], [0, 0, 1, 1], [], []>} : vector<128x32xbf16>, vector<32x32xbf16>, vector<128x32xf32> -> vector<128x32xf32>
    %60 = arith.negf %59 : vector<128x32xf32>
    %61 = math.exp %60 : vector<128x32xf32>
    %cst_32 = arith.constant 1.000000e+00 : f32
    %62 = vector.broadcast %cst_32 : f32 to vector<128x32xf32>
    %63 = arith.addf %62, %61 : vector<128x32xf32>
    %64 = arith.divf %62, %63 : vector<128x32xf32>
    %65 = arith.mulf %59, %64 : vector<128x32xf32>
    %cst_33 = arith.constant 1.66666663 : f32
    %66 = vector.broadcast %cst_33 : f32 to vector<128x32xf32>
    %67 = arith.mulf %65, %66 : vector<128x32xf32>
    %68 = arith.addf %43, %67 : vector<128x32xf32>
    %cst_34 = arith.constant 0.707106769 : f32
    %69 = vector.broadcast %cst_34 : f32 to vector<128x32xf32>
    %70 = arith.mulf %68, %69 : vector<128x32xf32>
    %c2 = arith.constant 2 : index
    %c0_35 = arith.constant 0 : index
    %c0_36 = arith.constant 0 : index
    %71 = vector.load %arg7[%c2, %c0_35, %c0_36] : memref<4x32x32xbf16, #tpu.memory_space<vmem>>, vector<1x32x32xbf16>
    %72 = vector.shape_cast %71 : vector<1x32x32xbf16> to vector<32x32xbf16>
    %73 = arith.truncf %70 : vector<128x32xf32> to vector<128x32xbf16>
    %cst_37 = arith.constant dense<0.000000e+00> : vector<128x32xf32>
    %74 = tpu.matmul %73, %72, %cst_37 {dimension_numbers = #tpu.dot_dimension_numbers<[1], [0], [0], [1], [0, 0, 1, 1], [], []>} : vector<128x32xbf16>, vector<32x32xbf16>, vector<128x32xf32> -> vector<128x32xf32>
    %75 = arith.negf %74 : vector<128x32xf32>
    %76 = math.exp %75 : vector<128x32xf32>
    %cst_38 = arith.constant 1.000000e+00 : f32
    %77 = vector.broadcast %cst_38 : f32 to vector<128x32xf32>
    %78 = arith.addf %77, %76 : vector<128x32xf32>
    %79 = arith.divf %77, %78 : vector<128x32xf32>
    %80 = arith.mulf %74, %79 : vector<128x32xf32>
    %cst_39 = arith.constant 1.66666663 : f32
    %81 = vector.broadcast %cst_39 : f32 to vector<128x32xf32>
    %82 = arith.mulf %80, %81 : vector<128x32xf32>
    %c3 = arith.constant 3 : index
    %c0_40 = arith.constant 0 : index
    %c0_41 = arith.constant 0 : index
    %83 = vector.load %arg7[%c3, %c0_40, %c0_41] : memref<4x32x32xbf16, #tpu.memory_space<vmem>>, vector<1x32x32xbf16>
    %84 = vector.shape_cast %83 : vector<1x32x32xbf16> to vector<32x32xbf16>
    %85 = arith.truncf %82 : vector<128x32xf32> to vector<128x32xbf16>
    %cst_42 = arith.constant dense<0.000000e+00> : vector<128x32xf32>
    %86 = tpu.matmul %85, %84, %cst_42 {dimension_numbers = #tpu.dot_dimension_numbers<[1], [0], [0], [1], [0, 0, 1, 1], [], []>} : vector<128x32xbf16>, vector<32x32xbf16>, vector<128x32xf32> -> vector<128x32xf32>
    %87 = arith.negf %86 : vector<128x32xf32>
    %88 = math.exp %87 : vector<128x32xf32>
    %cst_43 = arith.constant 1.000000e+00 : f32
    %89 = vector.broadcast %cst_43 : f32 to vector<128x32xf32>
    %90 = arith.addf %89, %88 : vector<128x32xf32>
    %91 = arith.divf %89, %90 : vector<128x32xf32>
    %92 = arith.mulf %86, %91 : vector<128x32xf32>
    %cst_44 = arith.constant 1.66666663 : f32
    %93 = vector.broadcast %cst_44 : f32 to vector<128x32xf32>
    %94 = arith.mulf %92, %93 : vector<128x32xf32>
    %95 = arith.addf %70, %94 : vector<128x32xf32>
    %cst_45 = arith.constant 0.707106769 : f32
    %96 = vector.broadcast %cst_45 : f32 to vector<128x32xf32>
    %97 = arith.mulf %95, %96 : vector<128x32xf32>
    %98 = vector.extract_strided_slice %6 {offsets = [0, 32], sizes = [128, 32], strides = [1, 1]} : vector<128x96xf32> to vector<128x32xf32>
    %99 = arith.mulf %97, %98 : vector<128x32xf32>
    %c0_46 = arith.constant 0 : index
    %c0_47 = arith.constant 0 : index
    %100 = vector.load %arg8[%c0_46, %c0_47] : memref<32x128xbf16, #tpu.memory_space<vmem>>, vector<32x128xbf16>
    %101 = arith.truncf %99 : vector<128x32xf32> to vector<128x32xbf16>
    %cst_48 = arith.constant dense<0.000000e+00> : vector<128x128xf32>
    %102 = tpu.matmul %101, %100, %cst_48 {dimension_numbers = #tpu.dot_dimension_numbers<[1], [0], [0], [1], [0, 0, 1, 1], [], []>} : vector<128x32xbf16>, vector<32x128xbf16>, vector<128x128xf32> -> vector<128x128xf32>
    %103 = arith.truncf %102 : vector<128x128xf32> to vector<128x128xbf16>
    %c0_49 = arith.constant 0 : index
    %c0_50 = arith.constant 0 : index
    %104 = vector.load %arg9[%c0_49, %c0_50] : memref<128x128xbf16, #tpu.memory_space<vmem>>, vector<128x128xbf16>
    tpu.vector_store %arg9[%c0_49, %c0_50], %103 {strides = array<i32>} : memref<128x128xbf16, #tpu.memory_space<vmem>>, vector<128x128xbf16>,
    return
  }
  func.func @transform_0(%arg0: i32, %arg1: memref<1xi32, #tpu.memory_space<smem>>) -> (i32, i32) {
    %c0_i32 = arith.constant 0 : i32
    %c0_i32_0 = arith.constant 0 : i32
    return %c0_i32, %arg0 : i32, i32
  }
  func.func @transform_1(%arg0: i32, %arg1: memref<1xi32, #tpu.memory_space<smem>>) -> (i32, i32) {
    %c0_i32 = arith.constant 0 : i32
    %c0_i32_0 = arith.constant 0 : i32
    return %arg0, %c0_i32 : i32, i32
  }
  func.func @transform_2(%arg0: i32, %arg1: memref<1xi32, #tpu.memory_space<smem>>) -> (i32, i32) {
    %c0_i32 = arith.constant 0 : i32
    %c0_i32_0 = arith.constant 0 : i32
    return %arg0, %c0_i32 : i32, i32
  }
  func.func @transform_3(%arg0: i32, %arg1: memref<1xi32, #tpu.memory_space<smem>>) -> (i32, i32) {
    %c0_i32 = arith.constant 0 : i32
    %c0_i32_0 = arith.constant 0 : i32
    %c0_i32_1 = arith.constant 0 : i32
    return %c0_i32, %c0_i32_0 : i32, i32
  }
  func.func @transform_4(%arg0: i32, %arg1: memref<1xi32, #tpu.memory_space<smem>>) -> (i32, i32) {
    %c0_i32 = arith.constant 0 : i32
    %c0_i32_0 = arith.constant 0 : i32
    %c0_i32_1 = arith.constant 0 : i32
    return %c0_i32, %c0_i32_0 : i32, i32
  }
  func.func @transform_5(%arg0: i32, %arg1: memref<1xi32, #tpu.memory_space<smem>>) -> (i32, i32, i32) {
    %c0_i32 = arith.constant 0 : i32
    %c0_i32_0 = arith.constant 0 : i32
    %c0_i32_1 = arith.constant 0 : i32
    %c0_i32_2 = arith.constant 0 : i32
    return %c0_i32, %c0_i32_0, %c0_i32_1 : i32, i32, i32
  }
  func.func @transform_6(%arg0: i32, %arg1: memref<1xi32, #tpu.memory_space<smem>>) -> (i32, i32) {
    %c0_i32 = arith.constant 0 : i32
    %c0_i32_0 = arith.constant 0 : i32
    %c0_i32_1 = arith.constant 0 : i32
    return %c0_i32, %c0_i32_0 : i32, i32
  }
  func.func @transform_7(%arg0: i32, %arg1: memref<1xi32, #tpu.memory_space<smem>>) -> (i32, i32) {
    %c0_i32 = arith.constant 0 : i32
    %c0_i32_0 = arith.constant 0 : i32
    return %arg0, %c0_i32 : i32, i32
  }
  func.func @transform_8(%arg0: i32, %arg1: memref<1xi32, #tpu.memory_space<smem>>) -> (i32, i32) {
    %c0_i32 = arith.constant 0 : i32
    %c0_i32_0 = arith.constant 0 : i32
    %c0_i32_1 = arith.constant 0 : i32
    return %c0_i32, %c0_i32_0 : i32, i32
  }
  func.func @transform_9(%arg0: i32, %arg1: memref<1xi32, #tpu.memory_space<smem>>) -> (i32, i32) {
    %c0_i32 = arith.constant 0 : i32
    %c0_i32_0 = arith.constant 0 : i32
    %c0_i32_1 = arith.constant 0 : i32
    return %c0_i32, %c0_i32_0 : i32, i32
  }
}

module attributes {stable_mosaic.version = 11 : i64} {
  func.func @_edge_kernel(%arg0: i32, %arg1: memref<1xi32, #tpu.memory_space<smem>>, %arg2: memref<1x128xi32, #tpu.memory_space<vmem>>, %arg3: memref<128x32xbf16, #tpu.memory_space<vmem>>, %arg4: memref<128x16xbf16, #tpu.memory_space<vmem>>, %arg5: memref<16x96xbf16, #tpu.memory_space<vmem>>, %arg6: memref<32x32xbf16, #tpu.memory_space<vmem>>, %arg7: memref<4x32x32xbf16, #tpu.memory_space<vmem>>, %arg8: memref<32x128xbf16, #tpu.memory_space<vmem>>, %arg9: memref<128x128xbf16, #tpu.memory_space<vmem>>, %arg10: memref<8x32xf32, #tpu.memory_space<vmem>>, %arg11: memref<8x32xf32, #tpu.memory_space<vmem>>) attributes {dimension_semantics = [#tpu.dimension_semantics<arbitrary>], iteration_bounds = array<i64: 1>, scalar_prefetch = 1 : i64, scratch_operands = 0 : i64, tpu.core_type = #tpu.core_type<tc>, window_params = [{transform_indices = @transform_0, window_bounds = array<i64: 1, 128>}, {transform_indices = @transform_1, window_bounds = array<i64: 128, 32>}, {transform_indices = @transform_2, window_bounds = array<i64: 128, 16>}, {pipeline_mode = #tpu.pipeline_mode<synchronous>, transform_indices = @transform_3, window_bounds = array<i64: 16, 96>}, {pipeline_mode = #tpu.pipeline_mode<synchronous>, transform_indices = @transform_4, window_bounds = array<i64: 32, 32>}, {pipeline_mode = #tpu.pipeline_mode<synchronous>, transform_indices = @transform_5, window_bounds = array<i64: 4, 32, 32>}, {pipeline_mode = #tpu.pipeline_mode<synchronous>, transform_indices = @transform_6, window_bounds = array<i64: 32, 128>}, {transform_indices = @transform_7, window_bounds = array<i64: 128, 128>}, {pipeline_mode = #tpu.pipeline_mode<synchronous>, transform_indices = @transform_8, window_bounds = array<i64: 8, 32>}, {pipeline_mode = #tpu.pipeline_mode<synchronous>, transform_indices = @transform_9, window_bounds = array<i64: 8, 32>}]} {
    %c0_i32 = arith.constant 0 : i32
    %0 = arith.cmpi eq, %arg0, %c0_i32 : i32
    %1 = arith.extui %0 : i1 to i32
    %c0_i32_0 = arith.constant 0 : i32
    %2 = arith.cmpi ne, %1, %c0_i32_0 : i32
    scf.if %2 {
      %cst_51 = arith.constant 0.000000e+00 : f32
      %105 = vector.broadcast %cst_51 : f32 to vector<8x32xf32>
      %c0_52 = arith.constant 0 : index
      %c0_53 = arith.constant 0 : index
      %106 = vector.load %arg10[%c0_52, %c0_53] : memref<8x32xf32, #tpu.memory_space<vmem>>, vector<8x32xf32>
      tpu.vector_store %arg10[%c0_52, %c0_53], %105 {strides = array<i32>} : memref<8x32xf32, #tpu.memory_space<vmem>>, vector<8x32xf32>,
      %cst_54 = arith.constant 0.000000e+00 : f32
      %107 = vector.broadcast %cst_54 : f32 to vector<8x32xf32>
      %c0_55 = arith.constant 0 : index
      %c0_56 = arith.constant 0 : index
      %108 = vector.load %arg11[%c0_55, %c0_56] : memref<8x32xf32, #tpu.memory_space<vmem>>, vector<8x32xf32>
      tpu.vector_store %arg11[%c0_55, %c0_56], %107 {strides = array<i32>} : memref<8x32xf32, #tpu.memory_space<vmem>>, vector<8x32xf32>,
    } else {
    }
    %c0 = arith.constant 0 : index
    %c0_1 = arith.constant 0 : index
    %3 = vector.load %arg3[%c0, %c0_1] : memref<128x32xbf16, #tpu.memory_space<vmem>>, vector<128x32xbf16>
    %c0_2 = arith.constant 0 : index
    %c0_3 = arith.constant 0 : index
    %4 = vector.load %arg4[%c0_2, %c0_3] : memref<128x16xbf16, #tpu.memory_space<vmem>>, vector<128x16xbf16>
    %c0_4 = arith.constant 0 : index
    %c0_5 = arith.constant 0 : index
    %5 = vector.load %arg5[%c0_4, %c0_5] : memref<16x96xbf16, #tpu.memory_space<vmem>>, vector<16x96xbf16>
    %cst = arith.constant dense<0.000000e+00> : vector<128x96xf32>
    %6 = tpu.matmul %4, %5, %cst {dimension_numbers = #tpu.dot_dimension_numbers<[1], [0], [0], [1], [0, 0, 1, 1], [], []>} : vector<128x16xbf16>, vector<16x96xbf16>, vector<128x96xf32> -> vector<128x96xf32>
    %7 = arith.extf %3 : vector<128x32xbf16> to vector<128x32xf32>
    %8 = vector.extract_strided_slice %6 {offsets = [0, 0], sizes = [128, 32], strides = [1, 1]} : vector<128x96xf32> to vector<128x32xf32>
    %9 = arith.mulf %7, %8 : vector<128x32xf32>
    %10 = arith.truncf %9 : vector<128x32xf32> to vector<128x32xbf16>
    %11 = vector.extract_strided_slice %6 {offsets = [0, 64], sizes = [128, 32], strides = [1, 1]} : vector<128x96xf32> to vector<128x32xf32>
    %12 = arith.mulf %7, %11 : vector<128x32xf32>
    %13 = arith.truncf %12 : vector<128x32xf32> to vector<128x32xbf16>
    %14 = arith.index_cast %arg0 : i32 to index
    %15 = memref.load %arg1[%14] : memref<1xi32, #tpu.memory_space<smem>>
    %16 = tpu.assume_multiple %15, 8 : i32
    %c0_6 = arith.constant 0 : index
    %c0_7 = arith.constant 0 : index
    %17 = vector.load %arg2[%c0_6, %c0_7] : memref<1x128xi32, #tpu.memory_space<vmem>>, vector<1x128xi32>
    %18 = tpu.iota {dimensions = array<i32: 0>} : vector<8x128xi32>
    %19 = vector.broadcast %16 : i32 to vector<8x128xi32>
    %20 = arith.addi %18, %19 : vector<8x128xi32>
    %21 = vector.broadcast %17 : vector<1x128xi32> to vector<8x128xi32>
    %22 = arith.cmpi eq, %20, %21 : vector<8x128xi32>
    %23 = arith.extui %22 : vector<8x128xi1> to vector<8x128xi32>
    %24 = arith.sitofp %23 : vector<8x128xi32> to vector<8x128xf32>
    %25 = arith.truncf %24 : vector<8x128xf32> to vector<8x128xbf16>
    %cst_8 = arith.constant dense<0.000000e+00> : vector<8x32xf32>
    %26 = tpu.matmul %25, %10, %cst_8 {dimension_numbers = #tpu.dot_dimension_numbers<[1], [0], [0], [1], [0, 0, 1, 1], [], []>} : vector<8x128xbf16>, vector<128x32xbf16>, vector<8x32xf32> -> vector<8x32xf32>
    %cst_9 = arith.constant dense<0.000000e+00> : vector<8x32xf32>
    %27 = tpu.matmul %25, %13, %cst_9 {dimension_numbers = #tpu.dot_dimension_numbers<[1], [0], [0], [1], [0, 0, 1, 1], [], []>} : vector<8x128xbf16>, vector<128x32xbf16>, vector<8x32xf32> -> vector<8x32xf32>
    %c0_10 = arith.constant 0 : index
    %c0_11 = arith.constant 0 : index
    %28 = vector.load %arg10[%c0_10, %c0_11] : memref<8x32xf32, #tpu.memory_space<vmem>>, vector<8x32xf32>
    %29 = arith.addf %28, %26 : vector<8x32xf32>
    %c0_12 = arith.constant 0 : index
    %c0_13 = arith.constant 0 : index
    %30 = vector.load %arg10[%c0_12, %c0_13] : memref<8x32xf32, #tpu.memory_space<vmem>>, vector<8x32xf32>
    tpu.vector_store %arg10[%c0_12, %c0_13], %29 {strides = array<i32>} : memref<8x32xf32, #tpu.memory_space<vmem>>, vector<8x32xf32>,
    %c0_14 = arith.constant 0 : index
    %c0_15 = arith.constant 0 : index
    %31 = vector.load %arg11[%c0_14, %c0_15] : memref<8x32xf32, #tpu.memory_space<vmem>>, vector<8x32xf32>
    %32 = arith.addf %31, %27 : vector<8x32xf32>
    %c0_16 = arith.constant 0 : index
    %c0_17 = arith.constant 0 : index
    %33 = vector.load %arg11[%c0_16, %c0_17] : memref<8x32xf32, #tpu.memory_space<vmem>>, vector<8x32xf32>
    tpu.vector_store %arg11[%c0_16, %c0_17], %32 {strides = array<i32>} : memref<8x32xf32, #tpu.memory_space<vmem>>, vector<8x32xf32>,
    %c0_18 = arith.constant 0 : index
    %c0_19 = arith.constant 0 : index
    %34 = vector.load %arg6[%c0_18, %c0_19] : memref<32x32xbf16, #tpu.memory_space<vmem>>, vector<32x32xbf16>
    %cst_20 = arith.constant dense<0.000000e+00> : vector<128x32xf32>
    %35 = tpu.matmul %3, %34, %cst_20 {dimension_numbers = #tpu.dot_dimension_numbers<[1], [0], [0], [1], [0, 0, 1, 1], [], []>} : vector<128x32xbf16>, vector<32x32xbf16>, vector<128x32xf32> -> vector<128x32xf32>
    %36 = arith.negf %35 : vector<128x32xf32>
    %37 = math.exp %36 : vector<128x32xf32>
    %cst_21 = arith.constant 1.000000e+00 : f32
    %38 = vector.broadcast %cst_21 : f32 to vector<128x32xf32>
    %39 = arith.addf %38, %37 : vector<128x32xf32>
    %40 = arith.divf %38, %39 : vector<128x32xf32>
    %41 = arith.mulf %35, %40 : vector<128x32xf32>
    %cst_22 = arith.constant 1.66666663 : f32
    %42 = vector.broadcast %cst_22 : f32 to vector<128x32xf32>
    %43 = arith.mulf %41, %42 : vector<128x32xf32>
    %c0_23 = arith.constant 0 : index
    %c0_24 = arith.constant 0 : index
    %c0_25 = arith.constant 0 : index
    %44 = vector.load %arg7[%c0_23, %c0_24, %c0_25] : memref<4x32x32xbf16, #tpu.memory_space<vmem>>, vector<1x32x32xbf16>
    %45 = vector.shape_cast %44 : vector<1x32x32xbf16> to vector<32x32xbf16>
    %46 = arith.truncf %43 : vector<128x32xf32> to vector<128x32xbf16>
    %cst_26 = arith.constant dense<0.000000e+00> : vector<128x32xf32>
    %47 = tpu.matmul %46, %45, %cst_26 {dimension_numbers = #tpu.dot_dimension_numbers<[1], [0], [0], [1], [0, 0, 1, 1], [], []>} : vector<128x32xbf16>, vector<32x32xbf16>, vector<128x32xf32> -> vector<128x32xf32>
    %48 = arith.negf %47 : vector<128x32xf32>
    %49 = math.exp %48 : vector<128x32xf32>
    %cst_27 = arith.constant 1.000000e+00 : f32
    %50 = vector.broadcast %cst_27 : f32 to vector<128x32xf32>
    %51 = arith.addf %50, %49 : vector<128x32xf32>
    %52 = arith.divf %50, %51 : vector<128x32xf32>
    %53 = arith.mulf %47, %52 : vector<128x32xf32>
    %cst_28 = arith.constant 1.66666663 : f32
    %54 = vector.broadcast %cst_28 : f32 to vector<128x32xf32>
    %55 = arith.mulf %53, %54 : vector<128x32xf32>
    %c1 = arith.constant 1 : index
    %c0_29 = arith.constant 0 : index
    %c0_30 = arith.constant 0 : index
    %56 = vector.load %arg7[%c1, %c0_29, %c0_30] : memref<4x32x32xbf16, #tpu.memory_space<vmem>>, vector<1x32x32xbf16>
    %57 = vector.shape_cast %56 : vector<1x32x32xbf16> to vector<32x32xbf16>
    %58 = arith.truncf %55 : vector<128x32xf32> to vector<128x32xbf16>
    %cst_31 = arith.constant dense<0.000000e+00> : vector<128x32xf32>
    %59 = tpu.matmul %58, %57, %cst_31 {dimension_numbers = #tpu.dot_dimension_numbers<[1], [0], [0], [1], [0, 0, 1, 1], [], []>} : vector<128x32xbf16>, vector<32x32xbf16>, vector<128x32xf32> -> vector<128x32xf32>
    %60 = arith.negf %59 : vector<128x32xf32>
    %61 = math.exp %60 : vector<128x32xf32>
    %cst_32 = arith.constant 1.000000e+00 : f32
    %62 = vector.broadcast %cst_32 : f32 to vector<128x32xf32>
    %63 = arith.addf %62, %61 : vector<128x32xf32>
    %64 = arith.divf %62, %63 : vector<128x32xf32>
    %65 = arith.mulf %59, %64 : vector<128x32xf32>
    %cst_33 = arith.constant 1.66666663 : f32
    %66 = vector.broadcast %cst_33 : f32 to vector<128x32xf32>
    %67 = arith.mulf %65, %66 : vector<128x32xf32>
    %68 = arith.addf %43, %67 : vector<128x32xf32>
    %cst_34 = arith.constant 0.707106769 : f32
    %69 = vector.broadcast %cst_34 : f32 to vector<128x32xf32>
    %70 = arith.mulf %68, %69 : vector<128x32xf32>
    %c2 = arith.constant 2 : index
    %c0_35 = arith.constant 0 : index
    %c0_36 = arith.constant 0 : index
    %71 = vector.load %arg7[%c2, %c0_35, %c0_36] : memref<4x32x32xbf16, #tpu.memory_space<vmem>>, vector<1x32x32xbf16>
    %72 = vector.shape_cast %71 : vector<1x32x32xbf16> to vector<32x32xbf16>
    %73 = arith.truncf %70 : vector<128x32xf32> to vector<128x32xbf16>
    %cst_37 = arith.constant dense<0.000000e+00> : vector<128x32xf32>
    %74 = tpu.matmul %73, %72, %cst_37 {dimension_numbers = #tpu.dot_dimension_numbers<[1], [0], [0], [1], [0, 0, 1, 1], [], []>} : vector<128x32xbf16>, vector<32x32xbf16>, vector<128x32xf32> -> vector<128x32xf32>
    %75 = arith.negf %74 : vector<128x32xf32>
    %76 = math.exp %75 : vector<128x32xf32>
    %cst_38 = arith.constant 1.000000e+00 : f32
    %77 = vector.broadcast %cst_38 : f32 to vector<128x32xf32>
    %78 = arith.addf %77, %76 : vector<128x32xf32>
    %79 = arith.divf %77, %78 : vector<128x32xf32>
    %80 = arith.mulf %74, %79 : vector<128x32xf32>
    %cst_39 = arith.constant 1.66666663 : f32
    %81 = vector.broadcast %cst_39 : f32 to vector<128x32xf32>
    %82 = arith.mulf %80, %81 : vector<128x32xf32>
    %c3 = arith.constant 3 : index
    %c0_40 = arith.constant 0 : index
    %c0_41 = arith.constant 0 : index
    %83 = vector.load %arg7[%c3, %c0_40, %c0_41] : memref<4x32x32xbf16, #tpu.memory_space<vmem>>, vector<1x32x32xbf16>
    %84 = vector.shape_cast %83 : vector<1x32x32xbf16> to vector<32x32xbf16>
    %85 = arith.truncf %82 : vector<128x32xf32> to vector<128x32xbf16>
    %cst_42 = arith.constant dense<0.000000e+00> : vector<128x32xf32>
    %86 = tpu.matmul %85, %84, %cst_42 {dimension_numbers = #tpu.dot_dimension_numbers<[1], [0], [0], [1], [0, 0, 1, 1], [], []>} : vector<128x32xbf16>, vector<32x32xbf16>, vector<128x32xf32> -> vector<128x32xf32>
    %87 = arith.negf %86 : vector<128x32xf32>
    %88 = math.exp %87 : vector<128x32xf32>
    %cst_43 = arith.constant 1.000000e+00 : f32
    %89 = vector.broadcast %cst_43 : f32 to vector<128x32xf32>
    %90 = arith.addf %89, %88 : vector<128x32xf32>
    %91 = arith.divf %89, %90 : vector<128x32xf32>
    %92 = arith.mulf %86, %91 : vector<128x32xf32>
    %cst_44 = arith.constant 1.66666663 : f32
    %93 = vector.broadcast %cst_44 : f32 to vector<128x32xf32>
    %94 = arith.mulf %92, %93 : vector<128x32xf32>
    %95 = arith.addf %70, %94 : vector<128x32xf32>
    %cst_45 = arith.constant 0.707106769 : f32
    %96 = vector.broadcast %cst_45 : f32 to vector<128x32xf32>
    %97 = arith.mulf %95, %96 : vector<128x32xf32>
    %98 = vector.extract_strided_slice %6 {offsets = [0, 32], sizes = [128, 32], strides = [1, 1]} : vector<128x96xf32> to vector<128x32xf32>
    %99 = arith.mulf %97, %98 : vector<128x32xf32>
    %c0_46 = arith.constant 0 : index
    %c0_47 = arith.constant 0 : index
    %100 = vector.load %arg8[%c0_46, %c0_47] : memref<32x128xbf16, #tpu.memory_space<vmem>>, vector<32x128xbf16>
    %101 = arith.truncf %99 : vector<128x32xf32> to vector<128x32xbf16>
    %cst_48 = arith.constant dense<0.000000e+00> : vector<128x128xf32>
    %102 = tpu.matmul %101, %100, %cst_48 {dimension_numbers = #tpu.dot_dimension_numbers<[1], [0], [0], [1], [0, 0, 1, 1], [], []>} : vector<128x32xbf16>, vector<32x128xbf16>, vector<128x128xf32> -> vector<128x128xf32>
    %103 = arith.truncf %102 : vector<128x128xf32> to vector<128x128xbf16>
    %c0_49 = arith.constant 0 : index
    %c0_50 = arith.constant 0 : index
    %104 = vector.load %arg9[%c0_49, %c0_50] : memref<128x128xbf16, #tpu.memory_space<vmem>>, vector<128x128xbf16>
    tpu.vector_store %arg9[%c0_49, %c0_50], %103 {strides = array<i32>} : memref<128x128xbf16, #tpu.memory_space<vmem>>, vector<128x128xbf16>,
    return
  }
  func.func @transform_0(%arg0: i32, %arg1: memref<1xi32, #tpu.memory_space<smem>>) -> (i32, i32) {
    %c0_i32 = arith.constant 0 : i32
    %c0_i32_0 = arith.constant 0 : i32
    return %c0_i32, %arg0 : i32, i32
  }
  func.func @transform_1(%arg0: i32, %arg1: memref<1xi32, #tpu.memory_space<smem>>) -> (i32, i32) {
    %c0_i32 = arith.constant 0 : i32
    %c0_i32_0 = arith.constant 0 : i32
    return %arg0, %c0_i32 : i32, i32
  }
  func.func @transform_2(%arg0: i32, %arg1: memref<1xi32, #tpu.memory_space<smem>>) -> (i32, i32) {
    %c0_i32 = arith.constant 0 : i32
    %c0_i32_0 = arith.constant 0 : i32
    return %arg0, %c0_i32 : i32, i32
  }
  func.func @transform_3(%arg0: i32, %arg1: memref<1xi32, #tpu.memory_space<smem>>) -> (i32, i32) {
    %c0_i32 = arith.constant 0 : i32
    %c0_i32_0 = arith.constant 0 : i32
    %c0_i32_1 = arith.constant 0 : i32
    return %c0_i32, %c0_i32_0 : i32, i32
  }
  func.func @transform_4(%arg0: i32, %arg1: memref<1xi32, #tpu.memory_space<smem>>) -> (i32, i32) {
    %c0_i32 = arith.constant 0 : i32
    %c0_i32_0 = arith.constant 0 : i32
    %c0_i32_1 = arith.constant 0 : i32
    return %c0_i32, %c0_i32_0 : i32, i32
  }
  func.func @transform_5(%arg0: i32, %arg1: memref<1xi32, #tpu.memory_space<smem>>) -> (i32, i32, i32) {
    %c0_i32 = arith.constant 0 : i32
    %c0_i32_0 = arith.constant 0 : i32
    %c0_i32_1 = arith.constant 0 : i32
    %c0_i32_2 = arith.constant 0 : i32
    return %c0_i32, %c0_i32_0, %c0_i32_1 : i32, i32, i32
  }
  func.func @transform_6(%arg0: i32, %arg1: memref<1xi32, #tpu.memory_space<smem>>) -> (i32, i32) {
    %c0_i32 = arith.constant 0 : i32
    %c0_i32_0 = arith.constant 0 : i32
    %c0_i32_1 = arith.constant 0 : i32
    return %c0_i32, %c0_i32_0 : i32, i32
  }
  func.func @transform_7(%arg0: i32, %arg1: memref<1xi32, #tpu.memory_space<smem>>) -> (i32, i32) {
    %c0_i32 = arith.constant 0 : i32
    %c0_i32_0 = arith.constant 0 : i32
    return %arg0, %c0_i32 : i32, i32
  }
  func.func @transform_8(%arg0: i32, %arg1: memref<1xi32, #tpu.memory_space<smem>>) -> (i32, i32) {
    %c0_i32 = arith.constant 0 : i32
    %c0_i32_0 = arith.constant 0 : i32
    %c0_i32_1 = arith.constant 0 : i32
    return %c0_i32, %c0_i32_0 : i32, i32
  }
  func.func @transform_9(%arg0: i32, %arg1: memref<1xi32, #tpu.memory_space<smem>>) -> (i32, i32) {
    %c0_i32 = arith.constant 0 : i32
    %c0_i32_0 = arith.constant 0 : i32
    %c0_i32_1 = arith.constant 0 : i32
    return %c0_i32, %c0_i32_0 : i32, i32
  }
}

</mosaic_0001>

<bundles_post_ra>
// kernel: tpu_custom_call.1
= control target key start
LH: loop header
LB: loop body
LE: loop exit
PB: predicated region body
PF: predicated region fallthrough
CT: control target
= control target key end

     0   :  { %17 = vsyncpa [#allocation5], 0  ;;  %vm121_vm0 = vcmask 130048   ;;  %s4166_s0 = inlined_call_operand.<no memory space> [shape: s32[1], index: 0, kind: input, shape index: {}]   ;;  %s4167_s1 = inlined_call_operand.vmem [shape: s32[1,128], index: 1, kind: input, shape index: {}]   ;;  %s4168_s2 = inlined_call_operand.vmem [shape: bf16[128,32], index: 2, kind: input, shape index: {}]   ;;  %s4169_s3 = inlined_call_operand.vmem [shape: bf16[128,16], index: 3, kind: input, shape index: {}]   ;;  %s4170_s4 = inlined_call_operand.vmem [shape: bf16[16,96], index: 4, kind: input, shape index: {}]   ;;  %s4171_s5 = inlined_call_operand.vmem [shape: bf16[32,32], index: 5, kind: input, shape index: {}]   ;;  %s4172_s6 = inlined_call_operand.vmem [shape: bf16[4,32,32], index: 6, kind: input, shape index: {}]   ;;  %s4173_s7 = inlined_call_operand.vmem [shape: bf16[32,128], index: 7, kind: input, shape index: {}]   ;;  %s4174_s8 = inlined_call_operand.hbm [shape: bf16[128,128], index: 8, kind: output, shape index: {0}]   ;;  %s4175_s9 = inlined_call_operand.hbm [shape: f32[8,32], index: 9, kind: output, shape index: {1}]   ;;  %s4176_s10 = inlined_call_operand.hbm [shape: f32[8,32], index: 10, kind: output, shape index: {2}]  }
   0x1   :  { %v2804_v0 = vld [vmem:[%s4170_s4] sm:$0xff]   ;;  %v2806_v2 = vld [vmem:[%s4169_s3 + $0x8] sm:$0xff]   ;;  %v2807_v3 = vld [vmem:[%s4169_s3 + $0x10] sm:$0xff]  }
   0x2   :  { %v2805_v1 = vld [vmem:[%s4169_s3] sm:$0xff]   ;;  %2617 = vmatprep.subr.bf16.mxu0 %v2804_v0  ;;  %v2808_v4 = vld [vmem:[%s4169_s3 + $0x18] sm:$0xff]  }
   0x3   :  { %2618 = vmatpush3.bf16.msra.mxu0 %v2804_v0  ;;  %2619 = vmatprep.mubr.msk.bf16.mxu0 %vm121_vm0, %v2805_v1  ;;  %v2809_v5 = vld [vmem:[%s4169_s3 + $0x20] sm:$0xff]  }
   0x6   :  { %2620 = vmatmul.mubr.msk.bf16.vlgmr.msra.gmra.mrb[0].mxu0 %vm121_vm0, %v2806_v2 }
   0x7   :  { %2623 = vmatprep.mubr.msk.bf16.mxu0 %vm121_vm0, %v2807_v3 }
   0xe   :  { %2624 = vmatmul.mubr.msk.bf16.gmra.mrb[4].mxu0 %vm121_vm0, %v2808_v4 }
   0xf   :  { %2627 = vmatprep.mubr.msk.bf16.mxu0 %vm121_vm0, %v2809_v5 }
  0x10   :  { %18 = vsyncpa [#allocation7], 0  ;;  %v2810_v6 = vld [vmem:[%s4169_s3 + $0x28] sm:$0xff]   ;;  %v2811_v7 = vld [vmem:[%s4169_s3 + $0x30] sm:$0xff]   ;;  %v3225_v9 = vmov 0.0   ;;  %vm3226_vm1 = vmmov 0   ;;  %v373_v59 = vlaneseq  ;;  %v375_v5 = vstv %s4166_s0 }
  0x11   :  { %v2812_v8 = vld [vmem:[%s4169_s3 + $0x38] sm:$0xff]   ;;  %2635 = vmatprep.subr.bf16.mxu1 %v3225_v9  ;;  %2655 = vmatprep.subr.bf16.mxu0 %v3225_v9  ;;  %vm38_vm2 = vcmask 261120   ;;  %v3335_v10 = vld [vmem:[%s4168_s2 + $0x8] sm:$0xff]   ;;  %v3340_v11 = vld [vmem:[%s4168_s2] sm:$0xff]   ;;  %s3227_s13 = smov 64   ;;  %s3228_s29 = smov 96  }
  0x12   :  { %2651 = vmatprep.mubr.msk.bf16.mxu1 %vm3226_vm1, %v3225_v9  ;;  %39 = vst.msk [vmem:[#allocation6] sm:$0xff] %vm38_vm2, %v3225_v9  ;;  %40 = vst.msk [vmem:[#allocation8] sm:$0xff] %vm38_vm2, %v3225_v9  ;;  %v245_v12 = vunpack.c.l.bf16 %v3335_v10  ;;  %v246_v13 = vunpack.c.h.bf16 %v3335_v10  ;;  %v243_v15 = vunpack.c.l.bf16 %v3340_v11  ;;  %v244_v16 = vunpack.c.h.bf16 %v3340_v11  ;;  %v3367_v22 = vld [vmem:[%s4168_s2 + $0x18] sm:$0xff]   ;;  %v3380_v25 = vld [vmem:[%s4168_s2 + $0x10] sm:$0xff]  }
  0x13   :  { %v249_v28 = vunpack.c.l.bf16 %v3367_v22  ;;  %v250_v29 = vunpack.c.h.bf16 %v3367_v22  ;;  %v247_v31 = vunpack.c.l.bf16 %v3380_v25  ;;  %v248_v32 = vunpack.c.h.bf16 %v3380_v25  ;;  %v3416_v40 = vld [vmem:[%s4168_s2 + $0x28] sm:$0xff]   ;;  %v3422_v41 = vld [vmem:[%s4168_s2 + $0x20] sm:$0xff]   ;;  %v3460_v56 = vld [vmem:[%s4168_s2 + $0x38] sm:$0xff]  }
  0x14   :  { %v253_v44 = vunpack.c.l.bf16 %v3416_v40  ;;  %v254_v45 = vunpack.c.h.bf16 %v3416_v40  ;;  %v251_v47 = vunpack.c.l.bf16 %v3422_v41  ;;  %v252_v48 = vunpack.c.h.bf16 %v3422_v41  ;;  %v3466_v57 = vld [vmem:[%s4168_s2 + $0x30] sm:$0xff]  }
  0x15   :  { %v257_v61 = vunpack.c.l.bf16 %v3460_v56  ;;  %v258_v62 = vunpack.c.h.bf16 %v3460_v56  ;;  %v255_v0 = vunpack.c.l.bf16 %v3466_v57  ;;  %v256_v1 = vunpack.c.h.bf16 %v3466_v57 }
  0x16   :  { %2628 = vmatmul.mubr.msk.bf16.gmra.mrb[8].mxu0 %vm121_vm0, %v2810_v6  ;;  %v374_v3 = vshrl.u32 %v373_v59, 7 }
  0x17   :  { %2631 = vmatprep.mubr.msk.bf16.mxu0 %vm121_vm0, %v2811_v7 }
  0x1e   :  { %2632 = vmatmul.mubr.msk.bf16.gmra.mrb[12].mxu0 %vm121_vm0, %v2812_v8 }
  0x1f   :  { %2671 = vmatprep.mubr.msk.bf16.mxu0 %vm3226_vm1, %v3225_v9 }
  0xd9   :  { %v3344_v14 = vpop.f32.mrb[0].mxu0 }
  0xda   :  { %303 = vrot.lane.b32.xlu1 %v3344_v14, %s3227_s13  ;;  %v3350_v17 = vpop.f32.mrb[1].mxu0  ;;  %v261_v19 = vmul.f32 %v3344_v14, %v245_v12 }
  0xdb   :  { %299 = vrot.lane.b32.xlu0 %v3350_v17, %s3227_s13  ;;  %v3354_v18 = vpop.f32.mrb[2].mxu0  ;;  %v259_v23 = vmul.f32 %v243_v15, %v3350_v17 }
  0xdc   :  { %v262_v20 = vmul.f32 %v3354_v18, %v246_v13  ;;  %v3362_v21 = vpop.f32.mrb[3].mxu0 }
  0xdd   :  { %v260_v24 = vmul.f32 %v244_v16, %v3362_v21 }
  0xde   :  { %305 = vrot.lane.b32.xlu1 %v3354_v18, %s3227_s13  ;;  %v276_v26 = vpack.c.bf16 %v262_v20, %v261_v19 }
  0xdf   :  { %301 = vrot.lane.b32.xlu0 %v3362_v21, %s3227_s13  ;;  %v275_v27 = vpack.c.bf16 %v260_v24, %v259_v23  ;;  %v376_v24 = vadd.s32 %v375_v5, %v374_v3 }
  0xe1   :  { %v3386_v30 = vpop.f32.mrb[4].mxu0  ;;  %2636 = vmatpush3.bf16.msra.mxu1 %v275_v27  ;;  %v2285_v27 = vld [vmem:[%s4167_s1] ss:$0 sm:$0xff] }
  0xe2   :  { %v3390_v33 = vpop.f32.mrb[5].mxu0  ;;  %2637 = vmatprep.subr.bf16.mxu1 %v3225_v9  ;;  %v265_v35 = vmul.f32 %v3386_v30, %v249_v28  ;;  %vm381_vm3 = vcmp.eq.s32.totalorder %v376_v24, %v2285_v27 }
  0xe3   :  { %307 = vrot.lane.b32.xlu0 %v3390_v33, %s3227_s13  ;;  %v3395_v34 = vpop.f32.mrb[6].mxu0  ;;  %v263_v38 = vmul.f32 %v247_v31, %v3390_v33  ;;  %vm3504_vm4 = vmpackc.low %vm381_vm3, %vm381_vm3 }
  0xe4   :  { %v266_v36 = vmul.f32 %v3395_v34, %v250_v29  ;;  %v3403_v37 = vpop.f32.mrb[7].mxu0 }
  0xe5   :  { %v264_v39 = vmul.f32 %v248_v32, %v3403_v37  ;;  %309 = vrot.lane.b32.xlu1 %v3403_v37, %s3227_s13  ;;  %2638 = vmatpush3.bf16.msra.mxu1 %v276_v26 }
  0xe6   :  { %2639 = vmatprep.subr.bf16.mxu1 %v3225_v9  ;;  %v278_v42 = vpack.c.bf16 %v266_v36, %v265_v35  ;;  %v2814_v35 = vld [vmem:[%s4171_s5] sm:$0xff]  }
  0xe7   :  { %311 = vrot.lane.b32.xlu0 %v3386_v30, %s3227_s13  ;;  %v277_v43 = vpack.c.bf16 %v264_v39, %v263_v38  ;;  %v2815_v38 = vld [vmem:[%s4171_s5 + $0x8] sm:$0xff]   ;;  %v3229_v39 = vmov 1.0|1.0  }
  0xe9   :  { %313 = vrot.lane.b32.xlu1 %v3395_v34, %s3227_s13  ;;  %v3430_v46 = vpop.f32.mrb[8].mxu0  ;;  %2640 = vmatpush3.bf16.msra.mxu1 %v277_v43 }
  0xea   :  { %v3434_v49 = vpop.f32.mrb[9].mxu0  ;;  %2641 = vmatprep.subr.bf16.mxu1 %v3225_v9  ;;  %v269_v51 = vmul.f32 %v3430_v46, %v253_v44 }
  0xeb   :  { %315 = vrot.lane.b32.xlu0 %v3434_v49, %s3227_s13  ;;  %v3439_v50 = vpop.f32.mrb[10].mxu0  ;;  %v267_v54 = vmul.f32 %v251_v47, %v3434_v49 }
  0xec   :  { %v270_v52 = vmul.f32 %v3439_v50, %v254_v45  ;;  %v3447_v53 = vpop.f32.mrb[11].mxu0 }
  0xed   :  { %v268_v55 = vmul.f32 %v252_v48, %v3447_v53  ;;  %317 = vrot.lane.b32.xlu1 %v3447_v53, %s3227_s13  ;;  %2642 = vmatpush3.bf16.msra.mxu1 %v278_v42 }
  0xee   :  { %2643 = vmatprep.subr.bf16.mxu1 %v3225_v9  ;;  %v280_v58 = vpack.c.bf16 %v270_v52, %v269_v51 }
  0xef   :  { %319 = vrot.lane.b32.xlu0 %v3430_v46, %s3227_s13  ;;  %v279_v60 = vpack.c.bf16 %v268_v55, %v267_v54 }
  0xf1   :  { %321 = vrot.lane.b32.xlu1 %v3439_v50, %s3227_s13  ;;  %v2633_v63 = vpop.f32.mrb[12].mxu0  ;;  %2644 = vmatpush3.bf16.msra.mxu1 %v279_v60 }
  0xf2   :  { %v228_v2 = vpop.f32.mrb[13].mxu0  ;;  %2645 = vmatprep.subr.bf16.mxu1 %v3225_v9  ;;  %v273_v6 = vmul.f32 %v2633_v63, %v257_v61 }
  0xf3   :  { %323 = vrot.lane.b32.xlu0 %v228_v2, %s3227_s13  ;;  %v2634_v4 = vpop.f32.mrb[14].mxu0  ;;  %v271_v19 = vmul.f32 %v255_v0, %v228_v2 }
  0xf4   :  { %v274_v7 = vmul.f32 %v2634_v4, %v258_v62  ;;  %v231_v8 = vpop.f32.mrb[15].mxu0 }
  0xf5   :  { %v272_v20 = vmul.f32 %v256_v1, %v231_v8  ;;  %325 = vrot.lane.b32.xlu1 %v231_v8, %s3227_s13  ;;  %2646 = vmatpush3.bf16.msra.mxu1 %v280_v58 }
  0xf6   :  { %2647 = vmatprep.subr.bf16.mxu1 %v3225_v9  ;;  %v282_v23 = vpack.c.bf16 %v274_v7, %v273_v6 }
  0xf7   :  { %327 = vrot.lane.b32.xlu0 %v2633_v63, %s3227_s13  ;;  %v281_v26 = vpack.c.bf16 %v272_v20, %v271_v19 }
  0xf9   :  { %329 = vrot.lane.b32.xlu1 %v2634_v4, %s3227_s13  ;;  %2648 = vmatpush3.bf16.msra.mxu1 %v281_v26 }
  0xfa   :  { %2649 = vmatprep.subr.bf16.mxu1 %v3225_v9 }
  0xfb   :  { %1936 = vrot.lane.b32.xlu0 %v3350_v17, %s3228_s29 }
  0xfd   :  { %1938 = vrot.lane.b32.xlu1 %v3362_v21, %s3228_s29  ;;  %2650 = vmatpush3.bf16.msra.mxu1 %v282_v23 }
  0xfe   :  { %2675 = vmatprep.subr.bf16.mxu1 %v2814_v35 }
  0xff   :  { %1940 = vrot.lane.b32.xlu0 %v3344_v14, %s3228_s29 }
 0x100   :  { %2652 = vmatmul.mubr.msk.bf16.vlgmr.msra.gmra.mrb[0].mxu1 %vm3504_vm4, %v3229_v39 }
 0x101   :  { %1942 = vrot.lane.b32.xlu1 %v3354_v18, %s3228_s29  ;;  %2676 = vmatpush3.bf16.msra.mxu1 %v2814_v35 }
 0x102   :  { %2677 = vmatprep.subr.bf16.mxu1 %v2815_v38  ;;  %2679 = vmatprep.mubr.msk.bf16.mxu1 %vm38_vm2, %v3340_v11 }
 0x103   :  { %1944 = vrot.lane.b32.xlu0 %v3390_v33, %s3228_s29 }
 0x105   :  { %1946 = vrot.lane.b32.xlu1 %v3403_v37, %s3228_s29  ;;  %2678 = vmatpush3.bf16.msra.mxu1 %v2815_v38 }
 0x107   :  { %1948 = vrot.lane.b32.xlu0 %v3386_v30, %s3228_s29 }
 0x108   :  { %2680 = vmatmul.mubr.msk.bf16.vlgmr.msra.gmra.mrb[4].mxu1 %vm38_vm2, %v3335_v10 }
 0x109   :  { %1950 = vrot.lane.b32.xlu1 %v3395_v34, %s3228_s29  ;;  %2683 = vmatprep.mubr.msk.bf16.mxu1 %vm38_vm2, %v3380_v25 }
 0x10b   :  { %1952 = vrot.lane.b32.xlu0 %v3434_v49, %s3228_s29 }
 0x10d   :  { %1954 = vrot.lane.b32.xlu1 %v3447_v53, %s3228_s29 }
 0x10f   :  { %1956 = vrot.lane.b32.xlu0 %v3430_v46, %s3228_s29 }
 0x110   :  { %2684 = vmatmul.mubr.msk.bf16.gmra.mrb[8].mxu1 %vm38_vm2, %v3367_v22 }
 0x111   :  { %1958 = vrot.lane.b32.xlu1 %v3439_v50, %s3228_s29  ;;  %2687 = vmatprep.mubr.msk.bf16.mxu1 %vm38_vm2, %v3422_v41 }
 0x113   :  { %1960 = vrot.lane.b32.xlu0 %v228_v2, %s3228_s29 }
 0x115   :  { %1962 = vrot.lane.b32.xlu1 %v231_v8, %s3228_s29 }
 0x117   :  { %1964 = vrot.lane.b32.xlu0 %v2633_v63, %s3228_s29 }
 0x118   :  { %2688 = vmatmul.mubr.msk.bf16.gmra.mrb[12].mxu1 %vm38_vm2, %v3416_v40 }
 0x119   :  { %1966 = vrot.lane.b32.xlu1 %v2634_v4, %s3228_s29  ;;  %2691 = vmatprep.mubr.msk.bf16.mxu1 %vm38_vm2, %v3466_v57  ;;  %v2817_v57 = vld [vmem:[%s4172_s6] sm:$0xff]  }
 0x120   :  { %2692 = vmatmul.mubr.msk.bf16.gmra.mrb[16].mxu1 %vm38_vm2, %v3460_v56  ;;  %v2818_v56 = vld [vmem:[%s4172_s6 + $0x8] sm:$0xff]  }
 0x14c   :  { %v304_v14 = vpop.permute.xlu1 %303 }
 0x14d   :  { %v300_v17 = vpop.permute.xlu0 %299  ;;  %v349_v43 = vmul.f32 %v304_v14, %v245_v12 }
 0x14e   :  { %v347_v30 = vmul.f32 %v300_v17, %v243_v15 }
 0x150   :  { %v306_v18 = vpop.permute.xlu1 %305 }
 0x151   :  { %v302_v21 = vpop.permute.xlu0 %301  ;;  %v350_v34 = vmul.f32 %v306_v18, %v246_v13 }
 0x152   :  { %v348_v33 = vmul.f32 %v302_v21, %v244_v16 }
 0x153   :  { %v364_v49 = vpack.c.bf16 %v350_v34, %v349_v43 }
 0x154   :  { %v363_v37 = vpack.c.bf16 %v348_v33, %v347_v30 }
 0x155   :  { %v308_v42 = vpop.permute.xlu0 %307 }
 0x156   :  { %2656 = vmatpush3.bf16.msra.mxu0 %v363_v37  ;;  %v351_v11 = vmul.f32 %v308_v42, %v247_v31 }
 0x157   :  { %v310_v46 = vpop.permute.xlu1 %309  ;;  %2657 = vmatprep.subr.bf16.mxu0 %v3225_v9 }
 0x158   :  { %v352_v50 = vmul.f32 %v310_v46, %v248_v32 }
 0x159   :  { %v312_v15 = vpop.permute.xlu0 %311 }
 0x15a   :  { %2658 = vmatpush3.bf16.msra.mxu0 %v364_v49  ;;  %v365_v13 = vpack.c.bf16 %v352_v50, %v351_v11  ;;  %v353_v51 = vmul.f32 %v312_v15, %v249_v28 }
 0x15b   :  { %v314_v16 = vpop.permute.xlu1 %313  ;;  %2659 = vmatprep.subr.bf16.mxu0 %v3225_v9 }
 0x15c   :  { %v354_v10 = vmul.f32 %v314_v16, %v250_v29 }
 0x15d   :  { %v316_v12 = vpop.permute.xlu0 %315 }
 0x15e   :  { %2660 = vmatpush3.bf16.msra.mxu0 %v365_v13  ;;  %v366_v32 = vpack.c.bf16 %v354_v10, %v353_v51  ;;  %v355_v53 = vmul.f32 %v316_v12, %v251_v47 }
 0x15f   :  { %v318_v52 = vpop.permute.xlu1 %317  ;;  %2661 = vmatprep.subr.bf16.mxu0 %v3225_v9 }
 0x160   :  { %v356_v25 = vmul.f32 %v318_v52, %v252_v48 }
 0x161   :  { %v320_v31 = vpop.permute.xlu0 %319 }
 0x162   :  { %2662 = vmatpush3.bf16.msra.mxu0 %v366_v32  ;;  %v367_v29 = vpack.c.bf16 %v356_v25, %v355_v53  ;;  %v357_v55 = vmul.f32 %v320_v31, %v253_v44 }
 0x163   :  { %v322_v54 = vpop.permute.xlu1 %321  ;;  %2663 = vmatprep.subr.bf16.mxu0 %v3225_v9 }
 0x164   :  { %v358_v22 = vmul.f32 %v322_v54, %v254_v45 }
 0x165   :  { %v324_v28 = vpop.permute.xlu0 %323 }
 0x166   :  { %2664 = vmatpush3.bf16.msra.mxu0 %v367_v29  ;;  %v368_v48 = vpack.c.bf16 %v358_v22, %v357_v55  ;;  %v359_v47 = vmul.f32 %v324_v28, %v255_v0 }
 0x167   :  { %v326_v58 = vpop.permute.xlu1 %325  ;;  %2665 = vmatprep.subr.bf16.mxu0 %v3225_v9 }
 0x168   :  { %v360_v41 = vmul.f32 %v326_v58, %v256_v1 }
 0x169   :  { %v328_v59 = vpop.permute.xlu0 %327 }
 0x16a   :  { %2666 = vmatpush3.bf16.msra.mxu0 %v368_v48  ;;  %v369_v45 = vpack.c.bf16 %v360_v41, %v359_v47  ;;  %v361_v44 = vmul.f32 %v328_v59, %v257_v61  ;;  %v465_v61 = vld [vmem:[#allocation6] sm:$0xff] }
 0x16b   :  { %v330_v60 = vpop.permute.xlu1 %329  ;;  %2667 = vmatprep.subr.bf16.mxu0 %v3225_v9 }
 0x16c   :  { %v362_v40 = vmul.f32 %v330_v60, %v258_v62 }
 0x16e   :  { %2668 = vmatpush3.bf16.msra.mxu0 %v369_v45  ;;  %v370_v63 = vpack.c.bf16 %v362_v40, %v361_v44 }
 0x16f   :  { %2669 = vmatprep.subr.bf16.mxu0 %v3225_v9 }
 0x172   :  { %2670 = vmatpush3.bf16.msra.mxu0 %v370_v63 }
 0x173   :  { %2695 = vmatprep.subr.bf16.mxu0 %v2817_v57 }
 0x175   :  { %2672 = vmatmul.mubr.msk.bf16.vlgmr.msra.gmra.mrb[16].mxu0 %vm3504_vm4, %v3229_v39 }
 0x176   :  { %2696 = vmatpush3.bf16.msra.mxu0 %v2817_v57 }
 0x177   :  { %2697 = vmatprep.subr.bf16.mxu0 %v2818_v56 }
 0x17a   :  { %2698 = vmatpush3.bf16.msra.mxu0 %v2818_v56 }
 0x1d3   :  { %v419_v9 = vpop.f32.mrb[0].mxu1 }
 0x1d4   :  { %v466_v62 = vadd.f32 %v465_v61, %v419_v9  ;;  %v2653_v0 = vpop.f32.mrb[1].mxu1 }
 0x1d5   :  { %v422_v1 = vpop.f32.mrb[2].mxu1 }
 0x1d6   :  { %468 = vst.msk [vmem:[#allocation6] sm:$0xff] %vm38_vm2, %v466_v62  ;;  %v2654_v2 = vpop.f32.mrb[3].mxu1 }
 0x1db   :  { %v3603_v3 = vpop.f32.mrb[4].mxu1 }
 0x1dc   :  { %v2311_v4 = vmul.f32 -1.442695, %v3603_v3  ;;  %v3606_v5 = vpop.f32.mrb[5].mxu1 }
 0x1dd   :  { %v2309_v6 = vmul.f32 -1.442695, %v3606_v5  ;;  %v3609_v7 = vpop.f32.mrb[6].mxu1 }
 0x1de   :  { %2835 = vpow2.f32 %v2311_v4  ;;  %v2312_v8 = vmul.f32 -1.442695, %v3609_v7  ;;  %v3612_v19 = vpop.f32.mrb[7].mxu1 }
 0x1df   :  { %2837 = vpow2.f32 %v2309_v6  ;;  %v2310_v20 = vmul.f32 -1.442695, %v3612_v19 }
 0x1e0   :  { %2839 = vpow2.f32 %v2312_v8 }
 0x1e1   :  { %2841 = vpow2.f32 %v2310_v20 }
 0x1e3   :  { %v3615_v23 = vpop.f32.mrb[8].mxu1 }
 0x1e4   :  { %v2315_v24 = vmul.f32 -1.442695, %v3615_v23  ;;  %v3618_v26 = vpop.f32.mrb[9].mxu1 }
 0x1e5   :  { %v2313_v27 = vmul.f32 -1.442695, %v3618_v26  ;;  %v3621_v35 = vpop.f32.mrb[10].mxu1 }
 0x1e6   :  { %2843 = vpow2.f32 %v2315_v24  ;;  %v2316_v36 = vmul.f32 -1.442695, %v3621_v35  ;;  %v3624_v38 = vpop.f32.mrb[11].mxu1 }
 0x1e7   :  { %2845 = vpow2.f32 %v2313_v27  ;;  %v2314_v39 = vmul.f32 -1.442695, %v3624_v38 }
 0x1e8   :  { %v2836_v14 = vpop.eup %2835  ;;  %2847 = vpow2.f32 %v2316_v36 }
 0x1e9   :  { %v2838_v17 = vpop.eup %2837  ;;  %v699_v18 = vadd.f32 1.0, %v2836_v14  ;;  %2849 = vpow2.f32 %v2314_v39 }
 0x1ea   :  { %v2840_v21 = vpop.eup %2839  ;;  %v697_v30 = vadd.f32 1.0, %v2838_v17 }
 0x1eb   :  { %v2842_v33 = vpop.eup %2841  ;;  %2851 = vrcp.f32 %v699_v18  ;;  %v700_v34 = vadd.f32 1.0, %v2840_v21  ;;  %v3627_v37 = vpop.f32.mrb[12].mxu1 }
 0x1ec   :  { %2853 = vrcp.f32 %v697_v30  ;;  %v698_v42 = vadd.f32 1.0, %v2842_v33  ;;  %v2319_v43 = vmul.f32 -1.442695, %v3627_v37  ;;  %v3630_v46 = vpop.f32.mrb[13].mxu1 }
 0x1ed   :  { %2855 = vrcp.f32 %v700_v34  ;;  %v2317_v49 = vmul.f32 -1.442695, %v3630_v46  ;;  %v3633_v50 = vpop.f32.mrb[14].mxu1 }
 0x1ee   :  { %2857 = vrcp.f32 %v698_v42  ;;  %v2320_v15 = vmul.f32 -1.442695, %v3633_v50  ;;  %v3636_v11 = vpop.f32.mrb[15].mxu1 }
 0x1ef   :  { %2859 = vpow2.f32 %v2319_v43  ;;  %v2318_v16 = vmul.f32 -1.442695, %v3636_v11 }
 0x1f0   :  { %v2844_v13 = vpop.eup %2843  ;;  %2861 = vpow2.f32 %v2317_v49 }
 0x1f1   :  { %v2846_v10 = vpop.eup %2845  ;;  %v703_v12 = vadd.f32 1.0, %v2844_v13  ;;  %2863 = vpow2.f32 %v2320_v15 }
 0x1f2   :  { %v2848_v51 = vpop.eup %2847  ;;  %v701_v52 = vadd.f32 1.0, %v2846_v10  ;;  %2865 = vpow2.f32 %v2318_v16 }
 0x1f3   :  { %v2850_v32 = vpop.eup %2849  ;;  %2867 = vrcp.f32 %v703_v12  ;;  %v704_v25 = vadd.f32 1.0, %v2848_v51  ;;  %v3639_v31 = vpop.f32.mrb[16].mxu1 }
 0x1f4   :  { %2869 = vrcp.f32 %v701_v52  ;;  %v702_v53 = vadd.f32 1.0, %v2850_v32  ;;  %v2323_v54 = vmul.f32 -1.442695, %v3639_v31  ;;  %v3642_v29 = vpop.f32.mrb[17].mxu1 }
 0x1f5   :  { %v2852_v22 = vpop.eup %2851  ;;  %2871 = vrcp.f32 %v704_v25  ;;  %v2321_v28 = vmul.f32 -1.442695, %v3642_v29  ;;  %v3645_v55 = vpop.f32.mrb[18].mxu1 }
 0x1f6   :  { %v2854_v58 = vpop.eup %2853  ;;  %2873 = vrcp.f32 %v702_v53  ;;  %v2324_v48 = vmul.f32 -1.442695, %v3645_v55  ;;  %v3648_v41 = vpop.f32.mrb[19].mxu1  ;;  %v747_v40 = vmul.f32 %v2852_v22, %v3603_v3 }
 0x1f7   :  { %v2856_v47 = vpop.eup %2855  ;;  %v745_v59 = vmul.f32 %v2854_v58, %v3606_v5  ;;  %2875 = vpow2.f32 %v2323_v54  ;;  %v2322_v60 = vmul.f32 -1.442695, %v3648_v41 }
 0x1f8   :  { %v2858_v45 = vpop.eup %2857  ;;  %v748_v44 = vmul.f32 %v2856_v47, %v3609_v7  ;;  %2877 = vpow2.f32 %v2321_v28  ;;  %v3661_v3 = vmul.f32 1.6666666, %v747_v40 }
 0x1f9   :  { %v2860_v63 = vpop.eup %2859  ;;  %v746_v57 = vmul.f32 %v2858_v45, %v3612_v19  ;;  %2879 = vpow2.f32 %v2324_v48  ;;  %v3657_v0 = vmul.f32 1.6666666, %v745_v59 }
 0x1fa   :  { %v2862_v56 = vpop.eup %2861  ;;  %v3655_v61 = vmul.f32 1.6666666, %v748_v44  ;;  %v707_v9 = vadd.f32 1.0, %v2860_v63  ;;  %2881 = vpow2.f32 %v2322_v60 }
 0x1fb   :  { %v2864_v62 = vpop.eup %2863  ;;  %v3659_v1 = vmul.f32 1.6666666, %v746_v57  ;;  %v705_v2 = vadd.f32 1.0, %v2862_v56 }
 0x1fc   :  { %v2866_v4 = vpop.eup %2865  ;;  %2883 = vrcp.f32 %v707_v9  ;;  %v708_v5 = vadd.f32 1.0, %v2864_v62  ;;  %v782_v20 = vpack.c.bf16 %v3655_v61, %v3661_v3 }
 0x1fd   :  { %v2868_v6 = vpop.eup %2867  ;;  %v781_v7 = vpack.c.bf16 %v3659_v1, %v3657_v0  ;;  %2885 = vrcp.f32 %v705_v2  ;;  %v706_v8 = vadd.f32 1.0, %v2866_v4 }
 0x1fe   :  { %v2870_v19 = vpop.eup %2869  ;;  %2887 = vrcp.f32 %v708_v5  ;;  %v751_v39 = vmul.f32 %v2868_v6, %v3615_v23  ;;  %v2819_v5 = vld [vmem:[%s4172_s6 + $0x10] sm:$0xff]   ;;  %v2820_v6 = vld [vmem:[%s4172_s6 + $0x18] sm:$0xff]  }
 0x1ff   :  { %v2872_v24 = vpop.eup %2871  ;;  %v749_v27 = vmul.f32 %v2870_v19, %v3618_v26  ;;  %2889 = vrcp.f32 %v706_v8  ;;  %2699 = vmatprep.mubr.msk.bf16.mxu0 %vm38_vm2, %v781_v7  ;;  %2715 = vmatprep.subr.bf16.mxu1 %v2819_v5 }
 0x200   :  { %v2874_v36 = vpop.eup %2873  ;;  %v752_v14 = vmul.f32 %v2872_v24, %v3621_v35  ;;  %2700 = vmatmul.mubr.msk.bf16.vlgmr.msra.gmra.mrb[20].mxu0 %vm38_vm2, %v782_v20  ;;  %v3679_v15 = vmul.f32 1.6666666, %v751_v39  ;;  %2716 = vmatpush3.bf16.msra.mxu1 %v2819_v5 }
 0x201   :  { %v2876_v17 = vpop.eup %2875  ;;  %v750_v18 = vmul.f32 %v2874_v36, %v3624_v38  ;;  %v3675_v42 = vmul.f32 1.6666666, %v749_v27  ;;  %2717 = vmatprep.subr.bf16.mxu1 %v2820_v6 }
 0x202   :  { %v2878_v21 = vpop.eup %2877  ;;  %v3673_v30 = vmul.f32 1.6666666, %v752_v14  ;;  %v711_v33 = vadd.f32 1.0, %v2876_v17 }
 0x203   :  { %v2880_v34 = vpop.eup %2879  ;;  %v3677_v26 = vmul.f32 1.6666666, %v750_v18  ;;  %v709_v43 = vadd.f32 1.0, %v2878_v21 }
 0x204   :  { %v2882_v49 = vpop.eup %2881  ;;  %2891 = vrcp.f32 %v711_v33  ;;  %v712_v23 = vadd.f32 1.0, %v2880_v34  ;;  %v784_v13 = vpack.c.bf16 %v3673_v30, %v3679_v15  ;;  %2718 = vmatpush3.bf16.msra.mxu1 %v2820_v6 }
 0x205   :  { %v783_v35 = vpack.c.bf16 %v3677_v26, %v3675_v42  ;;  %2893 = vrcp.f32 %v709_v43  ;;  %v710_v38 = vadd.f32 1.0, %v2882_v49 }
 0x206   :  { %v2884_v16 = vpop.eup %2883  ;;  %2895 = vrcp.f32 %v712_v23 }
 0x207   :  { %v2886_v10 = vpop.eup %2885  ;;  %2897 = vrcp.f32 %v710_v38  ;;  %2703 = vmatprep.mubr.msk.bf16.mxu0 %vm38_vm2, %v783_v35  ;;  %v755_v32 = vmul.f32 %v2884_v16, %v3627_v37 }
 0x208   :  { %v2888_v12 = vpop.eup %2887  ;;  %v753_v51 = vmul.f32 %v2886_v10, %v3630_v46  ;;  %2704 = vmatmul.mubr.msk.bf16.gmra.mrb[24].mxu0 %vm38_vm2, %v784_v13 }
 0x209   :  { %v2890_v52 = vpop.eup %2889  ;;  %v756_v25 = vmul.f32 %v2888_v12, %v3633_v50  ;;  %v3697_v58 = vmul.f32 1.6666666, %v755_v32 }
 0x20a   :  { %v754_v53 = vmul.f32 %v2890_v52, %v3636_v11  ;;  %v3693_v22 = vmul.f32 1.6666666, %v753_v51 }
 0x20b   :  { %v3691_v54 = vmul.f32 1.6666666, %v756_v25 }
 0x20c   :  { %v3695_v28 = vmul.f32 1.6666666, %v754_v53 }
 0x20d   :  { %v786_v37 = vpack.c.bf16 %v3691_v54, %v3697_v58 }
 0x20e   :  { %v2892_v48 = vpop.eup %2891  ;;  %v785_v46 = vpack.c.bf16 %v3695_v28, %v3693_v22 }
 0x20f   :  { %v2894_v47 = vpop.eup %2893  ;;  %v759_v60 = vmul.f32 %v2892_v48, %v3639_v31 }
 0x210   :  { %v2896_v59 = vpop.eup %2895  ;;  %v757_v50 = vmul.f32 %v2894_v47, %v3642_v29  ;;  %2707 = vmatprep.mubr.msk.bf16.mxu0 %vm38_vm2, %v785_v46 }
 0x211   :  { %v2898_v11 = vpop.eup %2897  ;;  %v760_v45 = vmul.f32 %v2896_v59, %v3645_v55  ;;  %2708 = vmatmul.mubr.msk.bf16.gmra.mrb[28].mxu0 %vm38_vm2, %v786_v37  ;;  %v3715_v56 = vmul.f32 1.6666666, %v759_v60  ;;  %v469_v55 = vld [vmem:[#allocation8] sm:$0xff] }
 0x212   :  { %v758_v40 = vmul.f32 %v2898_v11, %v3648_v41  ;;  %v3711_v63 = vmul.f32 1.6666666, %v757_v50 }
 0x213   :  { %v3709_v44 = vmul.f32 1.6666666, %v760_v45 }
 0x214   :  { %v3713_v57 = vmul.f32 1.6666666, %v758_v40 }
 0x215   :  { %v788_v31 = vpack.c.bf16 %v3709_v44, %v3715_v56 }
 0x216   :  { %v787_v29 = vpack.c.bf16 %v3713_v57, %v3711_v63 }
 0x218   :  { %2711 = vmatprep.mubr.msk.bf16.mxu0 %vm38_vm2, %v787_v29 }
 0x219   :  { %2712 = vmatmul.mubr.msk.bf16.gmra.mrb[32].mxu0 %vm38_vm2, %v788_v31 }
 0x248   :  { %v459_v41 = vpop.f32.mrb[16].mxu0 }
 0x249   :  { %v470_v9 = vadd.f32 %v469_v55, %v459_v41  ;;  %v2673_v62 = vpop.f32.mrb[17].mxu0 }
 0x24a   :  { %v462_v2 = vpop.f32.mrb[18].mxu0 }
 0x24b   :  { %471 = vst.msk [vmem:[#allocation8] sm:$0xff] %vm38_vm2, %v470_v9  ;;  %v2674_v4 = vpop.f32.mrb[19].mxu0 }
 0x2d3   :  { %v3730_v7 = vpop.f32.mrb[20].mxu0 }
 0x2d4   :  { %v2337_v8 = vmul.f32 -1.442695, %v3730_v7  ;;  %v3733_v19 = vpop.f32.mrb[21].mxu0 }
 0x2d5   :  { %v2335_v20 = vmul.f32 -1.442695, %v3733_v19  ;;  %v3736_v24 = vpop.f32.mrb[22].mxu0 }
 0x2d6   :  { %2899 = vpow2.f32 %v2337_v8  ;;  %v2338_v27 = vmul.f32 -1.442695, %v3736_v24  ;;  %v3739_v36 = vpop.f32.mrb[23].mxu0 }
 0x2d7   :  { %2901 = vpow2.f32 %v2335_v20  ;;  %v2336_v39 = vmul.f32 -1.442695, %v3739_v36 }
 0x2d8   :  { %2903 = vpow2.f32 %v2338_v27 }
 0x2d9   :  { %2905 = vpow2.f32 %v2336_v39 }
 0x2db   :  { %v3742_v14 = vpop.f32.mrb[24].mxu0 }
 0x2dc   :  { %v2341_v17 = vmul.f32 -1.442695, %v3742_v14  ;;  %v3745_v18 = vpop.f32.mrb[25].mxu0 }
 0x2dd   :  { %v2339_v21 = vmul.f32 -1.442695, %v3745_v18  ;;  %v3748_v33 = vpop.f32.mrb[26].mxu0 }
 0x2de   :  { %2907 = vpow2.f32 %v2341_v17  ;;  %v2342_v34 = vmul.f32 -1.442695, %v3748_v33  ;;  %v3751_v43 = vpop.f32.mrb[27].mxu0 }
 0x2df   :  { %2909 = vpow2.f32 %v2339_v21  ;;  %v2340_v49 = vmul.f32 -1.442695, %v3751_v43 }
 0x2e0   :  { %v2900_v23 = vpop.eup %2899  ;;  %2911 = vpow2.f32 %v2342_v34 }
 0x2e1   :  { %v2902_v35 = vpop.eup %2901  ;;  %v972_v38 = vadd.f32 1.0, %v2900_v23  ;;  %2913 = vpow2.f32 %v2340_v49 }
 0x2e2   :  { %v2904_v16 = vpop.eup %2903  ;;  %v970_v13 = vadd.f32 1.0, %v2902_v35 }
 0x2e3   :  { %v2906_v10 = vpop.eup %2905  ;;  %2915 = vrcp.f32 %v972_v38  ;;  %v973_v12 = vadd.f32 1.0, %v2904_v16 }
 0x2e4   :  { %2917 = vrcp.f32 %v970_v13  ;;  %v971_v51 = vadd.f32 1.0, %v2906_v10  ;;  %v3754_v52 = vpop.f32.mrb[28].mxu0 }
 0x2e5   :  { %2919 = vrcp.f32 %v973_v12  ;;  %v2345_v32 = vmul.f32 -1.442695, %v3754_v52  ;;  %v3757_v25 = vpop.f32.mrb[29].mxu0 }
 0x2e6   :  { %2921 = vrcp.f32 %v971_v51  ;;  %v2343_v53 = vmul.f32 -1.442695, %v3757_v25  ;;  %v3760_v48 = vpop.f32.mrb[30].mxu0 }
 0x2e7   :  { %2923 = vpow2.f32 %v2345_v32  ;;  %v2346_v46 = vmul.f32 -1.442695, %v3760_v48  ;;  %v3763_v47 = vpop.f32.mrb[31].mxu0 }
 0x2e8   :  { %v2908_v37 = vpop.eup %2907  ;;  %2925 = vpow2.f32 %v2343_v53  ;;  %v2344_v59 = vmul.f32 -1.442695, %v3763_v47 }
 0x2e9   :  { %v2910_v50 = vpop.eup %2909  ;;  %v976_v11 = vadd.f32 1.0, %v2908_v37  ;;  %2927 = vpow2.f32 %v2346_v46 }
 0x2ea   :  { %v2912_v60 = vpop.eup %2911  ;;  %v974_v45 = vadd.f32 1.0, %v2910_v50  ;;  %2929 = vpow2.f32 %v2344_v59 }
 0x2eb   :  { %v2914_v40 = vpop.eup %2913  ;;  %2931 = vrcp.f32 %v976_v11  ;;  %v977_v29 = vadd.f32 1.0, %v2912_v60 }
 0x2ec   :  { %2933 = vrcp.f32 %v974_v45  ;;  %v975_v31 = vadd.f32 1.0, %v2914_v40  ;;  %v3766_v55 = vpop.f32.mrb[32].mxu0 }
 0x2ed   :  { %v2916_v41 = vpop.eup %2915  ;;  %2935 = vrcp.f32 %v977_v29  ;;  %v2349_v9 = vmul.f32 -1.442695, %v3766_v55  ;;  %v3769_v62 = vpop.f32.mrb[33].mxu0 }
 0x2ee   :  { %v2918_v2 = vpop.eup %2917  ;;  %v1020_v4 = vmul.f32 %v2916_v41, %v3730_v7  ;;  %2937 = vrcp.f32 %v975_v31  ;;  %v2347_v5 = vmul.f32 -1.442695, %v3769_v62  ;;  %v3773_v6 = vpop.f32.mrb[34].mxu0 }
 0x2ef   :  { %v2920_v8 = vpop.eup %2919  ;;  %v1018_v20 = vmul.f32 %v2918_v2, %v3733_v19  ;;  %2939 = vpow2.f32 %v2349_v9  ;;  %v2350_v27 = vmul.f32 -1.442695, %v3773_v6  ;;  %v3777_v39 = vpop.f32.mrb[35].mxu0 }
 0x2f0   :  { %v2922_v17 = vpop.eup %2921  ;;  %v1021_v21 = vmul.f32 %v2920_v8, %v3736_v24  ;;  %2941 = vpow2.f32 %v2347_v5  ;;  %v2348_v34 = vmul.f32 -1.442695, %v3777_v39  ;;  %v1036_v35 = vmul.f32 1.6666666, %v1020_v4 }
 0x2f1   :  { %v2924_v7 = vpop.eup %2923  ;;  %v1019_v49 = vmul.f32 %v2922_v17, %v3739_v36  ;;  %2943 = vpow2.f32 %v2350_v27  ;;  %v1034_v13 = vmul.f32 1.6666666, %v1018_v20 }
 0x2f2   :  { %v2926_v23 = vpop.eup %2925  ;;  %v1037_v38 = vmul.f32 1.6666666, %v1021_v21  ;;  %v980_v16 = vadd.f32 1.0, %v2924_v7  ;;  %2945 = vpow2.f32 %v2348_v34 }
 0x2f3   :  { %v2928_v19 = vpop.eup %2927  ;;  %v1035_v10 = vmul.f32 1.6666666, %v1019_v49  ;;  %v978_v12 = vadd.f32 1.0, %v2926_v23 }
 0x2f4   :  { %v2930_v51 = vpop.eup %2929  ;;  %v1056_v32 = vpack.c.bf16 %v1037_v38, %v1036_v35  ;;  %2947 = vrcp.f32 %v980_v16  ;;  %v981_v24 = vadd.f32 1.0, %v2928_v19 }
 0x2f5   :  { %v2932_v53 = vpop.eup %2931  ;;  %v1055_v46 = vpack.c.bf16 %v1035_v10, %v1034_v13  ;;  %2949 = vrcp.f32 %v978_v12  ;;  %v979_v37 = vadd.f32 1.0, %v2930_v51 }
 0x2f6   :  { %v2934_v59 = vpop.eup %2933  ;;  %v1024_v36 = vmul.f32 %v2932_v53, %v3742_v14  ;;  %2951 = vrcp.f32 %v981_v24 }
 0x2f7   :  { %v2936_v50 = vpop.eup %2935  ;;  %v1022_v11 = vmul.f32 %v2934_v59, %v3745_v18  ;;  %2953 = vrcp.f32 %v979_v37  ;;  %2719 = vmatprep.mubr.msk.bf16.mxu1 %vm38_vm2, %v1055_v46 }
 0x2f8   :  { %v2938_v60 = vpop.eup %2937  ;;  %v1025_v45 = vmul.f32 %v2936_v50, %v3748_v33  ;;  %2720 = vmatmul.mubr.msk.bf16.vlgmr.msra.gmra.mrb[20].mxu1 %vm38_vm2, %v1056_v32  ;;  %v1040_v41 = vmul.f32 1.6666666, %v1024_v36 }
 0x2f9   :  { %v2940_v40 = vpop.eup %2939  ;;  %v1023_v29 = vmul.f32 %v2938_v60, %v3751_v43  ;;  %v1038_v4 = vmul.f32 1.6666666, %v1022_v11 }
 0x2fa   :  { %v2942_v31 = vpop.eup %2941  ;;  %v1041_v9 = vmul.f32 1.6666666, %v1025_v45  ;;  %v984_v2 = vadd.f32 1.0, %v2940_v40 }
 0x2fb   :  { %v2944_v14 = vpop.eup %2943  ;;  %v1039_v5 = vmul.f32 1.6666666, %v1023_v29  ;;  %v982_v8 = vadd.f32 1.0, %v2942_v31 }
 0x2fc   :  { %v2946_v18 = vpop.eup %2945  ;;  %v1058_v20 = vpack.c.bf16 %v1041_v9, %v1040_v41  ;;  %2955 = vrcp.f32 %v984_v2  ;;  %v985_v27 = vadd.f32 1.0, %v2944_v14 }
 0x2fd   :  { %v1057_v17 = vpack.c.bf16 %v1039_v5, %v1038_v4  ;;  %2957 = vrcp.f32 %v982_v8  ;;  %v983_v33 = vadd.f32 1.0, %v2946_v18 }
 0x2fe   :  { %v2948_v21 = vpop.eup %2947  ;;  %2959 = vrcp.f32 %v985_v27 }
 0x2ff   :  { %v2950_v34 = vpop.eup %2949  ;;  %v1028_v43 = vmul.f32 %v2948_v21, %v3754_v52  ;;  %2961 = vrcp.f32 %v983_v33  ;;  %2723 = vmatprep.mubr.msk.bf16.mxu1 %vm38_vm2, %v1057_v17 }
 0x300   :  { %v2952_v7 = vpop.eup %2951  ;;  %v1026_v49 = vmul.f32 %v2950_v34, %v3757_v25  ;;  %2724 = vmatmul.mubr.msk.bf16.gmra.mrb[24].mxu1 %vm38_vm2, %v1058_v20 }
 0x301   :  { %v2954_v23 = vpop.eup %2953  ;;  %v1029_v35 = vmul.f32 %v2952_v7, %v3760_v48  ;;  %v1044_v16 = vmul.f32 1.6666666, %v1028_v43 }
 0x302   :  { %v1027_v38 = vmul.f32 %v2954_v23, %v3763_v47  ;;  %v1042_v13 = vmul.f32 1.6666666, %v1026_v49 }
 0x303   :  { %v1045_v19 = vmul.f32 1.6666666, %v1029_v35 }
 0x304   :  { %v1043_v10 = vmul.f32 1.6666666, %v1027_v38 }
 0x305   :  { %v1060_v12 = vpack.c.bf16 %v1045_v19, %v1044_v16 }
 0x306   :  { %v2956_v51 = vpop.eup %2955  ;;  %v1059_v52 = vpack.c.bf16 %v1043_v10, %v1042_v13 }
 0x307   :  { %v2958_v32 = vpop.eup %2957  ;;  %v1032_v24 = vmul.f32 %v2956_v51, %v3766_v55  ;;  %v2821_v55 = vld [vmem:[%s4172_s6 + $0x20] sm:$0xff]  }
 0x308   :  { %v2960_v53 = vpop.eup %2959  ;;  %v1030_v25 = vmul.f32 %v2958_v32, %v3769_v62  ;;  %2727 = vmatprep.mubr.msk.bf16.mxu1 %vm38_vm2, %v1059_v52  ;;  %2735 = vmatprep.subr.bf16.mxu0 %v2821_v55  ;;  %v2822_v62 = vld [vmem:[%s4172_s6 + $0x28] sm:$0xff]  }
 0x309   :  { %v2962_v46 = vpop.eup %2961  ;;  %v1033_v48 = vmul.f32 %v2960_v53, %v3773_v6  ;;  %2728 = vmatmul.mubr.msk.bf16.gmra.mrb[28].mxu1 %vm38_vm2, %v1060_v12  ;;  %v1048_v37 = vmul.f32 1.6666666, %v1032_v24  ;;  %2736 = vmatpush3.bf16.msra.mxu0 %v2821_v55 }
 0x30a   :  { %v1031_v47 = vmul.f32 %v2962_v46, %v3777_v39  ;;  %v1046_v36 = vmul.f32 1.6666666, %v1030_v25  ;;  %2737 = vmatprep.subr.bf16.mxu0 %v2822_v62 }
 0x30b   :  { %v1049_v59 = vmul.f32 1.6666666, %v1033_v48 }
 0x30c   :  { %v1047_v50 = vmul.f32 1.6666666, %v1031_v47 }
 0x30d   :  { %v1062_v11 = vpack.c.bf16 %v1049_v59, %v1048_v37  ;;  %2738 = vmatpush3.bf16.msra.mxu0 %v2822_v62 }
 0x30e   :  { %v1061_v60 = vpack.c.bf16 %v1047_v50, %v1046_v36 }
 0x310   :  { %2731 = vmatprep.mubr.msk.bf16.mxu1 %vm38_vm2, %v1061_v60 }
 0x311   :  { %2732 = vmatmul.mubr.msk.bf16.gmra.mrb[32].mxu1 %vm38_vm2, %v1062_v11 }
 0x3cb   :  { %v3808_v6 = vpop.f32.mrb[20].mxu1 }
 0x3cc   :  { %v2367_v39 = vmul.f32 -1.442695, %v3808_v6  ;;  %v3811_v45 = vpop.f32.mrb[21].mxu1 }
 0x3cd   :  { %v2365_v40 = vmul.f32 -1.442695, %v3811_v45  ;;  %v3814_v29 = vpop.f32.mrb[22].mxu1 }
 0x3ce   :  { %2963 = vpow2.f32 %v2367_v39  ;;  %v2368_v31 = vmul.f32 -1.442695, %v3814_v29  ;;  %v3817_v41 = vpop.f32.mrb[23].mxu1 }
 0x3cf   :  { %2965 = vpow2.f32 %v2365_v40  ;;  %v2366_v9 = vmul.f32 -1.442695, %v3817_v41 }
 0x3d0   :  { %2967 = vpow2.f32 %v2368_v31 }
 0x3d1   :  { %2969 = vpow2.f32 %v2366_v9 }
 0x3d3   :  { %v3820_v2 = vpop.f32.mrb[24].mxu1 }
 0x3d4   :  { %v2371_v14 = vmul.f32 -1.442695, %v3820_v2  ;;  %v3823_v4 = vpop.f32.mrb[25].mxu1 }
 0x3d5   :  { %v2369_v5 = vmul.f32 -1.442695, %v3823_v4  ;;  %v3826_v8 = vpop.f32.mrb[26].mxu1 }
 0x3d6   :  { %2971 = vpow2.f32 %v2371_v14  ;;  %v2372_v18 = vmul.f32 -1.442695, %v3826_v8  ;;  %v3829_v20 = vpop.f32.mrb[27].mxu1 }
 0x3d7   :  { %2973 = vpow2.f32 %v2369_v5  ;;  %v2370_v27 = vmul.f32 -1.442695, %v3829_v20 }
 0x3d8   :  { %v2964_v17 = vpop.eup %2963  ;;  %2975 = vpow2.f32 %v2372_v18 }
 0x3d9   :  { %v2966_v33 = vpop.eup %2965  ;;  %v1246_v21 = vadd.f32 1.0, %v2964_v17  ;;  %2977 = vpow2.f32 %v2370_v27 }
 0x3da   :  { %v2968_v34 = vpop.eup %2967  ;;  %v1244_v43 = vadd.f32 1.0, %v2966_v33 }
 0x3db   :  { %v2970_v7 = vpop.eup %2969  ;;  %2979 = vrcp.f32 %v1246_v21  ;;  %v1247_v49 = vadd.f32 1.0, %v2968_v34 }
 0x3dc   :  { %2981 = vrcp.f32 %v1244_v43  ;;  %v1245_v23 = vadd.f32 1.0, %v2970_v7  ;;  %v3832_v35 = vpop.f32.mrb[28].mxu1 }
 0x3dd   :  { %2983 = vrcp.f32 %v1247_v49  ;;  %v2375_v38 = vmul.f32 -1.442695, %v3832_v35  ;;  %v3835_v16 = vpop.f32.mrb[29].mxu1 }
 0x3de   :  { %2985 = vrcp.f32 %v1245_v23  ;;  %v2373_v19 = vmul.f32 -1.442695, %v3835_v16  ;;  %v3838_v13 = vpop.f32.mrb[30].mxu1 }
 0x3df   :  { %2987 = vpow2.f32 %v2375_v38  ;;  %v2376_v10 = vmul.f32 -1.442695, %v3838_v13  ;;  %v3841_v12 = vpop.f32.mrb[31].mxu1 }
 0x3e0   :  { %v2972_v51 = vpop.eup %2971  ;;  %2989 = vpow2.f32 %v2373_v19  ;;  %v2374_v52 = vmul.f32 -1.442695, %v3841_v12 }
 0x3e1   :  { %v2974_v32 = vpop.eup %2973  ;;  %v1250_v24 = vadd.f32 1.0, %v2972_v51  ;;  %2991 = vpow2.f32 %v2376_v10 }
 0x3e2   :  { %v2976_v53 = vpop.eup %2975  ;;  %v1248_v25 = vadd.f32 1.0, %v2974_v32  ;;  %2993 = vpow2.f32 %v2374_v52 }
 0x3e3   :  { %v2978_v46 = vpop.eup %2977  ;;  %2995 = vrcp.f32 %v1250_v24  ;;  %v1251_v48 = vadd.f32 1.0, %v2976_v53 }
 0x3e4   :  { %2997 = vrcp.f32 %v1248_v25  ;;  %v1249_v47 = vadd.f32 1.0, %v2978_v46  ;;  %v3844_v37 = vpop.f32.mrb[32].mxu1 }
 0x3e5   :  { %v2980_v59 = vpop.eup %2979  ;;  %2999 = vrcp.f32 %v1251_v48  ;;  %v2379_v36 = vmul.f32 -1.442695, %v3844_v37  ;;  %v3847_v50 = vpop.f32.mrb[33].mxu1 }
 0x3e6   :  { %v2982_v11 = vpop.eup %2981  ;;  %v1294_v60 = vmul.f32 %v2980_v59, %v3808_v6  ;;  %3001 = vrcp.f32 %v1249_v47  ;;  %v2377_v55 = vmul.f32 -1.442695, %v3847_v50  ;;  %v3851_v62 = vpop.f32.mrb[34].mxu1 }
 0x3e7   :  { %v2984_v39 = vpop.eup %2983  ;;  %v1292_v40 = vmul.f32 %v2982_v11, %v3811_v45  ;;  %3003 = vpow2.f32 %v2379_v36  ;;  %v2380_v31 = vmul.f32 -1.442695, %v3851_v62  ;;  %v3855_v9 = vpop.f32.mrb[35].mxu1 }
 0x3e8   :  { %v2986_v14 = vpop.eup %2985  ;;  %v1310_v5 = vmul.f32 1.6666666, %v1294_v60  ;;  %v1295_v18 = vmul.f32 %v2984_v39, %v3814_v29  ;;  %3005 = vpow2.f32 %v2377_v55  ;;  %v2378_v6 = vmul.f32 -1.442695, %v3855_v9 }
 0x3e9   :  { %v2988_v27 = vpop.eup %2987  ;;  %v1308_v17 = vmul.f32 1.6666666, %v1292_v40  ;;  %v1293_v33 = vmul.f32 %v2986_v14, %v3817_v41  ;;  %3007 = vpow2.f32 %v2380_v31 }
 0x3ea   :  { %v2990_v21 = vpop.eup %2989  ;;  %v1311_v34 = vmul.f32 1.6666666, %v1295_v18  ;;  %v1254_v45 = vadd.f32 1.0, %v2988_v27  ;;  %3009 = vpow2.f32 %v2378_v6  ;;  %v1326_v29 = vadd.f32 %v1310_v5, %v3661_v3 }
 0x3eb   :  { %v2992_v43 = vpop.eup %2991  ;;  %v1324_v7 = vadd.f32 %v1308_v17, %v3657_v0  ;;  %v1309_v49 = vmul.f32 1.6666666, %v1293_v33  ;;  %v1252_v23 = vadd.f32 1.0, %v2990_v21 }
 0x3ec   :  { %v2994_v38 = vpop.eup %2993  ;;  %v1327_v19 = vadd.f32 %v1311_v34, %v3655_v61  ;;  %3011 = vrcp.f32 %v1254_v45  ;;  %v1255_v10 = vadd.f32 1.0, %v2992_v43  ;;  %v3872_v48 = vmul.f32 0.70710677, %v1326_v29 }
 0x3ed   :  { %v2996_v51 = vpop.eup %2995  ;;  %v1325_v41 = vadd.f32 %v1309_v49, %v3659_v1  ;;  %3013 = vrcp.f32 %v1252_v23  ;;  %v1253_v52 = vadd.f32 1.0, %v2994_v38  ;;  %v3867_v25 = vmul.f32 0.70710677, %v1324_v7 }
 0x3ee   :  { %v2998_v32 = vpop.eup %2997  ;;  %v3864_v24 = vmul.f32 0.70710677, %v1327_v19  ;;  %v1298_v53 = vmul.f32 %v2996_v51, %v3820_v2  ;;  %3015 = vrcp.f32 %v1255_v10 }
 0x3ef   :  { %v3000_v0 = vpop.eup %2999  ;;  %v3869_v46 = vmul.f32 0.70710677, %v1325_v41  ;;  %v1296_v61 = vmul.f32 %v2998_v32, %v3823_v4  ;;  %3017 = vrcp.f32 %v1253_v52 }
 0x3f0   :  { %v3002_v3 = vpop.eup %3001  ;;  %v1314_v1 = vmul.f32 1.6666666, %v1298_v53  ;;  %v1299_v47 = vmul.f32 %v3000_v0, %v3826_v8  ;;  %v1362_v55 = vpack.c.bf16 %v3864_v24, %v3872_v48 }
 0x3f1   :  { %v3004_v59 = vpop.eup %3003  ;;  %v1361_v36 = vpack.c.bf16 %v3869_v46, %v3867_v25  ;;  %v1312_v2 = vmul.f32 1.6666666, %v1296_v61  ;;  %v1297_v11 = vmul.f32 %v3002_v3, %v3829_v20 }
 0x3f2   :  { %v3006_v60 = vpop.eup %3005  ;;  %v1315_v39 = vmul.f32 1.6666666, %v1299_v47  ;;  %v1258_v4 = vadd.f32 1.0, %v3004_v59  ;;  %v1330_v18 = vadd.f32 %v1314_v1, %v3679_v15 }
 0x3f3   :  { %v3008_v40 = vpop.eup %3007  ;;  %v1328_v31 = vadd.f32 %v1312_v2, %v3675_v42  ;;  %v1313_v14 = vmul.f32 1.6666666, %v1297_v11  ;;  %v1256_v5 = vadd.f32 1.0, %v3006_v60  ;;  %2739 = vmatprep.mubr.msk.bf16.mxu0 %vm38_vm2, %v1361_v36 }
 0x3f4   :  { %v3010_v8 = vpop.eup %3009  ;;  %v1331_v6 = vadd.f32 %v1315_v39, %v3673_v30  ;;  %3019 = vrcp.f32 %v1258_v4  ;;  %v1259_v20 = vadd.f32 1.0, %v3008_v40  ;;  %2740 = vmatmul.mubr.msk.bf16.vlgmr.msra.gmra.mrb[36].mxu0 %vm38_vm2, %v1362_v55  ;;  %v3893_v43 = vmul.f32 0.70710677, %v1330_v18 }
 0x3f5   :  { %v1329_v27 = vadd.f32 %v1313_v14, %v3677_v26  ;;  %3021 = vrcp.f32 %v1256_v5  ;;  %v1257_v17 = vadd.f32 1.0, %v3010_v8  ;;  %v3888_v34 = vmul.f32 0.70710677, %v1328_v31 }
 0x3f6   :  { %v3012_v33 = vpop.eup %3011  ;;  %v3886_v21 = vmul.f32 0.70710677, %v1331_v6  ;;  %3023 = vrcp.f32 %v1259_v20 }
 0x3f7   :  { %v3014_v42 = vpop.eup %3013  ;;  %v3890_v45 = vmul.f32 0.70710677, %v1329_v27  ;;  %v1302_v15 = vmul.f32 %v3012_v33, %v3832_v35  ;;  %3025 = vrcp.f32 %v1257_v17 }
 0x3f8   :  { %v3016_v30 = vpop.eup %3015  ;;  %v1300_v7 = vmul.f32 %v3014_v42, %v3835_v16  ;;  %v1364_v29 = vpack.c.bf16 %v3886_v21, %v3893_v43 }
 0x3f9   :  { %v3018_v26 = vpop.eup %3017  ;;  %v1363_v49 = vpack.c.bf16 %v3890_v45, %v3888_v34  ;;  %v1318_v23 = vmul.f32 1.6666666, %v1302_v15  ;;  %v1303_v38 = vmul.f32 %v3016_v30, %v3838_v13 }
 0x3fa   :  { %v1316_v19 = vmul.f32 1.6666666, %v1300_v7  ;;  %v1301_v10 = vmul.f32 %v3018_v26, %v3841_v12 }
 0x3fb   :  { %v1319_v35 = vmul.f32 1.6666666, %v1303_v38  ;;  %2743 = vmatprep.mubr.msk.bf16.mxu0 %vm38_vm2, %v1363_v49  ;;  %v1334_v16 = vadd.f32 %v1318_v23, %v3697_v58 }
 0x3fc   :  { %v1332_v51 = vadd.f32 %v1316_v19, %v3693_v22  ;;  %v1317_v41 = vmul.f32 1.6666666, %v1301_v10  ;;  %2744 = vmatmul.mubr.msk.bf16.gmra.mrb[40].mxu0 %vm38_vm2, %v1364_v29 }
 0x3fd   :  { %v1335_v52 = vadd.f32 %v1319_v35, %v3691_v54  ;;  %v3916_v59 = vmul.f32 0.70710677, %v1334_v16 }
 0x3fe   :  { %v3020_v32 = vpop.eup %3019  ;;  %v1333_v13 = vadd.f32 %v1317_v41, %v3695_v28  ;;  %v3911_v3 = vmul.f32 0.70710677, %v1332_v51 }
 0x3ff   :  { %v3022_v53 = vpop.eup %3021  ;;  %v3908_v0 = vmul.f32 0.70710677, %v1335_v52  ;;  %v1306_v12 = vmul.f32 %v3020_v32, %v3844_v37 }
 0x400   :  { %v3024_v61 = vpop.eup %3023  ;;  %v3913_v1 = vmul.f32 0.70710677, %v1333_v13  ;;  %v1304_v22 = vmul.f32 %v3022_v53, %v3847_v50 }
 0x401   :  { %v3026_v47 = vpop.eup %3025  ;;  %v1322_v58 = vmul.f32 1.6666666, %v1306_v12  ;;  %v1307_v54 = vmul.f32 %v3024_v61, %v3851_v62  ;;  %v1366_v37 = vpack.c.bf16 %v3908_v0, %v3916_v59 }
 0x402   :  { %v1365_v28 = vpack.c.bf16 %v3913_v1, %v3911_v3  ;;  %v1320_v36 = vmul.f32 1.6666666, %v1304_v22  ;;  %v1305_v2 = vmul.f32 %v3026_v47, %v3855_v9 }
 0x403   :  { %v1323_v11 = vmul.f32 1.6666666, %v1307_v54  ;;  %v1338_v50 = vadd.f32 %v1322_v58, %v3715_v56 }
 0x404   :  { %v1336_v60 = vadd.f32 %v1320_v36, %v3711_v63  ;;  %v1321_v55 = vmul.f32 1.6666666, %v1305_v2  ;;  %2747 = vmatprep.mubr.msk.bf16.mxu0 %vm38_vm2, %v1365_v28 }
 0x405   :  { %v1339_v39 = vadd.f32 %v1323_v11, %v3709_v44  ;;  %2748 = vmatmul.mubr.msk.bf16.gmra.mrb[44].mxu0 %vm38_vm2, %v1366_v37  ;;  %v3936_v31 = vmul.f32 0.70710677, %v1338_v50  ;;  %v2823_v44 = vld [vmem:[%s4172_s6 + $0x30] sm:$0xff]  }
 0x406   :  { %v1337_v62 = vadd.f32 %v1321_v55, %v3713_v57  ;;  %v3932_v9 = vmul.f32 0.70710677, %v1336_v60  ;;  %2755 = vmatprep.subr.bf16.mxu1 %v2823_v44  ;;  %v2824_v57 = vld [vmem:[%s4172_s6 + $0x38] sm:$0xff]  }
 0x407   :  { %v3930_v4 = vmul.f32 0.70710677, %v1339_v39  ;;  %2756 = vmatpush3.bf16.msra.mxu1 %v2823_v44 }
 0x408   :  { %v3934_v40 = vmul.f32 0.70710677, %v1337_v62  ;;  %2757 = vmatprep.subr.bf16.mxu1 %v2824_v57 }
 0x409   :  { %v1368_v56 = vpack.c.bf16 %v3930_v4, %v3936_v31 }
 0x40a   :  { %v1367_v63 = vpack.c.bf16 %v3934_v40, %v3932_v9 }
 0x40b   :  { %2758 = vmatpush3.bf16.msra.mxu1 %v2824_v57 }
 0x40c   :  { %2751 = vmatprep.mubr.msk.bf16.mxu0 %vm38_vm2, %v1367_v63 }
 0x40d   :  { %2752 = vmatmul.mubr.msk.bf16.gmra.mrb[48].mxu0 %vm38_vm2, %v1368_v56 }
 0x4c7   :  { %v3950_v14 = vpop.f32.mrb[36].mxu0 }
 0x4c8   :  { %v2397_v5 = vmul.f32 -1.442695, %v3950_v14  ;;  %v3953_v8 = vpop.f32.mrb[37].mxu0 }
 0x4c9   :  { %v2395_v18 = vmul.f32 -1.442695, %v3953_v8  ;;  %v3956_v6 = vpop.f32.mrb[38].mxu0 }
 0x4ca   :  { %3027 = vpow2.f32 %v2397_v5  ;;  %v2398_v20 = vmul.f32 -1.442695, %v3956_v6  ;;  %v3959_v27 = vpop.f32.mrb[39].mxu0 }
 0x4cb   :  { %3029 = vpow2.f32 %v2395_v18  ;;  %v2396_v17 = vmul.f32 -1.442695, %v3959_v27 }
 0x4cc   :  { %3031 = vpow2.f32 %v2398_v20 }
 0x4cd   :  { %3033 = vpow2.f32 %v2396_v17 }
 0x4cf   :  { %v3962_v33 = vpop.f32.mrb[40].mxu0 }
 0x4d0   :  { %v2401_v42 = vmul.f32 -1.442695, %v3962_v33  ;;  %v3965_v15 = vpop.f32.mrb[41].mxu0 }
 0x4d1   :  { %v2399_v30 = vmul.f32 -1.442695, %v3965_v15  ;;  %v3968_v7 = vpop.f32.mrb[42].mxu0 }
 0x4d2   :  { %3035 = vpow2.f32 %v2401_v42  ;;  %v2402_v26 = vmul.f32 -1.442695, %v3968_v7  ;;  %v3971_v49 = vpop.f32.mrb[43].mxu0 }
 0x4d3   :  { %3037 = vpow2.f32 %v2399_v30  ;;  %v2400_v23 = vmul.f32 -1.442695, %v3971_v49 }
 0x4d4   :  { %v3028_v38 = vpop.eup %3027  ;;  %3039 = vpow2.f32 %v2402_v26 }
 0x4d5   :  { %v3030_v29 = vpop.eup %3029  ;;  %v1552_v19 = vadd.f32 1.0, %v3028_v38  ;;  %3041 = vpow2.f32 %v2400_v23 }
 0x4d6   :  { %v3032_v10 = vpop.eup %3031  ;;  %v1550_v35 = vadd.f32 1.0, %v3030_v29 }
 0x4d7   :  { %v3034_v51 = vpop.eup %3033  ;;  %3043 = vrcp.f32 %v1552_v19  ;;  %v1553_v41 = vadd.f32 1.0, %v3032_v10 }
 0x4d8   :  { %3045 = vrcp.f32 %v1550_v35  ;;  %v1551_v16 = vadd.f32 1.0, %v3034_v51  ;;  %v3974_v52 = vpop.f32.mrb[44].mxu0 }
 0x4d9   :  { %3047 = vrcp.f32 %v1553_v41  ;;  %v2405_v32 = vmul.f32 -1.442695, %v3974_v52  ;;  %v3977_v13 = vpop.f32.mrb[45].mxu0 }
 0x4da   :  { %3049 = vrcp.f32 %v1551_v16  ;;  %v2403_v53 = vmul.f32 -1.442695, %v3977_v13  ;;  %v3980_v12 = vpop.f32.mrb[46].mxu0 }
 0x4db   :  { %3051 = vpow2.f32 %v2405_v32  ;;  %v2406_v61 = vmul.f32 -1.442695, %v3980_v12  ;;  %v3983_v22 = vpop.f32.mrb[47].mxu0 }
 0x4dc   :  { %v3036_v47 = vpop.eup %3035  ;;  %3053 = vpow2.f32 %v2403_v53  ;;  %v2404_v58 = vmul.f32 -1.442695, %v3983_v22 }
 0x4dd   :  { %v3038_v54 = vpop.eup %3037  ;;  %v1556_v28 = vadd.f32 1.0, %v3036_v47  ;;  %3055 = vpow2.f32 %v2406_v61 }
 0x4de   :  { %v3040_v36 = vpop.eup %3039  ;;  %v1554_v2 = vadd.f32 1.0, %v3038_v54  ;;  %3057 = vpow2.f32 %v2404_v58 }
 0x4df   :  { %v3042_v37 = vpop.eup %3041  ;;  %3059 = vrcp.f32 %v1556_v28  ;;  %v1557_v11 = vadd.f32 1.0, %v3040_v36 }
 0x4e0   :  { %3061 = vrcp.f32 %v1554_v2  ;;  %v1555_v60 = vadd.f32 1.0, %v3042_v37  ;;  %v3986_v55 = vpop.f32.mrb[48].mxu0 }
 0x4e1   :  { %v3044_v50 = vpop.eup %3043  ;;  %3063 = vrcp.f32 %v1557_v11  ;;  %v2409_v39 = vmul.f32 -1.442695, %v3986_v55  ;;  %v3989_v62 = vpop.f32.mrb[49].mxu0 }
 0x4e2   :  { %v3046_v63 = vpop.eup %3045  ;;  %v1600_v56 = vmul.f32 %v3044_v50, %v3950_v14  ;;  %3065 = vrcp.f32 %v1555_v60  ;;  %v2407_v44 = vmul.f32 -1.442695, %v3989_v62  ;;  %v3993_v57 = vpop.f32.mrb[50].mxu0 }
 0x4e3   :  { %v3048_v5 = vpop.eup %3047  ;;  %v1598_v18 = vmul.f32 %v3046_v63, %v3953_v8  ;;  %3067 = vpow2.f32 %v2409_v39  ;;  %v2410_v20 = vmul.f32 -1.442695, %v3993_v57  ;;  %v3997_v17 = vpop.f32.mrb[51].mxu0 }
 0x4e4   :  { %v3050_v42 = vpop.eup %3049  ;;  %v1601_v30 = vmul.f32 %v3048_v5, %v3956_v6  ;;  %3069 = vpow2.f32 %v2407_v44  ;;  %v2408_v26 = vmul.f32 -1.442695, %v3997_v17  ;;  %v1616_v29 = vmul.f32 1.6666666, %v1600_v56 }
 0x4e5   :  { %v3052_v14 = vpop.eup %3051  ;;  %v1599_v23 = vmul.f32 %v3050_v42, %v3959_v27  ;;  %3071 = vpow2.f32 %v2410_v20  ;;  %v1614_v35 = vmul.f32 1.6666666, %v1598_v18 }
 0x4e6   :  { %v3054_v38 = vpop.eup %3053  ;;  %v1617_v19 = vmul.f32 1.6666666, %v1601_v30  ;;  %v1560_v10 = vadd.f32 1.0, %v3052_v14  ;;  %3073 = vpow2.f32 %v2408_v26 }
 0x4e7   :  { %v3056_v8 = vpop.eup %3055  ;;  %v1615_v51 = vmul.f32 1.6666666, %v1599_v23  ;;  %v1558_v41 = vadd.f32 1.0, %v3054_v38 }
 0x4e8   :  { %v3058_v16 = vpop.eup %3057  ;;  %v1636_v32 = vpack.c.bf16 %v1617_v19, %v1616_v29  ;;  %3075 = vrcp.f32 %v1560_v10  ;;  %v1561_v6 = vadd.f32 1.0, %v3056_v8 }
 0x4e9   :  { %v3060_v53 = vpop.eup %3059  ;;  %v1635_v61 = vpack.c.bf16 %v1615_v51, %v1614_v35  ;;  %3077 = vrcp.f32 %v1558_v41  ;;  %v1559_v47 = vadd.f32 1.0, %v3058_v16 }
 0x4ea   :  { %v3062_v58 = vpop.eup %3061  ;;  %v1604_v27 = vmul.f32 %v3060_v53, %v3962_v33  ;;  %3079 = vrcp.f32 %v1561_v6 }
 0x4eb   :  { %v3064_v54 = vpop.eup %3063  ;;  %v1602_v28 = vmul.f32 %v3062_v58, %v3965_v15  ;;  %3081 = vrcp.f32 %v1559_v47  ;;  %2759 = vmatprep.mubr.msk.bf16.mxu1 %vm38_vm2, %v1635_v61 }
 0x4ec   :  { %v3066_v36 = vpop.eup %3065  ;;  %v1605_v2 = vmul.f32 %v3064_v54, %v3968_v7  ;;  %2760 = vmatmul.mubr.msk.bf16.vlgmr.msra.gmra.mrb[36].mxu1 %vm38_vm2, %v1636_v32  ;;  %v1620_v50 = vmul.f32 1.6666666, %v1604_v27 }
 0x4ed   :  { %v3068_v37 = vpop.eup %3067  ;;  %v1603_v11 = vmul.f32 %v3066_v36, %v3971_v49  ;;  %v1618_v56 = vmul.f32 1.6666666, %v1602_v28 }
 0x4ee   :  { %v3070_v60 = vpop.eup %3069  ;;  %v1621_v39 = vmul.f32 1.6666666, %v1605_v2  ;;  %v1564_v63 = vadd.f32 1.0, %v3068_v37 }
 0x4ef   :  { %v3072_v33 = vpop.eup %3071  ;;  %v1619_v44 = vmul.f32 1.6666666, %v1603_v11  ;;  %v1562_v5 = vadd.f32 1.0, %v3070_v60 }
 0x4f0   :  { %v3074_v15 = vpop.eup %3073  ;;  %v1638_v18 = vpack.c.bf16 %v1621_v39, %v1620_v50  ;;  %3083 = vrcp.f32 %v1564_v63  ;;  %v1565_v20 = vadd.f32 1.0, %v3072_v33 }
 0x4f1   :  { %v1637_v42 = vpack.c.bf16 %v1619_v44, %v1618_v56  ;;  %3085 = vrcp.f32 %v1562_v5  ;;  %v1563_v7 = vadd.f32 1.0, %v3074_v15 }
 0x4f2   :  { %v3076_v30 = vpop.eup %3075  ;;  %3087 = vrcp.f32 %v1565_v20 }
 0x4f3   :  { %v3078_v26 = vpop.eup %3077  ;;  %v1608_v49 = vmul.f32 %v3076_v30, %v3974_v52  ;;  %3089 = vrcp.f32 %v1563_v7  ;;  %2763 = vmatprep.mubr.msk.bf16.mxu1 %vm38_vm2, %v1637_v42 }
 0x4f4   :  { %v3080_v14 = vpop.eup %3079  ;;  %v1606_v23 = vmul.f32 %v3078_v26, %v3977_v13  ;;  %2764 = vmatmul.mubr.msk.bf16.gmra.mrb[40].mxu1 %vm38_vm2, %v1638_v18 }
 0x4f5   :  { %v3082_v38 = vpop.eup %3081  ;;  %v1609_v29 = vmul.f32 %v3080_v14, %v3980_v12  ;;  %v1624_v10 = vmul.f32 1.6666666, %v1608_v49 }
 0x4f6   :  { %v1607_v19 = vmul.f32 %v3082_v38, %v3983_v22  ;;  %v1622_v35 = vmul.f32 1.6666666, %v1606_v23 }
 0x4f7   :  { %v1625_v8 = vmul.f32 1.6666666, %v1609_v29 }
 0x4f8   :  { %v1623_v51 = vmul.f32 1.6666666, %v1607_v19  ;;  %v4054_v19 = vpop.permute.xlu0 %1936 }
 0x4f9   :  { %v1640_v41 = vpack.c.bf16 %v1625_v8, %v1624_v10 }
 0x4fa   :  { %v3084_v16 = vpop.eup %3083  ;;  %v1639_v52 = vpack.c.bf16 %v1623_v51, %v1622_v35  ;;  %v4059_v35 = vpop.permute.xlu1 %1938 }
 0x4fb   :  { %v3086_v32 = vpop.eup %3085  ;;  %v1612_v6 = vmul.f32 %v3084_v16, %v3986_v55  ;;  %v2825_v55 = vld [vmem:[%s4173_s7] sm:$0xff]  }
 0x4fc   :  { %v3088_v53 = vpop.eup %3087  ;;  %v1610_v13 = vmul.f32 %v3086_v32, %v3989_v62  ;;  %2767 = vmatprep.mubr.msk.bf16.mxu1 %vm38_vm2, %v1639_v52  ;;  %2775 = vmatprep.subr.bf16.mxu0 %v2825_v55  ;;  %v2826_v62 = vld [vmem:[%s4173_s7 + $0x8] sm:$0xff]   ;;  %s3230_s7 = smov [#allocation6]  }
 0x4fd   :  { %v3090_v61 = vpop.eup %3089  ;;  %v1613_v12 = vmul.f32 %v3088_v53, %v3993_v57  ;;  %2768 = vmatmul.mubr.msk.bf16.gmra.mrb[44].mxu1 %vm38_vm2, %v1640_v41  ;;  %v1628_v47 = vmul.f32 1.6666666, %v1612_v6  ;;  %2776 = vmatpush3.bf16.msra.mxu0 %v2825_v55  ;;  %s2243_s26 = sshll.u32 %s3230_s7, 4  ;;  %s2244_s26 = int_to_ptr.vmem [resolvable:$true] %s2243_s26 }
 0x4fe   :  { %v1611_v22 = vmul.f32 %v3090_v61, %v3997_v17  ;;  %v1626_v27 = vmul.f32 1.6666666, %v1610_v13  ;;  %2777 = vmatprep.subr.bf16.mxu0 %v2826_v62  ;;  %s3155_s27 = scalar_lea.vmem %s2244_s26, 128  ;;  %p3160_p1 = scmp.lt.s32.totalorder %s2244_s26, %s2244_s26 }
 0x4ff   :  { %v1629_v58 = vmul.f32 1.6666666, %v1613_v12  ;;  %p3156_p0 = scmp.ne.s32.totalorder %s2244_s26, %s3155_s27  ;;  %p3161_p2 = scmp.lt.s32.totalorder %s3155_s27, %s3155_s27 }
 0x500   :  { %v1627_v54 = vmul.f32 1.6666666, %v1611_v22 }
 0x501   :  { %v1642_v28 = vpack.c.bf16 %v1629_v58, %v1628_v47  ;;  %2778 = vmatpush3.bf16.msra.mxu0 %v2826_v62  ;;  %v1941_v47 = vpop.permute.xlu0 %1940  ;;  %p3162_p3 = por %p3161_p2, %p3160_p1 }
 0x502   :  { %v1641_v36 = vpack.c.bf16 %v1627_v54, %v1626_v27  ;;  %v1943_v27 = vpop.permute.xlu1 %1942 }
 0x503   :  { %p3163_p4 = pnand %p3162_p3, %p3156_p0 }
 0x504   :  { %2771 = vmatprep.mubr.msk.bf16.mxu1 %vm38_vm2, %v1641_v36 }
 0x505   :  { %2772 = vmatmul.mubr.msk.bf16.gmra.mrb[48].mxu1 %vm38_vm2, %v1642_v28 }
 0x5bf   :  { %v4028_v57 = vpop.f32.mrb[36].mxu1 }
 0x5c0   :  { %v2427_v17 = vmul.f32 -1.442695, %v4028_v57  ;;  %v4031_v2 = vpop.f32.mrb[37].mxu1 }
 0x5c1   :  { %v2425_v37 = vmul.f32 -1.442695, %v4031_v2  ;;  %v4034_v11 = vpop.f32.mrb[38].mxu1 }
 0x5c2   :  { %3091 = vpow2.f32 %v2427_v17  ;;  %v2428_v60 = vmul.f32 -1.442695, %v4034_v11  ;;  %v4037_v50 = vpop.f32.mrb[39].mxu1 }
 0x5c3   :  { %3093 = vpow2.f32 %v2425_v37  ;;  %v2426_v39 = vmul.f32 -1.442695, %v4037_v50 }
 0x5c4   :  { %3095 = vpow2.f32 %v2428_v60 }
 0x5c5   :  { %3097 = vpow2.f32 %v2426_v39 }
 0x5c7   :  { %v4040_v63 = vpop.f32.mrb[40].mxu1 }
 0x5c8   :  { %v2431_v33 = vmul.f32 -1.442695, %v4040_v63  ;;  %v4043_v56 = vpop.f32.mrb[41].mxu1 }
 0x5c9   :  { %v2429_v44 = vmul.f32 -1.442695, %v4043_v56  ;;  %v4046_v5 = vpop.f32.mrb[42].mxu1 }
 0x5ca   :  { %3099 = vpow2.f32 %v2431_v33  ;;  %v2432_v15 = vmul.f32 -1.442695, %v4046_v5  ;;  %v4049_v18 = vpop.f32.mrb[43].mxu1 }
 0x5cb   :  { %3101 = vpow2.f32 %v2429_v44  ;;  %v2430_v20 = vmul.f32 -1.442695, %v4049_v18 }
 0x5cc   :  { %v3092_v42 = vpop.eup %3091  ;;  %3103 = vpow2.f32 %v2432_v15 }
 0x5cd   :  { %v3094_v7 = vpop.eup %3093  ;;  %v1826_v30 = vadd.f32 1.0, %v3092_v42  ;;  %3105 = vpow2.f32 %v2430_v20 }
 0x5ce   :  { %v3096_v26 = vpop.eup %3095  ;;  %v1824_v49 = vadd.f32 1.0, %v3094_v7 }
 0x5cf   :  { %v3098_v14 = vpop.eup %3097  ;;  %3107 = vrcp.f32 %v1826_v30  ;;  %v1827_v23 = vadd.f32 1.0, %v3096_v26 }
 0x5d0   :  { %3109 = vrcp.f32 %v1824_v49  ;;  %v1825_v38 = vadd.f32 1.0, %v3098_v14  ;;  %v4052_v29 = vpop.f32.mrb[44].mxu1 }
 0x5d1   :  { %3111 = vrcp.f32 %v1827_v23  ;;  %v2435_v10 = vmul.f32 -1.442695, %v4052_v29  ;;  %v4057_v8 = vpop.f32.mrb[45].mxu1 }
 0x5d2   :  { %3113 = vrcp.f32 %v1825_v38  ;;  %v2433_v51 = vmul.f32 -1.442695, %v4057_v8  ;;  %v4062_v41 = vpop.f32.mrb[46].mxu1  ;;  %v4084_v38 = vpop.permute.xlu0 %1944 }
 0x5d3   :  { %3115 = vpow2.f32 %v2435_v10  ;;  %v2436_v16 = vmul.f32 -1.442695, %v4062_v41  ;;  %v4065_v52 = vpop.f32.mrb[47].mxu1 }
 0x5d4   :  { %v3100_v32 = vpop.eup %3099  ;;  %3117 = vpow2.f32 %v2433_v51  ;;  %v2434_v6 = vmul.f32 -1.442695, %v4065_v52 }
 0x5d5   :  { %v3102_v53 = vpop.eup %3101  ;;  %v1830_v13 = vadd.f32 1.0, %v3100_v32  ;;  %3119 = vpow2.f32 %v2436_v16 }
 0x5d6   :  { %v3104_v61 = vpop.eup %3103  ;;  %v1828_v12 = vadd.f32 1.0, %v3102_v53  ;;  %3121 = vpow2.f32 %v2434_v6 }
 0x5d7   :  { %v3106_v22 = vpop.eup %3105  ;;  %3123 = vrcp.f32 %v1830_v13  ;;  %v1831_v58 = vadd.f32 1.0, %v3104_v61 }
 0x5d8   :  { %3125 = vrcp.f32 %v1828_v12  ;;  %v1829_v54 = vadd.f32 1.0, %v3106_v22  ;;  %v4068_v28 = vpop.f32.mrb[48].mxu1 }
 0x5d9   :  { %v3108_v36 = vpop.eup %3107  ;;  %3127 = vrcp.f32 %v1831_v58  ;;  %v2439_v55 = vmul.f32 -1.442695, %v4068_v28  ;;  %v4071_v62 = vpop.f32.mrb[49].mxu1 }
 0x5da   :  { %v3110_v17 = vpop.eup %3109  ;;  %v1874_v37 = vmul.f32 %v3108_v36, %v4028_v57  ;;  %3129 = vrcp.f32 %v1829_v54  ;;  %v2437_v60 = vmul.f32 -1.442695, %v4071_v62  ;;  %v4075_v39 = vpop.f32.mrb[50].mxu1 }
 0x5db   :  { %v3112_v33 = vpop.eup %3111  ;;  %v1872_v44 = vmul.f32 %v3110_v17, %v4031_v2  ;;  %3131 = vpow2.f32 %v2439_v55  ;;  %v2440_v15 = vmul.f32 -1.442695, %v4075_v39  ;;  %v4079_v20 = vpop.f32.mrb[51].mxu1 }
 0x5dc   :  { %v3114_v42 = vpop.eup %3113  ;;  %v1890_v7 = vmul.f32 1.6666666, %v1874_v37  ;;  %v1875_v30 = vmul.f32 %v3112_v33, %v4034_v11  ;;  %3133 = vpow2.f32 %v2437_v60  ;;  %v2438_v57 = vmul.f32 -1.442695, %v4079_v20  ;;  %v4086_v2 = vpop.permute.xlu1 %1946 }
 0x5dd   :  { %v3116_v26 = vpop.eup %3115  ;;  %v1888_v49 = vmul.f32 1.6666666, %v1872_v44  ;;  %v1873_v14 = vmul.f32 %v3114_v42, %v4037_v50  ;;  %3135 = vpow2.f32 %v2440_v15 }
 0x5de   :  { %v3118_v23 = vpop.eup %3117  ;;  %v1906_v10 = vadd.f32 %v1890_v7, %v3872_v48  ;;  %v1891_v51 = vmul.f32 1.6666666, %v1875_v30  ;;  %v1834_v16 = vadd.f32 1.0, %v3116_v26  ;;  %3137 = vpow2.f32 %v2438_v57 }
 0x5df   :  { %v3120_v32 = vpop.eup %3119  ;;  %v1904_v11 = vadd.f32 %v1888_v49, %v3867_v25  ;;  %v1889_v6 = vmul.f32 1.6666666, %v1873_v14  ;;  %v1832_v53 = vadd.f32 1.0, %v3118_v23 }
 0x5e0   :  { %v3122_v13 = vpop.eup %3121  ;;  %v1922_v61 = vmul.f32 0.70710677, %v1906_v10  ;;  %v1907_v50 = vadd.f32 %v1891_v51, %v3864_v24  ;;  %3139 = vrcp.f32 %v1834_v16  ;;  %v1835_v12 = vadd.f32 1.0, %v3120_v32  ;;  %v1949_v24 = vpop.permute.xlu0 %1948 }
 0x5e1   :  { %v3124_v22 = vpop.eup %3123  ;;  %v1920_v58 = vmul.f32 0.70710677, %v1904_v11  ;;  %v1905_v54 = vadd.f32 %v1889_v6, %v3869_v46  ;;  %3141 = vrcp.f32 %v1832_v53  ;;  %v1833_v48 = vadd.f32 1.0, %v3122_v13  ;;  %v1951_v44 = vpop.permute.xlu1 %1950 }
 0x5e2   :  { %v3126_v36 = vpop.eup %3125  ;;  %v1923_v55 = vmul.f32 0.70710677, %v1907_v50  ;;  %v1878_v17 = vmul.f32 %v3124_v22, %v4040_v63  ;;  %3143 = vrcp.f32 %v1835_v12  ;;  %v1986_v15 = vmul.f32 %v1941_v47, %v1922_v61 }
 0x5e3   :  { %v3128_v25 = vpop.eup %3127  ;;  %v1921_v37 = vmul.f32 0.70710677, %v1905_v54  ;;  %v1876_v60 = vmul.f32 %v3126_v36, %v4043_v56  ;;  %3145 = vrcp.f32 %v1833_v48  ;;  %v1984_v57 = vmul.f32 %v4054_v19, %v1920_v58 }
 0x5e4   :  { %v3130_v33 = vpop.eup %3129  ;;  %v1987_v42 = vmul.f32 %v1943_v27, %v1923_v55  ;;  %v1894_v7 = vmul.f32 1.6666666, %v1878_v17  ;;  %v1879_v46 = vmul.f32 %v3128_v25, %v4046_v5  ;;  %v1953_v61 = vpop.permute.xlu0 %1952 }
 0x5e5   :  { %v3132_v30 = vpop.eup %3131  ;;  %v1985_v26 = vmul.f32 %v4059_v35, %v1921_v37  ;;  %v1892_v63 = vmul.f32 1.6666666, %v1876_v60  ;;  %v1877_v49 = vmul.f32 %v3130_v33, %v4049_v18  ;;  %v1955_v50 = vpop.permute.xlu1 %1954 }
 0x5e6   :  { %v3134_v14 = vpop.eup %3133  ;;  %v2005_v23 = vpack.c.bf16 %v1987_v42, %v1986_v15  ;;  %v1910_v56 = vadd.f32 %v1894_v7, %v3893_v43  ;;  %v1895_v10 = vmul.f32 1.6666666, %v1879_v46  ;;  %v1838_v51 = vadd.f32 1.0, %v3132_v30 }
 0x5e7   :  { %v3136_v16 = vpop.eup %3135  ;;  %v1908_v47 = vadd.f32 %v1892_v63, %v3888_v34  ;;  %v1893_v27 = vmul.f32 1.6666666, %v1877_v49  ;;  %v1836_v32 = vadd.f32 1.0, %v3134_v14  ;;  %v2004_v5 = vpack.c.bf16 %v1985_v26, %v1984_v57 }
 0x5e8   :  { %v3138_v11 = vpop.eup %3137  ;;  %v1926_v6 = vmul.f32 0.70710677, %v1910_v56  ;;  %v1911_v19 = vadd.f32 %v1895_v10, %v3886_v21  ;;  %3147 = vrcp.f32 %v1838_v51  ;;  %v1839_v35 = vadd.f32 1.0, %v3136_v16 }
 0x5e9   :  { %v1924_v53 = vmul.f32 0.70710677, %v1908_v47  ;;  %v1909_v18 = vadd.f32 %v1893_v27, %v3890_v45  ;;  %3149 = vrcp.f32 %v1836_v32  ;;  %v1837_v13 = vadd.f32 1.0, %v3138_v11  ;;  %2779 = vmatprep.mubr.msk.bf16.mxu0 %vm38_vm2, %v2004_v5 }
 0x5ea   :  { %v3140_v43 = vpop.eup %3139  ;;  %v1927_v34 = vmul.f32 0.70710677, %v1911_v19  ;;  %3151 = vrcp.f32 %v1839_v35  ;;  %2780 = vmatmul.mubr.msk.bf16.vlgmr.msra.gmra.mrb[52].mxu0 %vm38_vm2, %v2005_v23  ;;  %v1990_v54 = vmul.f32 %v1949_v24, %v1926_v6  ;;  %v1957_v24 = vpop.permute.xlu0 %1956 }
 0x5eb   :  { %v3142_v12 = vpop.eup %3141  ;;  %v1925_v22 = vmul.f32 0.70710677, %v1909_v18  ;;  %v1882_v21 = vmul.f32 %v3140_v43, %v4052_v29  ;;  %3153 = vrcp.f32 %v1837_v13  ;;  %v1988_v55 = vmul.f32 %v4084_v38, %v1924_v53 }
 0x5ec   :  { %v3144_v58 = vpop.eup %3143  ;;  %v1991_v48 = vmul.f32 %v1951_v44, %v1927_v34  ;;  %v1880_v45 = vmul.f32 %v3142_v12, %v4057_v8  ;;  %v1959_v44 = vpop.permute.xlu1 %1958 }
 0x5ed   :  { %v3146_v36 = vpop.eup %3145  ;;  %v1989_v17 = vmul.f32 %v4086_v2, %v1925_v22  ;;  %v1898_v25 = vmul.f32 1.6666666, %v1882_v21  ;;  %v1883_v37 = vmul.f32 %v3144_v58, %v4062_v41 }
 0x5ee   :  { %v1896_v60 = vmul.f32 1.6666666, %v1880_v45  ;;  %v1881_v33 = vmul.f32 %v3146_v36, %v4065_v52  ;;  %v2007_v15 = vpack.c.bf16 %v1991_v48, %v1990_v54  ;;  %v1961_v51 = vpop.permute.xlu0 %1960 }
 0x5ef   :  { %v1914_v29 = vadd.f32 %v1898_v25, %v3916_v59  ;;  %v1899_v42 = vmul.f32 1.6666666, %v1883_v37  ;;  %v2006_v7 = vpack.c.bf16 %v1989_v17, %v1988_v55 }
 0x5f0   :  { %v1912_v8 = vadd.f32 %v1896_v60, %v3911_v3  ;;  %v1897_v46 = vmul.f32 1.6666666, %v1881_v33  ;;  %v1963_v16 = vpop.permute.xlu1 %1962 }
 0x5f1   :  { %v1930_v30 = vmul.f32 0.70710677, %v1914_v29  ;;  %v1915_v38 = vadd.f32 %v1899_v42, %v3908_v0  ;;  %2783 = vmatprep.mubr.msk.bf16.mxu0 %vm38_vm2, %v2006_v7 }
 0x5f2   :  { %v3148_v2 = vpop.eup %3147  ;;  %v1928_v41 = vmul.f32 0.70710677, %v1912_v8  ;;  %v1913_v57 = vadd.f32 %v1897_v46, %v3913_v1  ;;  %2784 = vmatmul.mubr.msk.bf16.gmra.mrb[56].mxu0 %vm38_vm2, %v2007_v15 }
 0x5f3   :  { %v3150_v52 = vpop.eup %3149  ;;  %v1931_v59 = vmul.f32 0.70710677, %v1915_v38  ;;  %v1886_v26 = vmul.f32 %v3148_v2, %v4068_v28  ;;  %v1994_v23 = vmul.f32 %v1957_v24, %v1930_v30 }
 0x5f4   :  { %v3152_v63 = vpop.eup %3151  ;;  %v1929_v49 = vmul.f32 0.70710677, %v1913_v57  ;;  %v1884_v3 = vmul.f32 %v3150_v52, %v4071_v62  ;;  %v1992_v47 = vmul.f32 %v1953_v61, %v1928_v41  ;;  %v1967_v43 = vpop.permute.xlu1 %1966 }
 0x5f5   :  { %v3154_v14 = vpop.eup %3153  ;;  %v1995_v56 = vmul.f32 %v1959_v44, %v1931_v59  ;;  %v1902_v0 = vmul.f32 1.6666666, %v1886_v26  ;;  %v1887_v10 = vmul.f32 %v3152_v63, %v4075_v39 }
 0x5f6   :  { %v1993_v1 = vmul.f32 %v1955_v50, %v1929_v49  ;;  %v1900_v27 = vmul.f32 1.6666666, %v1884_v3  ;;  %v1885_v32 = vmul.f32 %v3154_v14, %v4079_v20  ;;  %v1965_v20 = vpop.permute.xlu0 %1964 }
 0x5f7   :  { %v1918_v5 = vadd.f32 %v1902_v0, %v3936_v31  ;;  %v1903_v28 = vmul.f32 1.6666666, %v1887_v10  ;;  %v2009_v11 = vpack.c.bf16 %v1995_v56, %v1994_v23 }
 0x5f8   :  { %v1916_v6 = vadd.f32 %v1900_v27, %v3932_v9  ;;  %v1901_v62 = vmul.f32 1.6666666, %v1885_v32  ;;  %v2008_v19 = vpack.c.bf16 %v1993_v1, %v1992_v47 }
 0x5f9   :  { %v1934_v35 = vmul.f32 0.70710677, %v1918_v5  ;;  %v1919_v53 = vadd.f32 %v1903_v28, %v3930_v4 }
 0x5fa   :  { %v1932_v18 = vmul.f32 0.70710677, %v1916_v6  ;;  %v1917_v39 = vadd.f32 %v1901_v62, %v3934_v40  ;;  %2787 = vmatprep.mubr.msk.bf16.mxu0 %vm38_vm2, %v2008_v19 }
 0x5fb   :  { %v1935_v13 = vmul.f32 0.70710677, %v1919_v53  ;;  %2788 = vmatmul.mubr.msk.bf16.gmra.mrb[60].mxu0 %vm38_vm2, %v2009_v11  ;;  %v1998_v61 = vmul.f32 %v1965_v20, %v1934_v35 }
 0x5fc   :  { %v1933_v31 = vmul.f32 0.70710677, %v1917_v39  ;;  %v1996_v34 = vmul.f32 %v1961_v51, %v1932_v18 }
 0x5fd   :  { %v1999_v50 = vmul.f32 %v1967_v43, %v1935_v13 }
 0x5fe   :  { %v1997_v9 = vmul.f32 %v1963_v16, %v1933_v31 }
 0x5ff   :  { %v2011_v12 = vpack.c.bf16 %v1999_v50, %v1998_v61 }
 0x600   :  { %v2010_v22 = vpack.c.bf16 %v1997_v9, %v1996_v34 }
 0x602   :  { %2791 = vmatprep.mubr.msk.bf16.mxu0 %vm38_vm2, %v2010_v22 }
 0x603   :  { %2792 = vmatmul.mubr.msk.bf16.gmra.mrb[64].mxu0 %vm38_vm2, %v2011_v12 }
 0x604   :  { %3166 = shalt.err (!%p3163_p4)
}
 0x605   :  { %s3167_s1 = scalar_lea.hbm %s4175_s9, 128 }
 0x606   :  { %p3168_p5 = scmp.ne.s32.totalorder %s4175_s9, %s3167_s1  ;;  %p3171_p6 = scmp.lt.u32.totalorder %s3167_s1, %s4175_s9 }
 0x608   :  { %p3173_p7 = pnand %p3171_p6, %p3168_p5 }
 0x60a   :  { %3176 = shalt.err (!%p3173_p7)
}
 0x60b   :  { %2246 = dma.vmem_to_hbm [thread:$0]  %s2244_s26, 128, %s4175_s9, [#allocation7]  }
 0x60c   :  { %s3231_s15 = smov [#allocation8]  }
 0x60d   :  { %s2253_s16 = sshll.u32 %s3231_s15, 4  ;;  %s2254_s16 = int_to_ptr.vmem [resolvable:$true] %s2253_s16 }
 0x60e   :  { %s3177_s17 = scalar_lea.vmem %s2254_s16, 128  ;;  %p3182_p9 = scmp.lt.s32.totalorder %s2254_s16, %s2254_s16 }
 0x60f   :  { %p3178_p8 = scmp.ne.s32.totalorder %s2254_s16, %s3177_s17  ;;  %p3183_p10 = scmp.lt.s32.totalorder %s3177_s17, %s3177_s17 }
 0x611   :  { %p3184_p11 = por %p3183_p10, %p3182_p9 }
 0x613   :  { %p3185_p12 = pnand %p3184_p11, %p3178_p8 }
 0x615   :  { %3188 = shalt.err (!%p3185_p12)
}
 0x616   :  { %s3189_s20 = scalar_lea.hbm %s4176_s10, 128 }
 0x617   :  { %p3190_p13 = scmp.ne.s32.totalorder %s4176_s10, %s3189_s20  ;;  %p3193_p0 = scmp.lt.u32.totalorder %s3189_s20, %s4176_s10 }
 0x619   :  { %p3195_p1 = pnand %p3193_p0, %p3190_p13 }
 0x61b   :  { %3198 = shalt.err (!%p3195_p1)
}
 0x61c   :  { %2256 = dma.vmem_to_hbm [thread:$0]  %s2254_s16, 128, %s4176_s10, [#allocation7]  }
 0x61d   :  { %s3232_s10 = smov [#allocation4]  }
 0x61e   :  { %s2230_s6 = sshll.u32 %s3232_s10, 4  ;;  %s2231_s6 = int_to_ptr.vmem [resolvable:$true] %s2230_s6 }
 0x61f   :  { %s3199_s2 = scalar_lea.vmem %s2231_s6, 1024  ;;  %p3204_p3 = scmp.lt.s32.totalorder %s2231_s6, %s2231_s6 }
 0x620   :  { %p3200_p2 = scmp.ne.s32.totalorder %s2231_s6, %s3199_s2  ;;  %p3205_p4 = scmp.lt.s32.totalorder %s3199_s2, %s3199_s2 }
 0x622   :  { %p3206_p5 = por %p3205_p4, %p3204_p3 }
 0x624   :  { %p3207_p6 = pnand %p3206_p5, %p3200_p2 }
 0x6bd   :  { %v2781_v4 = vpop.f32.mrb[52].mxu0 }
 0x6be   :  { %v2082_v40 = vpop.f32.mrb[53].mxu0 }
 0x6bf   :  { %v2782_v21 = vpop.f32.mrb[54].mxu0 }
 0x6c0   :  { %v2491_v58 = vpack.c.bf16 %v2782_v21, %v2781_v4  ;;  %v2085_v54 = vpop.f32.mrb[55].mxu0 }
 0x6c1   :  { %v2486_v48 = vpack.c.bf16 %v2085_v54, %v2082_v40 }
 0x6c2   :  { %2523 = vst [vmem:[#allocation4 + $0x8] sm:$0xff] %v2491_v58  }
 0x6c3   :  { %2487 = vst [vmem:[#allocation4] sm:$0xff] %v2486_v48  }
 0x6c5   :  { %v2785_v45 = vpop.f32.mrb[56].mxu0 }
 0x6c6   :  { %v2098_v36 = vpop.f32.mrb[57].mxu0 }
 0x6c7   :  { %v2786_v55 = vpop.f32.mrb[58].mxu0 }
 0x6c8   :  { %v2501_v17 = vpack.c.bf16 %v2786_v55, %v2785_v45  ;;  %v2101_v25 = vpop.f32.mrb[59].mxu0 }
 0x6c9   :  { %v2496_v37 = vpack.c.bf16 %v2101_v25, %v2098_v36 }
 0x6ca   :  { %2525 = vst [vmem:[#allocation4 + $0x18] sm:$0xff] %v2501_v17  }
 0x6cb   :  { %2524 = vst [vmem:[#allocation4 + $0x10] sm:$0xff] %v2496_v37  }
 0x6ce   :  { %v2789_v60 = vpop.f32.mrb[60].mxu0 }
 0x6cf   :  { %v2114_v33 = vpop.f32.mrb[61].mxu0 }
 0x6d0   :  { %v2790_v15 = vpop.f32.mrb[62].mxu0 }
 0x6d1   :  { %v2511_v29 = vpack.c.bf16 %v2790_v15, %v2789_v60  ;;  %v2117_v42 = vpop.f32.mrb[63].mxu0 }
 0x6d2   :  { %v2506_v7 = vpack.c.bf16 %v2117_v42, %v2114_v33 }
 0x6d3   :  { %2527 = vst [vmem:[#allocation4 + $0x28] sm:$0xff] %v2511_v29  }
 0x6d4   :  { %2526 = vst [vmem:[#allocation4 + $0x20] sm:$0xff] %v2506_v7  }
 0x6d6   :  { %v2793_v24 = vpop.f32.mrb[64].mxu0 }
 0x6d7   :  { %v2130_v44 = vpop.f32.mrb[65].mxu0 }
 0x6d8   :  { %v2794_v8 = vpop.f32.mrb[66].mxu0 }
 0x6d9   :  { %v2521_v46 = vpack.c.bf16 %v2794_v8, %v2793_v24  ;;  %v2133_v30 = vpop.f32.mrb[67].mxu0 }
 0x6da   :  { %v2516_v38 = vpack.c.bf16 %v2133_v30, %v2130_v44 }
 0x6db   :  { %2529 = vst [vmem:[#allocation4 + $0x38] sm:$0xff] %v2521_v46  }
 0x6dc   :  { %2528 = vst [vmem:[#allocation4 + $0x30] sm:$0xff] %v2516_v38  }
 0x6dd   :  { %3210 = shalt.err (!%p3207_p6)
}
 0x6de   :  { %s3211_s7 = scalar_lea.hbm %s4174_s8, 1024 }
 0x6df   :  { %p3212_p7 = scmp.ne.s32.totalorder %s4174_s8, %s3211_s7  ;;  %p3215_p8 = scmp.lt.u32.totalorder %s3211_s7, %s4174_s8 }
 0x6e1   :  { %p3217_p9 = pnand %p3215_p8, %p3212_p7 }
 0x6e3   :  { %3220 = shalt.err (!%p3217_p9)
}
 0x6e4   :  { %s3233_s1 = smov 4  }
 0x6e5   :  { %2236 = dma.vmem_to_hbm [thread:$0]  %s2231_s6, 1024, %s4174_s8, [#allocation5], %s3227_s13, %s3227_s13, %s3233_s1  }
 0x6e6   :  { %3221 = dma.done.wait [#allocation5], 1024  }
 0x6e7   :  { %3222 = vsyncadd [#allocation5], 4294966272 }
 0x6e8   :  { %3223 = dma.done.wait [#allocation7], 256  }
 0x6e9   :  { %3224 = vsyncadd [#allocation7], 4294967040 }
 0x6ea   :  { %2266 = vsyncpa [#allocation5], 1 }
 0x6eb   :  { %2267 = vsyncpa [#allocation7], 1 }

// kernel: tpu_custom_call.1
= control target key start
LH: loop header
LB: loop body
LE: loop exit
PB: predicated region body
PF: predicated region fallthrough
CT: control target
= control target key end

     0   :  { %17 = vsyncpa [#allocation5], 0  ;;  %vm121_vm0 = vcmask 130048   ;;  %s4166_s0 = inlined_call_operand.<no memory space> [shape: s32[1], index: 0, kind: input, shape index: {}]   ;;  %s4167_s1 = inlined_call_operand.vmem [shape: s32[1,128], index: 1, kind: input, shape index: {}]   ;;  %s4168_s2 = inlined_call_operand.vmem [shape: bf16[128,32], index: 2, kind: input, shape index: {}]   ;;  %s4169_s3 = inlined_call_operand.vmem [shape: bf16[128,16], index: 3, kind: input, shape index: {}]   ;;  %s4170_s4 = inlined_call_operand.vmem [shape: bf16[16,96], index: 4, kind: input, shape index: {}]   ;;  %s4171_s5 = inlined_call_operand.vmem [shape: bf16[32,32], index: 5, kind: input, shape index: {}]   ;;  %s4172_s6 = inlined_call_operand.vmem [shape: bf16[4,32,32], index: 6, kind: input, shape index: {}]   ;;  %s4173_s7 = inlined_call_operand.vmem [shape: bf16[32,128], index: 7, kind: input, shape index: {}]   ;;  %s4174_s8 = inlined_call_operand.hbm [shape: bf16[128,128], index: 8, kind: output, shape index: {0}]   ;;  %s4175_s9 = inlined_call_operand.hbm [shape: f32[8,32], index: 9, kind: output, shape index: {1}]   ;;  %s4176_s10 = inlined_call_operand.hbm [shape: f32[8,32], index: 10, kind: output, shape index: {2}]  }
   0x1   :  { %v2804_v0 = vld [vmem:[%s4170_s4] sm:$0xff]   ;;  %v2806_v2 = vld [vmem:[%s4169_s3 + $0x8] sm:$0xff]   ;;  %v2807_v3 = vld [vmem:[%s4169_s3 + $0x10] sm:$0xff]  }
   0x2   :  { %v2805_v1 = vld [vmem:[%s4169_s3] sm:$0xff]   ;;  %2617 = vmatprep.subr.bf16.mxu0 %v2804_v0  ;;  %v2808_v4 = vld [vmem:[%s4169_s3 + $0x18] sm:$0xff]  }
   0x3   :  { %2618 = vmatpush3.bf16.msra.mxu0 %v2804_v0  ;;  %2619 = vmatprep.mubr.msk.bf16.mxu0 %vm121_vm0, %v2805_v1  ;;  %v2809_v5 = vld [vmem:[%s4169_s3 + $0x20] sm:$0xff]  }
   0x6   :  { %2620 = vmatmul.mubr.msk.bf16.vlgmr.msra.gmra.mrb[0].mxu0 %vm121_vm0, %v2806_v2 }
   0x7   :  { %2623 = vmatprep.mubr.msk.bf16.mxu0 %vm121_vm0, %v2807_v3 }
   0xe   :  { %2624 = vmatmul.mubr.msk.bf16.gmra.mrb[4].mxu0 %vm121_vm0, %v2808_v4 }
   0xf   :  { %2627 = vmatprep.mubr.msk.bf16.mxu0 %vm121_vm0, %v2809_v5 }
  0x10   :  { %18 = vsyncpa [#allocation7], 0  ;;  %v2810_v6 = vld [vmem:[%s4169_s3 + $0x28] sm:$0xff]   ;;  %v2811_v7 = vld [vmem:[%s4169_s3 + $0x30] sm:$0xff]   ;;  %v3225_v9 = vmov 0.0   ;;  %vm3226_vm1 = vmmov 0   ;;  %v373_v59 = vlaneseq  ;;  %v375_v5 = vstv %s4166_s0 }
  0x11   :  { %v2812_v8 = vld [vmem:[%s4169_s3 + $0x38] sm:$0xff]   ;;  %2635 = vmatprep.subr.bf16.mxu1 %v3225_v9  ;;  %2655 = vmatprep.subr.bf16.mxu0 %v3225_v9  ;;  %vm38_vm2 = vcmask 261120   ;;  %v3335_v10 = vld [vmem:[%s4168_s2 + $0x8] sm:$0xff]   ;;  %v3340_v11 = vld [vmem:[%s4168_s2] sm:$0xff]   ;;  %s3227_s13 = smov 64   ;;  %s3228_s29 = smov 96  }
  0x12   :  { %2651 = vmatprep.mubr.msk.bf16.mxu1 %vm3226_vm1, %v3225_v9  ;;  %39 = vst.msk [vmem:[#allocation6] sm:$0xff] %vm38_vm2, %v3225_v9  ;;  %40 = vst.msk [vmem:[#allocation8] sm:$0xff] %vm38_vm2, %v3225_v9  ;;  %v245_v12 = vunpack.c.l.bf16 %v3335_v10  ;;  %v246_v13 = vunpack.c.h.bf16 %v3335_v10  ;;  %v243_v15 = vunpack.c.l.bf16 %v3340_v11  ;;  %v244_v16 = vunpack.c.h.bf16 %v3340_v11  ;;  %v3367_v22 = vld [vmem:[%s4168_s2 + $0x18] sm:$0xff]   ;;  %v3380_v25 = vld [vmem:[%s4168_s2 + $0x10] sm:$0xff]  }
  0x13   :  { %v249_v28 = vunpack.c.l.bf16 %v3367_v22  ;;  %v250_v29 = vunpack.c.h.bf16 %v3367_v22  ;;  %v247_v31 = vunpack.c.l.bf16 %v3380_v25  ;;  %v248_v32 = vunpack.c.h.bf16 %v3380_v25  ;;  %v3416_v40 = vld [vmem:[%s4168_s2 + $0x28] sm:$0xff]   ;;  %v3422_v41 = vld [vmem:[%s4168_s2 + $0x20] sm:$0xff]   ;;  %v3460_v56 = vld [vmem:[%s4168_s2 + $0x38] sm:$0xff]  }
  0x14   :  { %v253_v44 = vunpack.c.l.bf16 %v3416_v40  ;;  %v254_v45 = vunpack.c.h.bf16 %v3416_v40  ;;  %v251_v47 = vunpack.c.l.bf16 %v3422_v41  ;;  %v252_v48 = vunpack.c.h.bf16 %v3422_v41  ;;  %v3466_v57 = vld [vmem:[%s4168_s2 + $0x30] sm:$0xff]  }
  0x15   :  { %v257_v61 = vunpack.c.l.bf16 %v3460_v56  ;;  %v258_v62 = vunpack.c.h.bf16 %v3460_v56  ;;  %v255_v0 = vunpack.c.l.bf16 %v3466_v57  ;;  %v256_v1 = vunpack.c.h.bf16 %v3466_v57 }
  0x16   :  { %2628 = vmatmul.mubr.msk.bf16.gmra.mrb[8].mxu0 %vm121_vm0, %v2810_v6  ;;  %v374_v3 = vshrl.u32 %v373_v59, 7 }
  0x17   :  { %2631 = vmatprep.mubr.msk.bf16.mxu0 %vm121_vm0, %v2811_v7 }
  0x1e   :  { %2632 = vmatmul.mubr.msk.bf16.gmra.mrb[12].mxu0 %vm121_vm0, %v2812_v8 }
  0x1f   :  { %2671 = vmatprep.mubr.msk.bf16.mxu0 %vm3226_vm1, %v3225_v9 }
  0xd9   :  { %v3344_v14 = vpop.f32.mrb[0].mxu0 }
  0xda   :  { %303 = vrot.lane.b32.xlu1 %v3344_v14, %s3227_s13  ;;  %v3350_v17 = vpop.f32.mrb[1].mxu0  ;;  %v261_v19 = vmul.f32 %v3344_v14, %v245_v12 }
  0xdb   :  { %299 = vrot.lane.b32.xlu0 %v3350_v17, %s3227_s13  ;;  %v3354_v18 = vpop.f32.mrb[2].mxu0  ;;  %v259_v23 = vmul.f32 %v243_v15, %v3350_v17 }
  0xdc   :  { %v262_v20 = vmul.f32 %v3354_v18, %v246_v13  ;;  %v3362_v21 = vpop.f32.mrb[3].mxu0 }
  0xdd   :  { %v260_v24 = vmul.f32 %v244_v16, %v3362_v21 }
  0xde   :  { %305 = vrot.lane.b32.xlu1 %v3354_v18, %s3227_s13  ;;  %v276_v26 = vpack.c.bf16 %v262_v20, %v261_v19 }
  0xdf   :  { %301 = vrot.lane.b32.xlu0 %v3362_v21, %s3227_s13  ;;  %v275_v27 = vpack.c.bf16 %v260_v24, %v259_v23  ;;  %v376_v24 = vadd.s32 %v375_v5, %v374_v3 }
  0xe1   :  { %v3386_v30 = vpop.f32.mrb[4].mxu0  ;;  %2636 = vmatpush3.bf16.msra.mxu1 %v275_v27  ;;  %v2285_v27 = vld [vmem:[%s4167_s1] ss:$0 sm:$0xff] }
  0xe2   :  { %v3390_v33 = vpop.f32.mrb[5].mxu0  ;;  %2637 = vmatprep.subr.bf16.mxu1 %v3225_v9  ;;  %v265_v35 = vmul.f32 %v3386_v30, %v249_v28  ;;  %vm381_vm3 = vcmp.eq.s32.totalorder %v376_v24, %v2285_v27 }
  0xe3   :  { %307 = vrot.lane.b32.xlu0 %v3390_v33, %s3227_s13  ;;  %v3395_v34 = vpop.f32.mrb[6].mxu0  ;;  %v263_v38 = vmul.f32 %v247_v31, %v3390_v33  ;;  %vm3504_vm4 = vmpackc.low %vm381_vm3, %vm381_vm3 }
  0xe4   :  { %v266_v36 = vmul.f32 %v3395_v34, %v250_v29  ;;  %v3403_v37 = vpop.f32.mrb[7].mxu0 }
  0xe5   :  { %v264_v39 = vmul.f32 %v248_v32, %v3403_v37  ;;  %309 = vrot.lane.b32.xlu1 %v3403_v37, %s3227_s13  ;;  %2638 = vmatpush3.bf16.msra.mxu1 %v276_v26 }
  0xe6   :  { %2639 = vmatprep.subr.bf16.mxu1 %v3225_v9  ;;  %v278_v42 = vpack.c.bf16 %v266_v36, %v265_v35  ;;  %v2814_v35 = vld [vmem:[%s4171_s5] sm:$0xff]  }
  0xe7   :  { %311 = vrot.lane.b32.xlu0 %v3386_v30, %s3227_s13  ;;  %v277_v43 = vpack.c.bf16 %v264_v39, %v263_v38  ;;  %v2815_v38 = vld [vmem:[%s4171_s5 + $0x8] sm:$0xff]   ;;  %v3229_v39 = vmov 1.0|1.0  }
  0xe9   :  { %313 = vrot.lane.b32.xlu1 %v3395_v34, %s3227_s13  ;;  %v3430_v46 = vpop.f32.mrb[8].mxu0  ;;  %2640 = vmatpush3.bf16.msra.mxu1 %v277_v43 }
  0xea   :  { %v3434_v49 = vpop.f32.mrb[9].mxu0  ;;  %2641 = vmatprep.subr.bf16.mxu1 %v3225_v9  ;;  %v269_v51 = vmul.f32 %v3430_v46, %v253_v44 }
  0xeb   :  { %315 = vrot.lane.b32.xlu0 %v3434_v49, %s3227_s13  ;;  %v3439_v50 = vpop.f32.mrb[10].mxu0  ;;  %v267_v54 = vmul.f32 %v251_v47, %v3434_v49 }
  0xec   :  { %v270_v52 = vmul.f32 %v3439_v50, %v254_v45  ;;  %v3447_v53 = vpop.f32.mrb[11].mxu0 }
  0xed   :  { %v268_v55 = vmul.f32 %v252_v48, %v3447_v53  ;;  %317 = vrot.lane.b32.xlu1 %v3447_v53, %s3227_s13  ;;  %2642 = vmatpush3.bf16.msra.mxu1 %v278_v42 }
  0xee   :  { %2643 = vmatprep.subr.bf16.mxu1 %v3225_v9  ;;  %v280_v58 = vpack.c.bf16 %v270_v52, %v269_v51 }
  0xef   :  { %319 = vrot.lane.b32.xlu0 %v3430_v46, %s3227_s13  ;;  %v279_v60 = vpack.c.bf16 %v268_v55, %v267_v54 }
  0xf1   :  { %321 = vrot.lane.b32.xlu1 %v3439_v50, %s3227_s13  ;;  %v2633_v63 = vpop.f32.mrb[12].mxu0  ;;  %2644 = vmatpush3.bf16.msra.mxu1 %v279_v60 }
  0xf2   :  { %v228_v2 = vpop.f32.mrb[13].mxu0  ;;  %2645 = vmatprep.subr.bf16.mxu1 %v3225_v9  ;;  %v273_v6 = vmul.f32 %v2633_v63, %v257_v61 }
  0xf3   :  { %323 = vrot.lane.b32.xlu0 %v228_v2, %s3227_s13  ;;  %v2634_v4 = vpop.f32.mrb[14].mxu0  ;;  %v271_v19 = vmul.f32 %v255_v0, %v228_v2 }
  0xf4   :  { %v274_v7 = vmul.f32 %v2634_v4, %v258_v62  ;;  %v231_v8 = vpop.f32.mrb[15].mxu0 }
  0xf5   :  { %v272_v20 = vmul.f32 %v256_v1, %v231_v8  ;;  %325 = vrot.lane.b32.xlu1 %v231_v8, %s3227_s13  ;;  %2646 = vmatpush3.bf16.msra.mxu1 %v280_v58 }
  0xf6   :  { %2647 = vmatprep.subr.bf16.mxu1 %v3225_v9  ;;  %v282_v23 = vpack.c.bf16 %v274_v7, %v273_v6 }
  0xf7   :  { %327 = vrot.lane.b32.xlu0 %v2633_v63, %s3227_s13  ;;  %v281_v26 = vpack.c.bf16 %v272_v20, %v271_v19 }
  0xf9   :  { %329 = vrot.lane.b32.xlu1 %v2634_v4, %s3227_s13  ;;  %2648 = vmatpush3.bf16.msra.mxu1 %v281_v26 }
  0xfa   :  { %2649 = vmatprep.subr.bf16.mxu1 %v3225_v9 }
  0xfb   :  { %1936 = vrot.lane.b32.xlu0 %v3350_v17, %s3228_s29 }
  0xfd   :  { %1938 = vrot.lane.b32.xlu1 %v3362_v21, %s3228_s29  ;;  %2650 = vmatpush3.bf16.msra.mxu1 %v282_v23 }
  0xfe   :  { %2675 = vmatprep.subr.bf16.mxu1 %v2814_v35 }
  0xff   :  { %1940 = vrot.lane.b32.xlu0 %v3344_v14, %s3228_s29 }
 0x100   :  { %2652 = vmatmul.mubr.msk.bf16.vlgmr.msra.gmra.mrb[0].mxu1 %vm3504_vm4, %v3229_v39 }
 0x101   :  { %1942 = vrot.lane.b32.xlu1 %v3354_v18, %s3228_s29  ;;  %2676 = vmatpush3.bf16.msra.mxu1 %v2814_v35 }
 0x102   :  { %2677 = vmatprep.subr.bf16.mxu1 %v2815_v38  ;;  %2679 = vmatprep.mubr.msk.bf16.mxu1 %vm38_vm2, %v3340_v11 }
 0x103   :  { %1944 = vrot.lane.b32.xlu0 %v3390_v33, %s3228_s29 }
 0x105   :  { %1946 = vrot.lane.b32.xlu1 %v3403_v37, %s3228_s29  ;;  %2678 = vmatpush3.bf16.msra.mxu1 %v2815_v38 }
 0x107   :  { %1948 = vrot.lane.b32.xlu0 %v3386_v30, %s3228_s29 }
 0x108   :  { %2680 = vmatmul.mubr.msk.bf16.vlgmr.msra.gmra.mrb[4].mxu1 %vm38_vm2, %v3335_v10 }
 0x109   :  { %1950 = vrot.lane.b32.xlu1 %v3395_v34, %s3228_s29  ;;  %2683 = vmatprep.mubr.msk.bf16.mxu1 %vm38_vm2, %v3380_v25 }
 0x10b   :  { %1952 = vrot.lane.b32.xlu0 %v3434_v49, %s3228_s29 }
 0x10d   :  { %1954 = vrot.lane.b32.xlu1 %v3447_v53, %s3228_s29 }
 0x10f   :  { %1956 = vrot.lane.b32.xlu0 %v3430_v46, %s3228_s29 }
 0x110   :  { %2684 = vmatmul.mubr.msk.bf16.gmra.mrb[8].mxu1 %vm38_vm2, %v3367_v22 }
 0x111   :  { %1958 = vrot.lane.b32.xlu1 %v3439_v50, %s3228_s29  ;;  %2687 = vmatprep.mubr.msk.bf16.mxu1 %vm38_vm2, %v3422_v41 }
 0x113   :  { %1960 = vrot.lane.b32.xlu0 %v228_v2, %s3228_s29 }
 0x115   :  { %1962 = vrot.lane.b32.xlu1 %v231_v8, %s3228_s29 }
 0x117   :  { %1964 = vrot.lane.b32.xlu0 %v2633_v63, %s3228_s29 }
 0x118   :  { %2688 = vmatmul.mubr.msk.bf16.gmra.mrb[12].mxu1 %vm38_vm2, %v3416_v40 }
 0x119   :  { %1966 = vrot.lane.b32.xlu1 %v2634_v4, %s3228_s29  ;;  %2691 = vmatprep.mubr.msk.bf16.mxu1 %vm38_vm2, %v3466_v57  ;;  %v2817_v57 = vld [vmem:[%s4172_s6] sm:$0xff]  }
 0x120   :  { %2692 = vmatmul.mubr.msk.bf16.gmra.mrb[16].mxu1 %vm38_vm2, %v3460_v56  ;;  %v2818_v56 = vld [vmem:[%s4172_s6 + $0x8] sm:$0xff]  }
 0x14c   :  { %v304_v14 = vpop.permute.xlu1 %303 }
 0x14d   :  { %v300_v17 = vpop.permute.xlu0 %299  ;;  %v349_v43 = vmul.f32 %v304_v14, %v245_v12 }
 0x14e   :  { %v347_v30 = vmul.f32 %v300_v17, %v243_v15 }
 0x150   :  { %v306_v18 = vpop.permute.xlu1 %305 }
 0x151   :  { %v302_v21 = vpop.permute.xlu0 %301  ;;  %v350_v34 = vmul.f32 %v306_v18, %v246_v13 }
 0x152   :  { %v348_v33 = vmul.f32 %v302_v21, %v244_v16 }
 0x153   :  { %v364_v49 = vpack.c.bf16 %v350_v34, %v349_v43 }
 0x154   :  { %v363_v37 = vpack.c.bf16 %v348_v33, %v347_v30 }
 0x155   :  { %v308_v42 = vpop.permute.xlu0 %307 }
 0x156   :  { %2656 = vmatpush3.bf16.msra.mxu0 %v363_v37  ;;  %v351_v11 = vmul.f32 %v308_v42, %v247_v31 }
 0x157   :  { %v310_v46 = vpop.permute.xlu1 %309  ;;  %2657 = vmatprep.subr.bf16.mxu0 %v3225_v9 }
 0x158   :  { %v352_v50 = vmul.f32 %v310_v46, %v248_v32 }
 0x159   :  { %v312_v15 = vpop.permute.xlu0 %311 }
 0x15a   :  { %2658 = vmatpush3.bf16.msra.mxu0 %v364_v49  ;;  %v365_v13 = vpack.c.bf16 %v352_v50, %v351_v11  ;;  %v353_v51 = vmul.f32 %v312_v15, %v249_v28 }
 0x15b   :  { %v314_v16 = vpop.permute.xlu1 %313  ;;  %2659 = vmatprep.subr.bf16.mxu0 %v3225_v9 }
 0x15c   :  { %v354_v10 = vmul.f32 %v314_v16, %v250_v29 }
 0x15d   :  { %v316_v12 = vpop.permute.xlu0 %315 }
 0x15e   :  { %2660 = vmatpush3.bf16.msra.mxu0 %v365_v13  ;;  %v366_v32 = vpack.c.bf16 %v354_v10, %v353_v51  ;;  %v355_v53 = vmul.f32 %v316_v12, %v251_v47 }
 0x15f   :  { %v318_v52 = vpop.permute.xlu1 %317  ;;  %2661 = vmatprep.subr.bf16.mxu0 %v3225_v9 }
 0x160   :  { %v356_v25 = vmul.f32 %v318_v52, %v252_v48 }
 0x161   :  { %v320_v31 = vpop.permute.xlu0 %319 }
 0x162   :  { %2662 = vmatpush3.bf16.msra.mxu0 %v366_v32  ;;  %v367_v29 = vpack.c.bf16 %v356_v25, %v355_v53  ;;  %v357_v55 = vmul.f32 %v320_v31, %v253_v44 }
 0x163   :  { %v322_v54 = vpop.permute.xlu1 %321  ;;  %2663 = vmatprep.subr.bf16.mxu0 %v3225_v9 }
 0x164   :  { %v358_v22 = vmul.f32 %v322_v54, %v254_v45 }
 0x165   :  { %v324_v28 = vpop.permute.xlu0 %323 }
 0x166   :  { %2664 = vmatpush3.bf16.msra.mxu0 %v367_v29  ;;  %v368_v48 = vpack.c.bf16 %v358_v22, %v357_v55  ;;  %v359_v47 = vmul.f32 %v324_v28, %v255_v0 }
 0x167   :  { %v326_v58 = vpop.permute.xlu1 %325  ;;  %2665 = vmatprep.subr.bf16.mxu0 %v3225_v9 }
 0x168   :  { %v360_v41 = vmul.f32 %v326_v58, %v256_v1 }
 0x169   :  { %v328_v59 = vpop.permute.xlu0 %327 }
 0x16a   :  { %2666 = vmatpush3.bf16.msra.mxu0 %v368_v48  ;;  %v369_v45 = vpack.c.bf16 %v360_v41, %v359_v47  ;;  %v361_v44 = vmul.f32 %v328_v59, %v257_v61  ;;  %v465_v61 = vld [vmem:[#allocation6] sm:$0xff] }
 0x16b   :  { %v330_v60 = vpop.permute.xlu1 %329  ;;  %2667 = vmatprep.subr.bf16.mxu0 %v3225_v9 }
 0x16c   :  { %v362_v40 = vmul.f32 %v330_v60, %v258_v62 }
 0x16e   :  { %2668 = vmatpush3.bf16.msra.mxu0 %v369_v45  ;;  %v370_v63 = vpack.c.bf16 %v362_v40, %v361_v44 }
 0x16f   :  { %2669 = vmatprep.subr.bf16.mxu0 %v3225_v9 }
 0x172   :  { %2670 = vmatpush3.bf16.msra.mxu0 %v370_v63 }
 0x173   :  { %2695 = vmatprep.subr.bf16.mxu0 %v2817_v57 }
 0x175   :  { %2672 = vmatmul.mubr.msk.bf16.vlgmr.msra.gmra.mrb[16].mxu0 %vm3504_vm4, %v3229_v39 }
 0x176   :  { %2696 = vmatpush3.bf16.msra.mxu0 %v2817_v57 }
 0x177   :  { %2697 = vmatprep.subr.bf16.mxu0 %v2818_v56 }
 0x17a   :  { %2698 = vmatpush3.bf16.msra.mxu0 %v2818_v56 }
 0x1d3   :  { %v419_v9 = vpop.f32.mrb[0].mxu1 }
 0x1d4   :  { %v466_v62 = vadd.f32 %v465_v61, %v419_v9  ;;  %v2653_v0 = vpop.f32.mrb[1].mxu1 }
 0x1d5   :  { %v422_v1 = vpop.f32.mrb[2].mxu1 }
 0x1d6   :  { %468 = vst.msk [vmem:[#allocation6] sm:$0xff] %vm38_vm2, %v466_v62  ;;  %v2654_v2 = vpop.f32.mrb[3].mxu1 }
 0x1db   :  { %v3603_v3 = vpop.f32.mrb[4].mxu1 }
 0x1dc   :  { %v2311_v4 = vmul.f32 -1.442695, %v3603_v3  ;;  %v3606_v5 = vpop.f32.mrb[5].mxu1 }
 0x1dd   :  { %v2309_v6 = vmul.f32 -1.442695, %v3606_v5  ;;  %v3609_v7 = vpop.f32.mrb[6].mxu1 }
 0x1de   :  { %2835 = vpow2.f32 %v2311_v4  ;;  %v2312_v8 = vmul.f32 -1.442695, %v3609_v7  ;;  %v3612_v19 = vpop.f32.mrb[7].mxu1 }
 0x1df   :  { %2837 = vpow2.f32 %v2309_v6  ;;  %v2310_v20 = vmul.f32 -1.442695, %v3612_v19 }
 0x1e0   :  { %2839 = vpow2.f32 %v2312_v8 }
 0x1e1   :  { %2841 = vpow2.f32 %v2310_v20 }
 0x1e3   :  { %v3615_v23 = vpop.f32.mrb[8].mxu1 }
 0x1e4   :  { %v2315_v24 = vmul.f32 -1.442695, %v3615_v23  ;;  %v3618_v26 = vpop.f32.mrb[9].mxu1 }
 0x1e5   :  { %v2313_v27 = vmul.f32 -1.442695, %v3618_v26  ;;  %v3621_v35 = vpop.f32.mrb[10].mxu1 }
 0x1e6   :  { %2843 = vpow2.f32 %v2315_v24  ;;  %v2316_v36 = vmul.f32 -1.442695, %v3621_v35  ;;  %v3624_v38 = vpop.f32.mrb[11].mxu1 }
 0x1e7   :  { %2845 = vpow2.f32 %v2313_v27  ;;  %v2314_v39 = vmul.f32 -1.442695, %v3624_v38 }
 0x1e8   :  { %v2836_v14 = vpop.eup %2835  ;;  %2847 = vpow2.f32 %v2316_v36 }
 0x1e9   :  { %v2838_v17 = vpop.eup %2837  ;;  %v699_v18 = vadd.f32 1.0, %v2836_v14  ;;  %2849 = vpow2.f32 %v2314_v39 }
 0x1ea   :  { %v2840_v21 = vpop.eup %2839  ;;  %v697_v30 = vadd.f32 1.0, %v2838_v17 }
 0x1eb   :  { %v2842_v33 = vpop.eup %2841  ;;  %2851 = vrcp.f32 %v699_v18  ;;  %v700_v34 = vadd.f32 1.0, %v2840_v21  ;;  %v3627_v37 = vpop.f32.mrb[12].mxu1 }
 0x1ec   :  { %2853 = vrcp.f32 %v697_v30  ;;  %v698_v42 = vadd.f32 1.0, %v2842_v33  ;;  %v2319_v43 = vmul.f32 -1.442695, %v3627_v37  ;;  %v3630_v46 = vpop.f32.mrb[13].mxu1 }
 0x1ed   :  { %2855 = vrcp.f32 %v700_v34  ;;  %v2317_v49 = vmul.f32 -1.442695, %v3630_v46  ;;  %v3633_v50 = vpop.f32.mrb[14].mxu1 }
 0x1ee   :  { %2857 = vrcp.f32 %v698_v42  ;;  %v2320_v15 = vmul.f32 -1.442695, %v3633_v50  ;;  %v3636_v11 = vpop.f32.mrb[15].mxu1 }
 0x1ef   :  { %2859 = vpow2.f32 %v2319_v43  ;;  %v2318_v16 = vmul.f32 -1.442695, %v3636_v11 }
 0x1f0   :  { %v2844_v13 = vpop.eup %2843  ;;  %2861 = vpow2.f32 %v2317_v49 }
 0x1f1   :  { %v2846_v10 = vpop.eup %2845  ;;  %v703_v12 = vadd.f32 1.0, %v2844_v13  ;;  %2863 = vpow2.f32 %v2320_v15 }
 0x1f2   :  { %v2848_v51 = vpop.eup %2847  ;;  %v701_v52 = vadd.f32 1.0, %v2846_v10  ;;  %2865 = vpow2.f32 %v2318_v16 }
 0x1f3   :  { %v2850_v32 = vpop.eup %2849  ;;  %2867 = vrcp.f32 %v703_v12  ;;  %v704_v25 = vadd.f32 1.0, %v2848_v51  ;;  %v3639_v31 = vpop.f32.mrb[16].mxu1 }
 0x1f4   :  { %2869 = vrcp.f32 %v701_v52  ;;  %v702_v53 = vadd.f32 1.0, %v2850_v32  ;;  %v2323_v54 = vmul.f32 -1.442695, %v3639_v31  ;;  %v3642_v29 = vpop.f32.mrb[17].mxu1 }
 0x1f5   :  { %v2852_v22 = vpop.eup %2851  ;;  %2871 = vrcp.f32 %v704_v25  ;;  %v2321_v28 = vmul.f32 -1.442695, %v3642_v29  ;;  %v3645_v55 = vpop.f32.mrb[18].mxu1 }
 0x1f6   :  { %v2854_v58 = vpop.eup %2853  ;;  %2873 = vrcp.f32 %v702_v53  ;;  %v2324_v48 = vmul.f32 -1.442695, %v3645_v55  ;;  %v3648_v41 = vpop.f32.mrb[19].mxu1  ;;  %v747_v40 = vmul.f32 %v2852_v22, %v3603_v3 }
 0x1f7   :  { %v2856_v47 = vpop.eup %2855  ;;  %v745_v59 = vmul.f32 %v2854_v58, %v3606_v5  ;;  %2875 = vpow2.f32 %v2323_v54  ;;  %v2322_v60 = vmul.f32 -1.442695, %v3648_v41 }
 0x1f8   :  { %v2858_v45 = vpop.eup %2857  ;;  %v748_v44 = vmul.f32 %v2856_v47, %v3609_v7  ;;  %2877 = vpow2.f32 %v2321_v28  ;;  %v3661_v3 = vmul.f32 1.6666666, %v747_v40 }
 0x1f9   :  { %v2860_v63 = vpop.eup %2859  ;;  %v746_v57 = vmul.f32 %v2858_v45, %v3612_v19  ;;  %2879 = vpow2.f32 %v2324_v48  ;;  %v3657_v0 = vmul.f32 1.6666666, %v745_v59 }
 0x1fa   :  { %v2862_v56 = vpop.eup %2861  ;;  %v3655_v61 = vmul.f32 1.6666666, %v748_v44  ;;  %v707_v9 = vadd.f32 1.0, %v2860_v63  ;;  %2881 = vpow2.f32 %v2322_v60 }
 0x1fb   :  { %v2864_v62 = vpop.eup %2863  ;;  %v3659_v1 = vmul.f32 1.6666666, %v746_v57  ;;  %v705_v2 = vadd.f32 1.0, %v2862_v56 }
 0x1fc   :  { %v2866_v4 = vpop.eup %2865  ;;  %2883 = vrcp.f32 %v707_v9  ;;  %v708_v5 = vadd.f32 1.0, %v2864_v62  ;;  %v782_v20 = vpack.c.bf16 %v3655_v61, %v3661_v3 }
 0x1fd   :  { %v2868_v6 = vpop.eup %2867  ;;  %v781_v7 = vpack.c.bf16 %v3659_v1, %v3657_v0  ;;  %2885 = vrcp.f32 %v705_v2  ;;  %v706_v8 = vadd.f32 1.0, %v2866_v4 }
 0x1fe   :  { %v2870_v19 = vpop.eup %2869  ;;  %2887 = vrcp.f32 %v708_v5  ;;  %v751_v39 = vmul.f32 %v2868_v6, %v3615_v23  ;;  %v2819_v5 = vld [vmem:[%s4172_s6 + $0x10] sm:$0xff]   ;;  %v2820_v6 = vld [vmem:[%s4172_s6 + $0x18] sm:$0xff]  }
 0x1ff   :  { %v2872_v24 = vpop.eup %2871  ;;  %v749_v27 = vmul.f32 %v2870_v19, %v3618_v26  ;;  %2889 = vrcp.f32 %v706_v8  ;;  %2699 = vmatprep.mubr.msk.bf16.mxu0 %vm38_vm2, %v781_v7  ;;  %2715 = vmatprep.subr.bf16.mxu1 %v2819_v5 }
 0x200   :  { %v2874_v36 = vpop.eup %2873  ;;  %v752_v14 = vmul.f32 %v2872_v24, %v3621_v35  ;;  %2700 = vmatmul.mubr.msk.bf16.vlgmr.msra.gmra.mrb[20].mxu0 %vm38_vm2, %v782_v20  ;;  %v3679_v15 = vmul.f32 1.6666666, %v751_v39  ;;  %2716 = vmatpush3.bf16.msra.mxu1 %v2819_v5 }
 0x201   :  { %v2876_v17 = vpop.eup %2875  ;;  %v750_v18 = vmul.f32 %v2874_v36, %v3624_v38  ;;  %v3675_v42 = vmul.f32 1.6666666, %v749_v27  ;;  %2717 = vmatprep.subr.bf16.mxu1 %v2820_v6 }
 0x202   :  { %v2878_v21 = vpop.eup %2877  ;;  %v3673_v30 = vmul.f32 1.6666666, %v752_v14  ;;  %v711_v33 = vadd.f32 1.0, %v2876_v17 }
 0x203   :  { %v2880_v34 = vpop.eup %2879  ;;  %v3677_v26 = vmul.f32 1.6666666, %v750_v18  ;;  %v709_v43 = vadd.f32 1.0, %v2878_v21 }
 0x204   :  { %v2882_v49 = vpop.eup %2881  ;;  %2891 = vrcp.f32 %v711_v33  ;;  %v712_v23 = vadd.f32 1.0, %v2880_v34  ;;  %v784_v13 = vpack.c.bf16 %v3673_v30, %v3679_v15  ;;  %2718 = vmatpush3.bf16.msra.mxu1 %v2820_v6 }
 0x205   :  { %v783_v35 = vpack.c.bf16 %v3677_v26, %v3675_v42  ;;  %2893 = vrcp.f32 %v709_v43  ;;  %v710_v38 = vadd.f32 1.0, %v2882_v49 }
 0x206   :  { %v2884_v16 = vpop.eup %2883  ;;  %2895 = vrcp.f32 %v712_v23 }
 0x207   :  { %v2886_v10 = vpop.eup %2885  ;;  %2897 = vrcp.f32 %v710_v38  ;;  %2703 = vmatprep.mubr.msk.bf16.mxu0 %vm38_vm2, %v783_v35  ;;  %v755_v32 = vmul.f32 %v2884_v16, %v3627_v37 }
 0x208   :  { %v2888_v12 = vpop.eup %2887  ;;  %v753_v51 = vmul.f32 %v2886_v10, %v3630_v46  ;;  %2704 = vmatmul.mubr.msk.bf16.gmra.mrb[24].mxu0 %vm38_vm2, %v784_v13 }
 0x209   :  { %v2890_v52 = vpop.eup %2889  ;;  %v756_v25 = vmul.f32 %v2888_v12, %v3633_v50  ;;  %v3697_v58 = vmul.f32 1.6666666, %v755_v32 }
 0x20a   :  { %v754_v53 = vmul.f32 %v2890_v52, %v3636_v11  ;;  %v3693_v22 = vmul.f32 1.6666666, %v753_v51 }
 0x20b   :  { %v3691_v54 = vmul.f32 1.6666666, %v756_v25 }
 0x20c   :  { %v3695_v28 = vmul.f32 1.6666666, %v754_v53 }
 0x20d   :  { %v786_v37 = vpack.c.bf16 %v3691_v54, %v3697_v58 }
 0x20e   :  { %v2892_v48 = vpop.eup %2891  ;;  %v785_v46 = vpack.c.bf16 %v3695_v28, %v3693_v22 }
 0x20f   :  { %v2894_v47 = vpop.eup %2893  ;;  %v759_v60 = vmul.f32 %v2892_v48, %v3639_v31 }
 0x210   :  { %v2896_v59 = vpop.eup %2895  ;;  %v757_v50 = vmul.f32 %v2894_v47, %v3642_v29  ;;  %2707 = vmatprep.mubr.msk.bf16.mxu0 %vm38_vm2, %v785_v46 }
 0x211   :  { %v2898_v11 = vpop.eup %2897  ;;  %v760_v45 = vmul.f32 %v2896_v59, %v3645_v55  ;;  %2708 = vmatmul.mubr.msk.bf16.gmra.mrb[28].mxu0 %vm38_vm2, %v786_v37  ;;  %v3715_v56 = vmul.f32 1.6666666, %v759_v60  ;;  %v469_v55 = vld [vmem:[#allocation8] sm:$0xff] }
 0x212   :  { %v758_v40 = vmul.f32 %v2898_v11, %v3648_v41  ;;  %v3711_v63 = vmul.f32 1.6666666, %v757_v50 }
 0x213   :  { %v3709_v44 = vmul.f32 1.6666666, %v760_v45 }
 0x214   :  { %v3713_v57 = vmul.f32 1.6666666, %v758_v40 }
 0x215   :  { %v788_v31 = vpack.c.bf16 %v3709_v44, %v3715_v56 }
 0x216   :  { %v787_v29 = vpack.c.bf16 %v3713_v57, %v3711_v63 }
 0x218   :  { %2711 = vmatprep.mubr.msk.bf16.mxu0 %vm38_vm2, %v787_v29 }
 0x219   :  { %2712 = vmatmul.mubr.msk.bf16.gmra.mrb[32].mxu0 %vm38_vm2, %v788_v31 }
 0x248   :  { %v459_v41 = vpop.f32.mrb[16].mxu0 }
 0x249   :  { %v470_v9 = vadd.f32 %v469_v55, %v459_v41  ;;  %v2673_v62 = vpop.f32.mrb[17].mxu0 }
 0x24a   :  { %v462_v2 = vpop.f32.mrb[18].mxu0 }
 0x24b   :  { %471 = vst.msk [vmem:[#allocation8] sm:$0xff] %vm38_vm2, %v470_v9  ;;  %v2674_v4 = vpop.f32.mrb[19].mxu0 }
 0x2d3   :  { %v3730_v7 = vpop.f32.mrb[20].mxu0 }
 0x2d4   :  { %v2337_v8 = vmul.f32 -1.442695, %v3730_v7  ;;  %v3733_v19 = vpop.f32.mrb[21].mxu0 }
 0x2d5   :  { %v2335_v20 = vmul.f32 -1.442695, %v3733_v19  ;;  %v3736_v24 = vpop.f32.mrb[22].mxu0 }
 0x2d6   :  { %2899 = vpow2.f32 %v2337_v8  ;;  %v2338_v27 = vmul.f32 -1.442695, %v3736_v24  ;;  %v3739_v36 = vpop.f32.mrb[23].mxu0 }
 0x2d7   :  { %2901 = vpow2.f32 %v2335_v20  ;;  %v2336_v39 = vmul.f32 -1.442695, %v3739_v36 }
 0x2d8   :  { %2903 = vpow2.f32 %v2338_v27 }
 0x2d9   :  { %2905 = vpow2.f32 %v2336_v39 }
 0x2db   :  { %v3742_v14 = vpop.f32.mrb[24].mxu0 }
 0x2dc   :  { %v2341_v17 = vmul.f32 -1.442695, %v3742_v14  ;;  %v3745_v18 = vpop.f32.mrb[25].mxu0 }
 0x2dd   :  { %v2339_v21 = vmul.f32 -1.442695, %v3745_v18  ;;  %v3748_v33 = vpop.f32.mrb[26].mxu0 }
 0x2de   :  { %2907 = vpow2.f32 %v2341_v17  ;;  %v2342_v34 = vmul.f32 -1.442695, %v3748_v33  ;;  %v3751_v43 = vpop.f32.mrb[27].mxu0 }
 0x2df   :  { %2909 = vpow2.f32 %v2339_v21  ;;  %v2340_v49 = vmul.f32 -1.442695, %v3751_v43 }
 0x2e0   :  { %v2900_v23 = vpop.eup %2899  ;;  %2911 = vpow2.f32 %v2342_v34 }
 0x2e1   :  { %v2902_v35 = vpop.eup %2901  ;;  %v972_v38 = vadd.f32 1.0, %v2900_v23  ;;  %2913 = vpow2.f32 %v2340_v49 }
 0x2e2   :  { %v2904_v16 = vpop.eup %2903  ;;  %v970_v13 = vadd.f32 1.0, %v2902_v35 }
 0x2e3   :  { %v2906_v10 = vpop.eup %2905  ;;  %2915 = vrcp.f32 %v972_v38  ;;  %v973_v12 = vadd.f32 1.0, %v2904_v16 }
 0x2e4   :  { %2917 = vrcp.f32 %v970_v13  ;;  %v971_v51 = vadd.f32 1.0, %v2906_v10  ;;  %v3754_v52 = vpop.f32.mrb[28].mxu0 }
 0x2e5   :  { %2919 = vrcp.f32 %v973_v12  ;;  %v2345_v32 = vmul.f32 -1.442695, %v3754_v52  ;;  %v3757_v25 = vpop.f32.mrb[29].mxu0 }
 0x2e6   :  { %2921 = vrcp.f32 %v971_v51  ;;  %v2343_v53 = vmul.f32 -1.442695, %v3757_v25  ;;  %v3760_v48 = vpop.f32.mrb[30].mxu0 }
 0x2e7   :  { %2923 = vpow2.f32 %v2345_v32  ;;  %v2346_v46 = vmul.f32 -1.442695, %v3760_v48  ;;  %v3763_v47 = vpop.f32.mrb[31].mxu0 }
 0x2e8   :  { %v2908_v37 = vpop.eup %2907  ;;  %2925 = vpow2.f32 %v2343_v53  ;;  %v2344_v59 = vmul.f32 -1.442695, %v3763_v47 }
 0x2e9   :  { %v2910_v50 = vpop.eup %2909  ;;  %v976_v11 = vadd.f32 1.0, %v2908_v37  ;;  %2927 = vpow2.f32 %v2346_v46 }
 0x2ea   :  { %v2912_v60 = vpop.eup %2911  ;;  %v974_v45 = vadd.f32 1.0, %v2910_v50  ;;  %2929 = vpow2.f32 %v2344_v59 }
 0x2eb   :  { %v2914_v40 = vpop.eup %2913  ;;  %2931 = vrcp.f32 %v976_v11  ;;  %v977_v29 = vadd.f32 1.0, %v2912_v60 }
 0x2ec   :  { %2933 = vrcp.f32 %v974_v45  ;;  %v975_v31 = vadd.f32 1.0, %v2914_v40  ;;  %v3766_v55 = vpop.f32.mrb[32].mxu0 }
 0x2ed   :  { %v2916_v41 = vpop.eup %2915  ;;  %2935 = vrcp.f32 %v977_v29  ;;  %v2349_v9 = vmul.f32 -1.442695, %v3766_v55  ;;  %v3769_v62 = vpop.f32.mrb[33].mxu0 }
 0x2ee   :  { %v2918_v2 = vpop.eup %2917  ;;  %v1020_v4 = vmul.f32 %v2916_v41, %v3730_v7  ;;  %2937 = vrcp.f32 %v975_v31  ;;  %v2347_v5 = vmul.f32 -1.442695, %v3769_v62  ;;  %v3773_v6 = vpop.f32.mrb[34].mxu0 }
 0x2ef   :  { %v2920_v8 = vpop.eup %2919  ;;  %v1018_v20 = vmul.f32 %v2918_v2, %v3733_v19  ;;  %2939 = vpow2.f32 %v2349_v9  ;;  %v2350_v27 = vmul.f32 -1.442695, %v3773_v6  ;;  %v3777_v39 = vpop.f32.mrb[35].mxu0 }
 0x2f0   :  { %v2922_v17 = vpop.eup %2921  ;;  %v1021_v21 = vmul.f32 %v2920_v8, %v3736_v24  ;;  %2941 = vpow2.f32 %v2347_v5  ;;  %v2348_v34 = vmul.f32 -1.442695, %v3777_v39  ;;  %v1036_v35 = vmul.f32 1.6666666, %v1020_v4 }
 0x2f1   :  { %v2924_v7 = vpop.eup %2923  ;;  %v1019_v49 = vmul.f32 %v2922_v17, %v3739_v36  ;;  %2943 = vpow2.f32 %v2350_v27  ;;  %v1034_v13 = vmul.f32 1.6666666, %v1018_v20 }
 0x2f2   :  { %v2926_v23 = vpop.eup %2925  ;;  %v1037_v38 = vmul.f32 1.6666666, %v1021_v21  ;;  %v980_v16 = vadd.f32 1.0, %v2924_v7  ;;  %2945 = vpow2.f32 %v2348_v34 }
 0x2f3   :  { %v2928_v19 = vpop.eup %2927  ;;  %v1035_v10 = vmul.f32 1.6666666, %v1019_v49  ;;  %v978_v12 = vadd.f32 1.0, %v2926_v23 }
 0x2f4   :  { %v2930_v51 = vpop.eup %2929  ;;  %v1056_v32 = vpack.c.bf16 %v1037_v38, %v1036_v35  ;;  %2947 = vrcp.f32 %v980_v16  ;;  %v981_v24 = vadd.f32 1.0, %v2928_v19 }
 0x2f5   :  { %v2932_v53 = vpop.eup %2931  ;;  %v1055_v46 = vpack.c.bf16 %v1035_v10, %v1034_v13  ;;  %2949 = vrcp.f32 %v978_v12  ;;  %v979_v37 = vadd.f32 1.0, %v2930_v51 }
 0x2f6   :  { %v2934_v59 = vpop.eup %2933  ;;  %v1024_v36 = vmul.f32 %v2932_v53, %v3742_v14  ;;  %2951 = vrcp.f32 %v981_v24 }
 0x2f7   :  { %v2936_v50 = vpop.eup %2935  ;;  %v1022_v11 = vmul.f32 %v2934_v59, %v3745_v18  ;;  %2953 = vrcp.f32 %v979_v37  ;;  %2719 = vmatprep.mubr.msk.bf16.mxu1 %vm38_vm2, %v1055_v46 }
 0x2f8   :  { %v2938_v60 = vpop.eup %2937  ;;  %v1025_v45 = vmul.f32 %v2936_v50, %v3748_v33  ;;  %2720 = vmatmul.mubr.msk.bf16.vlgmr.msra.gmra.mrb[20].mxu1 %vm38_vm2, %v1056_v32  ;;  %v1040_v41 = vmul.f32 1.6666666, %v1024_v36 }
 0x2f9   :  { %v2940_v40 = vpop.eup %2939  ;;  %v1023_v29 = vmul.f32 %v2938_v60, %v3751_v43  ;;  %v1038_v4 = vmul.f32 1.6666666, %v1022_v11 }
 0x2fa   :  { %v2942_v31 = vpop.eup %2941  ;;  %v1041_v9 = vmul.f32 1.6666666, %v1025_v45  ;;  %v984_v2 = vadd.f32 1.0, %v2940_v40 }
 0x2fb   :  { %v2944_v14 = vpop.eup %2943  ;;  %v1039_v5 = vmul.f32 1.6666666, %v1023_v29  ;;  %v982_v8 = vadd.f32 1.0, %v2942_v31 }
 0x2fc   :  { %v2946_v18 = vpop.eup %2945  ;;  %v1058_v20 = vpack.c.bf16 %v1041_v9, %v1040_v41  ;;  %2955 = vrcp.f32 %v984_v2  ;;  %v985_v27 = vadd.f32 1.0, %v2944_v14 }
 0x2fd   :  { %v1057_v17 = vpack.c.bf16 %v1039_v5, %v1038_v4  ;;  %2957 = vrcp.f32 %v982_v8  ;;  %v983_v33 = vadd.f32 1.0, %v2946_v18 }
 0x2fe   :  { %v2948_v21 = vpop.eup %2947  ;;  %2959 = vrcp.f32 %v985_v27 }
 0x2ff   :  { %v2950_v34 = vpop.eup %2949  ;;  %v1028_v43 = vmul.f32 %v2948_v21, %v3754_v52  ;;  %2961 = vrcp.f32 %v983_v33  ;;  %2723 = vmatprep.mubr.msk.bf16.mxu1 %vm38_vm2, %v1057_v17 }
 0x300   :  { %v2952_v7 = vpop.eup %2951  ;;  %v1026_v49 = vmul.f32 %v2950_v34, %v3757_v25  ;;  %2724 = vmatmul.mubr.msk.bf16.gmra.mrb[24].mxu1 %vm38_vm2, %v1058_v20 }
 0x301   :  { %v2954_v23 = vpop.eup %2953  ;;  %v1029_v35 = vmul.f32 %v2952_v7, %v3760_v48  ;;  %v1044_v16 = vmul.f32 1.6666666, %v1028_v43 }
 0x302   :  { %v1027_v38 = vmul.f32 %v2954_v23, %v3763_v47  ;;  %v1042_v13 = vmul.f32 1.6666666, %v1026_v49 }
 0x303   :  { %v1045_v19 = vmul.f32 1.6666666, %v1029_v35 }
 0x304   :  { %v1043_v10 = vmul.f32 1.6666666, %v1027_v38 }
 0x305   :  { %v1060_v12 = vpack.c.bf16 %v1045_v19, %v1044_v16 }
 0x306   :  { %v2956_v51 = vpop.eup %2955  ;;  %v1059_v52 = vpack.c.bf16 %v1043_v10, %v1042_v13 }
 0x307   :  { %v2958_v32 = vpop.eup %2957  ;;  %v1032_v24 = vmul.f32 %v2956_v51, %v3766_v55  ;;  %v2821_v55 = vld [vmem:[%s4172_s6 + $0x20] sm:$0xff]  }
 0x308   :  { %v2960_v53 = vpop.eup %2959  ;;  %v1030_v25 = vmul.f32 %v2958_v32, %v3769_v62  ;;  %2727 = vmatprep.mubr.msk.bf16.mxu1 %vm38_vm2, %v1059_v52  ;;  %2735 = vmatprep.subr.bf16.mxu0 %v2821_v55  ;;  %v2822_v62 = vld [vmem:[%s4172_s6 + $0x28] sm:$0xff]  }
 0x309   :  { %v2962_v46 = vpop.eup %2961  ;;  %v1033_v48 = vmul.f32 %v2960_v53, %v3773_v6  ;;  %2728 = vmatmul.mubr.msk.bf16.gmra.mrb[28].mxu1 %vm38_vm2, %v1060_v12  ;;  %v1048_v37 = vmul.f32 1.6666666, %v1032_v24  ;;  %2736 = vmatpush3.bf16.msra.mxu0 %v2821_v55 }
 0x30a   :  { %v1031_v47 = vmul.f32 %v2962_v46, %v3777_v39  ;;  %v1046_v36 = vmul.f32 1.6666666, %v1030_v25  ;;  %2737 = vmatprep.subr.bf16.mxu0 %v2822_v62 }
 0x30b   :  { %v1049_v59 = vmul.f32 1.6666666, %v1033_v48 }
 0x30c   :  { %v1047_v50 = vmul.f32 1.6666666, %v1031_v47 }
 0x30d   :  { %v1062_v11 = vpack.c.bf16 %v1049_v59, %v1048_v37  ;;  %2738 = vmatpush3.bf16.msra.mxu0 %v2822_v62 }
 0x30e   :  { %v1061_v60 = vpack.c.bf16 %v1047_v50, %v1046_v36 }
 0x310   :  { %2731 = vmatprep.mubr.msk.bf16.mxu1 %vm38_vm2, %v1061_v60 }
 0x311   :  { %2732 = vmatmul.mubr.msk.bf16.gmra.mrb[32].mxu1 %vm38_vm2, %v1062_v11 }
 0x3cb   :  { %v3808_v6 = vpop.f32.mrb[20].mxu1 }
 0x3cc   :  { %v2367_v39 = vmul.f32 -1.442695, %v3808_v6  ;;  %v3811_v45 = vpop.f32.mrb[21].mxu1 }
 0x3cd   :  { %v2365_v40 = vmul.f32 -1.442695, %v3811_v45  ;;  %v3814_v29 = vpop.f32.mrb[22].mxu1 }
 0x3ce   :  { %2963 = vpow2.f32 %v2367_v39  ;;  %v2368_v31 = vmul.f32 -1.442695, %v3814_v29  ;;  %v3817_v41 = vpop.f32.mrb[23].mxu1 }
 0x3cf   :  { %2965 = vpow2.f32 %v2365_v40  ;;  %v2366_v9 = vmul.f32 -1.442695, %v3817_v41 }
 0x3d0   :  { %2967 = vpow2.f32 %v2368_v31 }
 0x3d1   :  { %2969 = vpow2.f32 %v2366_v9 }
 0x3d3   :  { %v3820_v2 = vpop.f32.mrb[24].mxu1 }
 0x3d4   :  { %v2371_v14 = vmul.f32 -1.442695, %v3820_v2  ;;  %v3823_v4 = vpop.f32.mrb[25].mxu1 }
 0x3d5   :  { %v2369_v5 = vmul.f32 -1.442695, %v3823_v4  ;;  %v3826_v8 = vpop.f32.mrb[26].mxu1 }
 0x3d6   :  { %2971 = vpow2.f32 %v2371_v14  ;;  %v2372_v18 = vmul.f32 -1.442695, %v3826_v8  ;;  %v3829_v20 = vpop.f32.mrb[27].mxu1 }
 0x3d7   :  { %2973 = vpow2.f32 %v2369_v5  ;;  %v2370_v27 = vmul.f32 -1.442695, %v3829_v20 }
 0x3d8   :  { %v2964_v17 = vpop.eup %2963  ;;  %2975 = vpow2.f32 %v2372_v18 }
 0x3d9   :  { %v2966_v33 = vpop.eup %2965  ;;  %v1246_v21 = vadd.f32 1.0, %v2964_v17  ;;  %2977 = vpow2.f32 %v2370_v27 }
 0x3da   :  { %v2968_v34 = vpop.eup %2967  ;;  %v1244_v43 = vadd.f32 1.0, %v2966_v33 }
 0x3db   :  { %v2970_v7 = vpop.eup %2969  ;;  %2979 = vrcp.f32 %v1246_v21  ;;  %v1247_v49 = vadd.f32 1.0, %v2968_v34 }
 0x3dc   :  { %2981 = vrcp.f32 %v1244_v43  ;;  %v1245_v23 = vadd.f32 1.0, %v2970_v7  ;;  %v3832_v35 = vpop.f32.mrb[28].mxu1 }
 0x3dd   :  { %2983 = vrcp.f32 %v1247_v49  ;;  %v2375_v38 = vmul.f32 -1.442695, %v3832_v35  ;;  %v3835_v16 = vpop.f32.mrb[29].mxu1 }
 0x3de   :  { %2985 = vrcp.f32 %v1245_v23  ;;  %v2373_v19 = vmul.f32 -1.442695, %v3835_v16  ;;  %v3838_v13 = vpop.f32.mrb[30].mxu1 }
 0x3df   :  { %2987 = vpow2.f32 %v2375_v38  ;;  %v2376_v10 = vmul.f32 -1.442695, %v3838_v13  ;;  %v3841_v12 = vpop.f32.mrb[31].mxu1 }
 0x3e0   :  { %v2972_v51 = vpop.eup %2971  ;;  %2989 = vpow2.f32 %v2373_v19  ;;  %v2374_v52 = vmul.f32 -1.442695, %v3841_v12 }
 0x3e1   :  { %v2974_v32 = vpop.eup %2973  ;;  %v1250_v24 = vadd.f32 1.0, %v2972_v51  ;;  %2991 = vpow2.f32 %v2376_v10 }
 0x3e2   :  { %v2976_v53 = vpop.eup %2975  ;;  %v1248_v25 = vadd.f32 1.0, %v2974_v32  ;;  %2993 = vpow2.f32 %v2374_v52 }
 0x3e3   :  { %v2978_v46 = vpop.eup %2977  ;;  %2995 = vrcp.f32 %v1250_v24  ;;  %v1251_v48 = vadd.f32 1.0, %v2976_v53 }
 0x3e4   :  { %2997 = vrcp.f32 %v1248_v25  ;;  %v1249_v47 = vadd.f32 1.0, %v2978_v46  ;;  %v3844_v37 = vpop.f32.mrb[32].mxu1 }
 0x3e5   :  { %v2980_v59 = vpop.eup %2979  ;;  %2999 = vrcp.f32 %v1251_v48  ;;  %v2379_v36 = vmul.f32 -1.442695, %v3844_v37  ;;  %v3847_v50 = vpop.f32.mrb[33].mxu1 }
 0x3e6   :  { %v2982_v11 = vpop.eup %2981  ;;  %v1294_v60 = vmul.f32 %v2980_v59, %v3808_v6  ;;  %3001 = vrcp.f32 %v1249_v47  ;;  %v2377_v55 = vmul.f32 -1.442695, %v3847_v50  ;;  %v3851_v62 = vpop.f32.mrb[34].mxu1 }
 0x3e7   :  { %v2984_v39 = vpop.eup %2983  ;;  %v1292_v40 = vmul.f32 %v2982_v11, %v3811_v45  ;;  %3003 = vpow2.f32 %v2379_v36  ;;  %v2380_v31 = vmul.f32 -1.442695, %v3851_v62  ;;  %v3855_v9 = vpop.f32.mrb[35].mxu1 }
 0x3e8   :  { %v2986_v14 = vpop.eup %2985  ;;  %v1310_v5 = vmul.f32 1.6666666, %v1294_v60  ;;  %v1295_v18 = vmul.f32 %v2984_v39, %v3814_v29  ;;  %3005 = vpow2.f32 %v2377_v55  ;;  %v2378_v6 = vmul.f32 -1.442695, %v3855_v9 }
 0x3e9   :  { %v2988_v27 = vpop.eup %2987  ;;  %v1308_v17 = vmul.f32 1.6666666, %v1292_v40  ;;  %v1293_v33 = vmul.f32 %v2986_v14, %v3817_v41  ;;  %3007 = vpow2.f32 %v2380_v31 }
 0x3ea   :  { %v2990_v21 = vpop.eup %2989  ;;  %v1311_v34 = vmul.f32 1.6666666, %v1295_v18  ;;  %v1254_v45 = vadd.f32 1.0, %v2988_v27  ;;  %3009 = vpow2.f32 %v2378_v6  ;;  %v1326_v29 = vadd.f32 %v1310_v5, %v3661_v3 }
 0x3eb   :  { %v2992_v43 = vpop.eup %2991  ;;  %v1324_v7 = vadd.f32 %v1308_v17, %v3657_v0  ;;  %v1309_v49 = vmul.f32 1.6666666, %v1293_v33  ;;  %v1252_v23 = vadd.f32 1.0, %v2990_v21 }
 0x3ec   :  { %v2994_v38 = vpop.eup %2993  ;;  %v1327_v19 = vadd.f32 %v1311_v34, %v3655_v61  ;;  %3011 = vrcp.f32 %v1254_v45  ;;  %v1255_v10 = vadd.f32 1.0, %v2992_v43  ;;  %v3872_v48 = vmul.f32 0.70710677, %v1326_v29 }
 0x3ed   :  { %v2996_v51 = vpop.eup %2995  ;;  %v1325_v41 = vadd.f32 %v1309_v49, %v3659_v1  ;;  %3013 = vrcp.f32 %v1252_v23  ;;  %v1253_v52 = vadd.f32 1.0, %v2994_v38  ;;  %v3867_v25 = vmul.f32 0.70710677, %v1324_v7 }
 0x3ee   :  { %v2998_v32 = vpop.eup %2997  ;;  %v3864_v24 = vmul.f32 0.70710677, %v1327_v19  ;;  %v1298_v53 = vmul.f32 %v2996_v51, %v3820_v2  ;;  %3015 = vrcp.f32 %v1255_v10 }
 0x3ef   :  { %v3000_v0 = vpop.eup %2999  ;;  %v3869_v46 = vmul.f32 0.70710677, %v1325_v41  ;;  %v1296_v61 = vmul.f32 %v2998_v32, %v3823_v4  ;;  %3017 = vrcp.f32 %v1253_v52 }
 0x3f0   :  { %v3002_v3 = vpop.eup %3001  ;;  %v1314_v1 = vmul.f32 1.6666666, %v1298_v53  ;;  %v1299_v47 = vmul.f32 %v3000_v0, %v3826_v8  ;;  %v1362_v55 = vpack.c.bf16 %v3864_v24, %v3872_v48 }
 0x3f1   :  { %v3004_v59 = vpop.eup %3003  ;;  %v1361_v36 = vpack.c.bf16 %v3869_v46, %v3867_v25  ;;  %v1312_v2 = vmul.f32 1.6666666, %v1296_v61  ;;  %v1297_v11 = vmul.f32 %v3002_v3, %v3829_v20 }
 0x3f2   :  { %v3006_v60 = vpop.eup %3005  ;;  %v1315_v39 = vmul.f32 1.6666666, %v1299_v47  ;;  %v1258_v4 = vadd.f32 1.0, %v3004_v59  ;;  %v1330_v18 = vadd.f32 %v1314_v1, %v3679_v15 }
 0x3f3   :  { %v3008_v40 = vpop.eup %3007  ;;  %v1328_v31 = vadd.f32 %v1312_v2, %v3675_v42  ;;  %v1313_v14 = vmul.f32 1.6666666, %v1297_v11  ;;  %v1256_v5 = vadd.f32 1.0, %v3006_v60  ;;  %2739 = vmatprep.mubr.msk.bf16.mxu0 %vm38_vm2, %v1361_v36 }
 0x3f4   :  { %v3010_v8 = vpop.eup %3009  ;;  %v1331_v6 = vadd.f32 %v1315_v39, %v3673_v30  ;;  %3019 = vrcp.f32 %v1258_v4  ;;  %v1259_v20 = vadd.f32 1.0, %v3008_v40  ;;  %2740 = vmatmul.mubr.msk.bf16.vlgmr.msra.gmra.mrb[36].mxu0 %vm38_vm2, %v1362_v55  ;;  %v3893_v43 = vmul.f32 0.70710677, %v1330_v18 }
 0x3f5   :  { %v1329_v27 = vadd.f32 %v1313_v14, %v3677_v26  ;;  %3021 = vrcp.f32 %v1256_v5  ;;  %v1257_v17 = vadd.f32 1.0, %v3010_v8  ;;  %v3888_v34 = vmul.f32 0.70710677, %v1328_v31 }
 0x3f6   :  { %v3012_v33 = vpop.eup %3011  ;;  %v3886_v21 = vmul.f32 0.70710677, %v1331_v6  ;;  %3023 = vrcp.f32 %v1259_v20 }
 0x3f7   :  { %v3014_v42 = vpop.eup %3013  ;;  %v3890_v45 = vmul.f32 0.70710677, %v1329_v27  ;;  %v1302_v15 = vmul.f32 %v3012_v33, %v3832_v35  ;;  %3025 = vrcp.f32 %v1257_v17 }
 0x3f8   :  { %v3016_v30 = vpop.eup %3015  ;;  %v1300_v7 = vmul.f32 %v3014_v42, %v3835_v16  ;;  %v1364_v29 = vpack.c.bf16 %v3886_v21, %v3893_v43 }
 0x3f9   :  { %v3018_v26 = vpop.eup %3017  ;;  %v1363_v49 = vpack.c.bf16 %v3890_v45, %v3888_v34  ;;  %v1318_v23 = vmul.f32 1.6666666, %v1302_v15  ;;  %v1303_v38 = vmul.f32 %v3016_v30, %v3838_v13 }
 0x3fa   :  { %v1316_v19 = vmul.f32 1.6666666, %v1300_v7  ;;  %v1301_v10 = vmul.f32 %v3018_v26, %v3841_v12 }
 0x3fb   :  { %v1319_v35 = vmul.f32 1.6666666, %v1303_v38  ;;  %2743 = vmatprep.mubr.msk.bf16.mxu0 %vm38_vm2, %v1363_v49  ;;  %v1334_v16 = vadd.f32 %v1318_v23, %v3697_v58 }
 0x3fc   :  { %v1332_v51 = vadd.f32 %v1316_v19, %v3693_v22  ;;  %v1317_v41 = vmul.f32 1.6666666, %v1301_v10  ;;  %2744 = vmatmul.mubr.msk.bf16.gmra.mrb[40].mxu0 %vm38_vm2, %v1364_v29 }
 0x3fd   :  { %v1335_v52 = vadd.f32 %v1319_v35, %v3691_v54  ;;  %v3916_v59 = vmul.f32 0.70710677, %v1334_v16 }
 0x3fe   :  { %v3020_v32 = vpop.eup %3019  ;;  %v1333_v13 = vadd.f32 %v1317_v41, %v3695_v28  ;;  %v3911_v3 = vmul.f32 0.70710677, %v1332_v51 }
 0x3ff   :  { %v3022_v53 = vpop.eup %3021  ;;  %v3908_v0 = vmul.f32 0.70710677, %v1335_v52  ;;  %v1306_v12 = vmul.f32 %v3020_v32, %v3844_v37 }
 0x400   :  { %v3024_v61 = vpop.eup %3023  ;;  %v3913_v1 = vmul.f32 0.70710677, %v1333_v13  ;;  %v1304_v22 = vmul.f32 %v3022_v53, %v3847_v50 }
 0x401   :  { %v3026_v47 = vpop.eup %3025  ;;  %v1322_v58 = vmul.f32 1.6666666, %v1306_v12  ;;  %v1307_v54 = vmul.f32 %v3024_v61, %v3851_v62  ;;  %v1366_v37 = vpack.c.bf16 %v3908_v0, %v3916_v59 }
 0x402   :  { %v1365_v28 = vpack.c.bf16 %v3913_v1, %v3911_v3  ;;  %v1320_v36 = vmul.f32 1.6666666, %v1304_v22  ;;  %v1305_v2 = vmul.f32 %v3026_v47, %v3855_v9 }
 0x403   :  { %v1323_v11 = vmul.f32 1.6666666, %v1307_v54  ;;  %v1338_v50 = vadd.f32 %v1322_v58, %v3715_v56 }
 0x404   :  { %v1336_v60 = vadd.f32 %v1320_v36, %v3711_v63  ;;  %v1321_v55 = vmul.f32 1.6666666, %v1305_v2  ;;  %2747 = vmatprep.mubr.msk.bf16.mxu0 %vm38_vm2, %v1365_v28 }
 0x405   :  { %v1339_v39 = vadd.f32 %v1323_v11, %v3709_v44  ;;  %2748 = vmatmul.mubr.msk.bf16.gmra.mrb[44].mxu0 %vm38_vm2, %v1366_v37  ;;  %v3936_v31 = vmul.f32 0.70710677, %v1338_v50  ;;  %v2823_v44 = vld [vmem:[%s4172_s6 + $0x30] sm:$0xff]  }
 0x406   :  { %v1337_v62 = vadd.f32 %v1321_v55, %v3713_v57  ;;  %v3932_v9 = vmul.f32 0.70710677, %v1336_v60  ;;  %2755 = vmatprep.subr.bf16.mxu1 %v2823_v44  ;;  %v2824_v57 = vld [vmem:[%s4172_s6 + $0x38] sm:$0xff]  }
 0x407   :  { %v3930_v4 = vmul.f32 0.70710677, %v1339_v39  ;;  %2756 = vmatpush3.bf16.msra.mxu1 %v2823_v44 }
 0x408   :  { %v3934_v40 = vmul.f32 0.70710677, %v1337_v62  ;;  %2757 = vmatprep.subr.bf16.mxu1 %v2824_v57 }
 0x409   :  { %v1368_v56 = vpack.c.bf16 %v3930_v4, %v3936_v31 }
 0x40a   :  { %v1367_v63 = vpack.c.bf16 %v3934_v40, %v3932_v9 }
 0x40b   :  { %2758 = vmatpush3.bf16.msra.mxu1 %v2824_v57 }
 0x40c   :  { %2751 = vmatprep.mubr.msk.bf16.mxu0 %vm38_vm2, %v1367_v63 }
 0x40d   :  { %2752 = vmatmul.mubr.msk.bf16.gmra.mrb[48].mxu0 %vm38_vm2, %v1368_v56 }
 0x4c7   :  { %v3950_v14 = vpop.f32.mrb[36].mxu0 }
 0x4c8   :  { %v2397_v5 = vmul.f32 -1.442695, %v3950_v14  ;;  %v3953_v8 = vpop.f32.mrb[37].mxu0 }
 0x4c9   :  { %v2395_v18 = vmul.f32 -1.442695, %v3953_v8  ;;  %v3956_v6 = vpop.f32.mrb[38].mxu0 }
 0x4ca   :  { %3027 = vpow2.f32 %v2397_v5  ;;  %v2398_v20 = vmul.f32 -1.442695, %v3956_v6  ;;  %v3959_v27 = vpop.f32.mrb[39].mxu0 }
 0x4cb   :  { %3029 = vpow2.f32 %v2395_v18  ;;  %v2396_v17 = vmul.f32 -1.442695, %v3959_v27 }
 0x4cc   :  { %3031 = vpow2.f32 %v2398_v20 }
 0x4cd   :  { %3033 = vpow2.f32 %v2396_v17 }
 0x4cf   :  { %v3962_v33 = vpop.f32.mrb[40].mxu0 }
 0x4d0   :  { %v2401_v42 = vmul.f32 -1.442695, %v3962_v33  ;;  %v3965_v15 = vpop.f32.mrb[41].mxu0 }
 0x4d1   :  { %v2399_v30 = vmul.f32 -1.442695, %v3965_v15  ;;  %v3968_v7 = vpop.f32.mrb[42].mxu0 }
 0x4d2   :  { %3035 = vpow2.f32 %v2401_v42  ;;  %v2402_v26 = vmul.f32 -1.442695, %v3968_v7  ;;  %v3971_v49 = vpop.f32.mrb[43].mxu0 }
 0x4d3   :  { %3037 = vpow2.f32 %v2399_v30  ;;  %v2400_v23 = vmul.f32 -1.442695, %v3971_v49 }
 0x4d4   :  { %v3028_v38 = vpop.eup %3027  ;;  %3039 = vpow2.f32 %v2402_v26 }
 0x4d5   :  { %v3030_v29 = vpop.eup %3029  ;;  %v1552_v19 = vadd.f32 1.0, %v3028_v38  ;;  %3041 = vpow2.f32 %v2400_v23 }
 0x4d6   :  { %v3032_v10 = vpop.eup %3031  ;;  %v1550_v35 = vadd.f32 1.0, %v3030_v29 }
 0x4d7   :  { %v3034_v51 = vpop.eup %3033  ;;  %3043 = vrcp.f32 %v1552_v19  ;;  %v1553_v41 = vadd.f32 1.0, %v3032_v10 }
 0x4d8   :  { %3045 = vrcp.f32 %v1550_v35  ;;  %v1551_v16 = vadd.f32 1.0, %v3034_v51  ;;  %v3974_v52 = vpop.f32.mrb[44].mxu0 }
 0x4d9   :  { %3047 = vrcp.f32 %v1553_v41  ;;  %v2405_v32 = vmul.f32 -1.442695, %v3974_v52  ;;  %v3977_v13 = vpop.f32.mrb[45].mxu0 }
 0x4da   :  { %3049 = vrcp.f32 %v1551_v16  ;;  %v2403_v53 = vmul.f32 -1.442695, %v3977_v13  ;;  %v3980_v12 = vpop.f32.mrb[46].mxu0 }
 0x4db   :  { %3051 = vpow2.f32 %v2405_v32  ;;  %v2406_v61 = vmul.f32 -1.442695, %v3980_v12  ;;  %v3983_v22 = vpop.f32.mrb[47].mxu0 }
 0x4dc   :  { %v3036_v47 = vpop.eup %3035  ;;  %3053 = vpow2.f32 %v2403_v53  ;;  %v2404_v58 = vmul.f32 -1.442695, %v3983_v22 }
 0x4dd   :  { %v3038_v54 = vpop.eup %3037  ;;  %v1556_v28 = vadd.f32 1.0, %v3036_v47  ;;  %3055 = vpow2.f32 %v2406_v61 }
 0x4de   :  { %v3040_v36 = vpop.eup %3039  ;;  %v1554_v2 = vadd.f32 1.0, %v3038_v54  ;;  %3057 = vpow2.f32 %v2404_v58 }
 0x4df   :  { %v3042_v37 = vpop.eup %3041  ;;  %3059 = vrcp.f32 %v1556_v28  ;;  %v1557_v11 = vadd.f32 1.0, %v3040_v36 }
 0x4e0   :  { %3061 = vrcp.f32 %v1554_v2  ;;  %v1555_v60 = vadd.f32 1.0, %v3042_v37  ;;  %v3986_v55 = vpop.f32.mrb[48].mxu0 }
 0x4e1   :  { %v3044_v50 = vpop.eup %3043  ;;  %3063 = vrcp.f32 %v1557_v11  ;;  %v2409_v39 = vmul.f32 -1.442695, %v3986_v55  ;;  %v3989_v62 = vpop.f32.mrb[49].mxu0 }
 0x4e2   :  { %v3046_v63 = vpop.eup %3045  ;;  %v1600_v56 = vmul.f32 %v3044_v50, %v3950_v14  ;;  %3065 = vrcp.f32 %v1555_v60  ;;  %v2407_v44 = vmul.f32 -1.442695, %v3989_v62  ;;  %v3993_v57 = vpop.f32.mrb[50].mxu0 }
 0x4e3   :  { %v3048_v5 = vpop.eup %3047  ;;  %v1598_v18 = vmul.f32 %v3046_v63, %v3953_v8  ;;  %3067 = vpow2.f32 %v2409_v39  ;;  %v2410_v20 = vmul.f32 -1.442695, %v3993_v57  ;;  %v3997_v17 = vpop.f32.mrb[51].mxu0 }
 0x4e4   :  { %v3050_v42 = vpop.eup %3049  ;;  %v1601_v30 = vmul.f32 %v3048_v5, %v3956_v6  ;;  %3069 = vpow2.f32 %v2407_v44  ;;  %v2408_v26 = vmul.f32 -1.442695, %v3997_v17  ;;  %v1616_v29 = vmul.f32 1.6666666, %v1600_v56 }
 0x4e5   :  { %v3052_v14 = vpop.eup %3051  ;;  %v1599_v23 = vmul.f32 %v3050_v42, %v3959_v27  ;;  %3071 = vpow2.f32 %v2410_v20  ;;  %v1614_v35 = vmul.f32 1.6666666, %v1598_v18 }
 0x4e6   :  { %v3054_v38 = vpop.eup %3053  ;;  %v1617_v19 = vmul.f32 1.6666666, %v1601_v30  ;;  %v1560_v10 = vadd.f32 1.0, %v3052_v14  ;;  %3073 = vpow2.f32 %v2408_v26 }
 0x4e7   :  { %v3056_v8 = vpop.eup %3055  ;;  %v1615_v51 = vmul.f32 1.6666666, %v1599_v23  ;;  %v1558_v41 = vadd.f32 1.0, %v3054_v38 }
 0x4e8   :  { %v3058_v16 = vpop.eup %3057  ;;  %v1636_v32 = vpack.c.bf16 %v1617_v19, %v1616_v29  ;;  %3075 = vrcp.f32 %v1560_v10  ;;  %v1561_v6 = vadd.f32 1.0, %v3056_v8 }
 0x4e9   :  { %v3060_v53 = vpop.eup %3059  ;;  %v1635_v61 = vpack.c.bf16 %v1615_v51, %v1614_v35  ;;  %3077 = vrcp.f32 %v1558_v41  ;;  %v1559_v47 = vadd.f32 1.0, %v3058_v16 }
 0x4ea   :  { %v3062_v58 = vpop.eup %3061  ;;  %v1604_v27 = vmul.f32 %v3060_v53, %v3962_v33  ;;  %3079 = vrcp.f32 %v1561_v6 }
 0x4eb   :  { %v3064_v54 = vpop.eup %3063  ;;  %v1602_v28 = vmul.f32 %v3062_v58, %v3965_v15  ;;  %3081 = vrcp.f32 %v1559_v47  ;;  %2759 = vmatprep.mubr.msk.bf16.mxu1 %vm38_vm2, %v1635_v61 }
 0x4ec   :  { %v3066_v36 = vpop.eup %3065  ;;  %v1605_v2 = vmul.f32 %v3064_v54, %v3968_v7  ;;  %2760 = vmatmul.mubr.msk.bf16.vlgmr.msra.gmra.mrb[36].mxu1 %vm38_vm2, %v1636_v32  ;;  %v1620_v50 = vmul.f32 1.6666666, %v1604_v27 }
 0x4ed   :  { %v3068_v37 = vpop.eup %3067  ;;  %v1603_v11 = vmul.f32 %v3066_v36, %v3971_v49  ;;  %v1618_v56 = vmul.f32 1.6666666, %v1602_v28 }
 0x4ee   :  { %v3070_v60 = vpop.eup %3069  ;;  %v1621_v39 = vmul.f32 1.6666666, %v1605_v2  ;;  %v1564_v63 = vadd.f32 1.0, %v3068_v37 }
 0x4ef   :  { %v3072_v33 = vpop.eup %3071  ;;  %v1619_v44 = vmul.f32 1.6666666, %v1603_v11  ;;  %v1562_v5 = vadd.f32 1.0, %v3070_v60 }
 0x4f0   :  { %v3074_v15 = vpop.eup %3073  ;;  %v1638_v18 = vpack.c.bf16 %v1621_v39, %v1620_v50  ;;  %3083 = vrcp.f32 %v1564_v63  ;;  %v1565_v20 = vadd.f32 1.0, %v3072_v33 }
 0x4f1   :  { %v1637_v42 = vpack.c.bf16 %v1619_v44, %v1618_v56  ;;  %3085 = vrcp.f32 %v1562_v5  ;;  %v1563_v7 = vadd.f32 1.0, %v3074_v15 }
 0x4f2   :  { %v3076_v30 = vpop.eup %3075  ;;  %3087 = vrcp.f32 %v1565_v20 }
 0x4f3   :  { %v3078_v26 = vpop.eup %3077  ;;  %v1608_v49 = vmul.f32 %v3076_v30, %v3974_v52  ;;  %3089 = vrcp.f32 %v1563_v7  ;;  %2763 = vmatprep.mubr.msk.bf16.mxu1 %vm38_vm2, %v1637_v42 }
 0x4f4   :  { %v3080_v14 = vpop.eup %3079  ;;  %v1606_v23 = vmul.f32 %v3078_v26, %v3977_v13  ;;  %2764 = vmatmul.mubr.msk.bf16.gmra.mrb[40].mxu1 %vm38_vm2, %v1638_v18 }
 0x4f5   :  { %v3082_v38 = vpop.eup %3081  ;;  %v1609_v29 = vmul.f32 %v3080_v14, %v3980_v12  ;;  %v1624_v10 = vmul.f32 1.6666666, %v1608_v49 }
 0x4f6   :  { %v1607_v19 = vmul.f32 %v3082_v38, %v3983_v22  ;;  %v1622_v35 = vmul.f32 1.6666666, %v1606_v23 }
 0x4f7   :  { %v1625_v8 = vmul.f32 1.6666666, %v1609_v29 }
 0x4f8   :  { %v1623_v51 = vmul.f32 1.6666666, %v1607_v19  ;;  %v4054_v19 = vpop.permute.xlu0 %1936 }
 0x4f9   :  { %v1640_v41 = vpack.c.bf16 %v1625_v8, %v1624_v10 }
 0x4fa   :  { %v3084_v16 = vpop.eup %3083  ;;  %v1639_v52 = vpack.c.bf16 %v1623_v51, %v1622_v35  ;;  %v4059_v35 = vpop.permute.xlu1 %1938 }
 0x4fb   :  { %v3086_v32 = vpop.eup %3085  ;;  %v1612_v6 = vmul.f32 %v3084_v16, %v3986_v55  ;;  %v2825_v55 = vld [vmem:[%s4173_s7] sm:$0xff]  }
 0x4fc   :  { %v3088_v53 = vpop.eup %3087  ;;  %v1610_v13 = vmul.f32 %v3086_v32, %v3989_v62  ;;  %2767 = vmatprep.mubr.msk.bf16.mxu1 %vm38_vm2, %v1639_v52  ;;  %2775 = vmatprep.subr.bf16.mxu0 %v2825_v55  ;;  %v2826_v62 = vld [vmem:[%s4173_s7 + $0x8] sm:$0xff]   ;;  %s3230_s7 = smov [#allocation6]  }
 0x4fd   :  { %v3090_v61 = vpop.eup %3089  ;;  %v1613_v12 = vmul.f32 %v3088_v53, %v3993_v57  ;;  %2768 = vmatmul.mubr.msk.bf16.gmra.mrb[44].mxu1 %vm38_vm2, %v1640_v41  ;;  %v1628_v47 = vmul.f32 1.6666666, %v1612_v6  ;;  %2776 = vmatpush3.bf16.msra.mxu0 %v2825_v55  ;;  %s2243_s26 = sshll.u32 %s3230_s7, 4  ;;  %s2244_s26 = int_to_ptr.vmem [resolvable:$true] %s2243_s26 }
 0x4fe   :  { %v1611_v22 = vmul.f32 %v3090_v61, %v3997_v17  ;;  %v1626_v27 = vmul.f32 1.6666666, %v1610_v13  ;;  %2777 = vmatprep.subr.bf16.mxu0 %v2826_v62  ;;  %s3155_s27 = scalar_lea.vmem %s2244_s26, 128  ;;  %p3160_p1 = scmp.lt.s32.totalorder %s2244_s26, %s2244_s26 }
 0x4ff   :  { %v1629_v58 = vmul.f32 1.6666666, %v1613_v12  ;;  %p3156_p0 = scmp.ne.s32.totalorder %s2244_s26, %s3155_s27  ;;  %p3161_p2 = scmp.lt.s32.totalorder %s3155_s27, %s3155_s27 }
 0x500   :  { %v1627_v54 = vmul.f32 1.6666666, %v1611_v22 }
 0x501   :  { %v1642_v28 = vpack.c.bf16 %v1629_v58, %v1628_v47  ;;  %2778 = vmatpush3.bf16.msra.mxu0 %v2826_v62  ;;  %v1941_v47 = vpop.permute.xlu0 %1940  ;;  %p3162_p3 = por %p3161_p2, %p3160_p1 }
 0x502   :  { %v1641_v36 = vpack.c.bf16 %v1627_v54, %v1626_v27  ;;  %v1943_v27 = vpop.permute.xlu1 %1942 }
 0x503   :  { %p3163_p4 = pnand %p3162_p3, %p3156_p0 }
 0x504   :  { %2771 = vmatprep.mubr.msk.bf16.mxu1 %vm38_vm2, %v1641_v36 }
 0x505   :  { %2772 = vmatmul.mubr.msk.bf16.gmra.mrb[48].mxu1 %vm38_vm2, %v1642_v28 }
 0x5bf   :  { %v4028_v57 = vpop.f32.mrb[36].mxu1 }
 0x5c0   :  { %v2427_v17 = vmul.f32 -1.442695, %v4028_v57  ;;  %v4031_v2 = vpop.f32.mrb[37].mxu1 }
 0x5c1   :  { %v2425_v37 = vmul.f32 -1.442695, %v4031_v2  ;;  %v4034_v11 = vpop.f32.mrb[38].mxu1 }
 0x5c2   :  { %3091 = vpow2.f32 %v2427_v17  ;;  %v2428_v60 = vmul.f32 -1.442695, %v4034_v11  ;;  %v4037_v50 = vpop.f32.mrb[39].mxu1 }
 0x5c3   :  { %3093 = vpow2.f32 %v2425_v37  ;;  %v2426_v39 = vmul.f32 -1.442695, %v4037_v50 }
 0x5c4   :  { %3095 = vpow2.f32 %v2428_v60 }
 0x5c5   :  { %3097 = vpow2.f32 %v2426_v39 }
 0x5c7   :  { %v4040_v63 = vpop.f32.mrb[40].mxu1 }
 0x5c8   :  { %v2431_v33 = vmul.f32 -1.442695, %v4040_v63  ;;  %v4043_v56 = vpop.f32.mrb[41].mxu1 }
 0x5c9   :  { %v2429_v44 = vmul.f32 -1.442695, %v4043_v56  ;;  %v4046_v5 = vpop.f32.mrb[42].mxu1 }
 0x5ca   :  { %3099 = vpow2.f32 %v2431_v33  ;;  %v2432_v15 = vmul.f32 -1.442695, %v4046_v5  ;;  %v4049_v18 = vpop.f32.mrb[43].mxu1 }
 0x5cb   :  { %3101 = vpow2.f32 %v2429_v44  ;;  %v2430_v20 = vmul.f32 -1.442695, %v4049_v18 }
 0x5cc   :  { %v3092_v42 = vpop.eup %3091  ;;  %3103 = vpow2.f32 %v2432_v15 }
 0x5cd   :  { %v3094_v7 = vpop.eup %3093  ;;  %v1826_v30 = vadd.f32 1.0, %v3092_v42  ;;  %3105 = vpow2.f32 %v2430_v20 }
 0x5ce   :  { %v3096_v26 = vpop.eup %3095  ;;  %v1824_v49 = vadd.f32 1.0, %v3094_v7 }
 0x5cf   :  { %v3098_v14 = vpop.eup %3097  ;;  %3107 = vrcp.f32 %v1826_v30  ;;  %v1827_v23 = vadd.f32 1.0, %v3096_v26 }
 0x5d0   :  { %3109 = vrcp.f32 %v1824_v49  ;;  %v1825_v38 = vadd.f32 1.0, %v3098_v14  ;;  %v4052_v29 = vpop.f32.mrb[44].mxu1 }
 0x5d1   :  { %3111 = vrcp.f32 %v1827_v23  ;;  %v2435_v10 = vmul.f32 -1.442695, %v4052_v29  ;;  %v4057_v8 = vpop.f32.mrb[45].mxu1 }
 0x5d2   :  { %3113 = vrcp.f32 %v1825_v38  ;;  %v2433_v51 = vmul.f32 -1.442695, %v4057_v8  ;;  %v4062_v41 = vpop.f32.mrb[46].mxu1  ;;  %v4084_v38 = vpop.permute.xlu0 %1944 }
 0x5d3   :  { %3115 = vpow2.f32 %v2435_v10  ;;  %v2436_v16 = vmul.f32 -1.442695, %v4062_v41  ;;  %v4065_v52 = vpop.f32.mrb[47].mxu1 }
 0x5d4   :  { %v3100_v32 = vpop.eup %3099  ;;  %3117 = vpow2.f32 %v2433_v51  ;;  %v2434_v6 = vmul.f32 -1.442695, %v4065_v52 }
 0x5d5   :  { %v3102_v53 = vpop.eup %3101  ;;  %v1830_v13 = vadd.f32 1.0, %v3100_v32  ;;  %3119 = vpow2.f32 %v2436_v16 }
 0x5d6   :  { %v3104_v61 = vpop.eup %3103  ;;  %v1828_v12 = vadd.f32 1.0, %v3102_v53  ;;  %3121 = vpow2.f32 %v2434_v6 }
 0x5d7   :  { %v3106_v22 = vpop.eup %3105  ;;  %3123 = vrcp.f32 %v1830_v13  ;;  %v1831_v58 = vadd.f32 1.0, %v3104_v61 }
 0x5d8   :  { %3125 = vrcp.f32 %v1828_v12  ;;  %v1829_v54 = vadd.f32 1.0, %v3106_v22  ;;  %v4068_v28 = vpop.f32.mrb[48].mxu1 }
 0x5d9   :  { %v3108_v36 = vpop.eup %3107  ;;  %3127 = vrcp.f32 %v1831_v58  ;;  %v2439_v55 = vmul.f32 -1.442695, %v4068_v28  ;;  %v4071_v62 = vpop.f32.mrb[49].mxu1 }
 0x5da   :  { %v3110_v17 = vpop.eup %3109  ;;  %v1874_v37 = vmul.f32 %v3108_v36, %v4028_v57  ;;  %3129 = vrcp.f32 %v1829_v54  ;;  %v2437_v60 = vmul.f32 -1.442695, %v4071_v62  ;;  %v4075_v39 = vpop.f32.mrb[50].mxu1 }
 0x5db   :  { %v3112_v33 = vpop.eup %3111  ;;  %v1872_v44 = vmul.f32 %v3110_v17, %v4031_v2  ;;  %3131 = vpow2.f32 %v2439_v55  ;;  %v2440_v15 = vmul.f32 -1.442695, %v4075_v39  ;;  %v4079_v20 = vpop.f32.mrb[51].mxu1 }
 0x5dc   :  { %v3114_v42 = vpop.eup %3113  ;;  %v1890_v7 = vmul.f32 1.6666666, %v1874_v37  ;;  %v1875_v30 = vmul.f32 %v3112_v33, %v4034_v11  ;;  %3133 = vpow2.f32 %v2437_v60  ;;  %v2438_v57 = vmul.f32 -1.442695, %v4079_v20  ;;  %v4086_v2 = vpop.permute.xlu1 %1946 }
 0x5dd   :  { %v3116_v26 = vpop.eup %3115  ;;  %v1888_v49 = vmul.f32 1.6666666, %v1872_v44  ;;  %v1873_v14 = vmul.f32 %v3114_v42, %v4037_v50  ;;  %3135 = vpow2.f32 %v2440_v15 }
 0x5de   :  { %v3118_v23 = vpop.eup %3117  ;;  %v1906_v10 = vadd.f32 %v1890_v7, %v3872_v48  ;;  %v1891_v51 = vmul.f32 1.6666666, %v1875_v30  ;;  %v1834_v16 = vadd.f32 1.0, %v3116_v26  ;;  %3137 = vpow2.f32 %v2438_v57 }
 0x5df   :  { %v3120_v32 = vpop.eup %3119  ;;  %v1904_v11 = vadd.f32 %v1888_v49, %v3867_v25  ;;  %v1889_v6 = vmul.f32 1.6666666, %v1873_v14  ;;  %v1832_v53 = vadd.f32 1.0, %v3118_v23 }
 0x5e0   :  { %v3122_v13 = vpop.eup %3121  ;;  %v1922_v61 = vmul.f32 0.70710677, %v1906_v10  ;;  %v1907_v50 = vadd.f32 %v1891_v51, %v3864_v24  ;;  %3139 = vrcp.f32 %v1834_v16  ;;  %v1835_v12 = vadd.f32 1.0, %v3120_v32  ;;  %v1949_v24 = vpop.permute.xlu0 %1948 }
 0x5e1   :  { %v3124_v22 = vpop.eup %3123  ;;  %v1920_v58 = vmul.f32 0.70710677, %v1904_v11  ;;  %v1905_v54 = vadd.f32 %v1889_v6, %v3869_v46  ;;  %3141 = vrcp.f32 %v1832_v53  ;;  %v1833_v48 = vadd.f32 1.0, %v3122_v13  ;;  %v1951_v44 = vpop.permute.xlu1 %1950 }
 0x5e2   :  { %v3126_v36 = vpop.eup %3125  ;;  %v1923_v55 = vmul.f32 0.70710677, %v1907_v50  ;;  %v1878_v17 = vmul.f32 %v3124_v22, %v4040_v63  ;;  %3143 = vrcp.f32 %v1835_v12  ;;  %v1986_v15 = vmul.f32 %v1941_v47, %v1922_v61 }
 0x5e3   :  { %v3128_v25 = vpop.eup %3127  ;;  %v1921_v37 = vmul.f32 0.70710677, %v1905_v54  ;;  %v1876_v60 = vmul.f32 %v3126_v36, %v4043_v56  ;;  %3145 = vrcp.f32 %v1833_v48  ;;  %v1984_v57 = vmul.f32 %v4054_v19, %v1920_v58 }
 0x5e4   :  { %v3130_v33 = vpop.eup %3129  ;;  %v1987_v42 = vmul.f32 %v1943_v27, %v1923_v55  ;;  %v1894_v7 = vmul.f32 1.6666666, %v1878_v17  ;;  %v1879_v46 = vmul.f32 %v3128_v25, %v4046_v5  ;;  %v1953_v61 = vpop.permute.xlu0 %1952 }
 0x5e5   :  { %v3132_v30 = vpop.eup %3131  ;;  %v1985_v26 = vmul.f32 %v4059_v35, %v1921_v37  ;;  %v1892_v63 = vmul.f32 1.6666666, %v1876_v60  ;;  %v1877_v49 = vmul.f32 %v3130_v33, %v4049_v18  ;;  %v1955_v50 = vpop.permute.xlu1 %1954 }
 0x5e6   :  { %v3134_v14 = vpop.eup %3133  ;;  %v2005_v23 = vpack.c.bf16 %v1987_v42, %v1986_v15  ;;  %v1910_v56 = vadd.f32 %v1894_v7, %v3893_v43  ;;  %v1895_v10 = vmul.f32 1.6666666, %v1879_v46  ;;  %v1838_v51 = vadd.f32 1.0, %v3132_v30 }
 0x5e7   :  { %v3136_v16 = vpop.eup %3135  ;;  %v1908_v47 = vadd.f32 %v1892_v63, %v3888_v34  ;;  %v1893_v27 = vmul.f32 1.6666666, %v1877_v49  ;;  %v1836_v32 = vadd.f32 1.0, %v3134_v14  ;;  %v2004_v5 = vpack.c.bf16 %v1985_v26, %v1984_v57 }
 0x5e8   :  { %v3138_v11 = vpop.eup %3137  ;;  %v1926_v6 = vmul.f32 0.70710677, %v1910_v56  ;;  %v1911_v19 = vadd.f32 %v1895_v10, %v3886_v21  ;;  %3147 = vrcp.f32 %v1838_v51  ;;  %v1839_v35 = vadd.f32 1.0, %v3136_v16 }
 0x5e9   :  { %v1924_v53 = vmul.f32 0.70710677, %v1908_v47  ;;  %v1909_v18 = vadd.f32 %v1893_v27, %v3890_v45  ;;  %3149 = vrcp.f32 %v1836_v32  ;;  %v1837_v13 = vadd.f32 1.0, %v3138_v11  ;;  %2779 = vmatprep.mubr.msk.bf16.mxu0 %vm38_vm2, %v2004_v5 }
 0x5ea   :  { %v3140_v43 = vpop.eup %3139  ;;  %v1927_v34 = vmul.f32 0.70710677, %v1911_v19  ;;  %3151 = vrcp.f32 %v1839_v35  ;;  %2780 = vmatmul.mubr.msk.bf16.vlgmr.msra.gmra.mrb[52].mxu0 %vm38_vm2, %v2005_v23  ;;  %v1990_v54 = vmul.f32 %v1949_v24, %v1926_v6  ;;  %v1957_v24 = vpop.permute.xlu0 %1956 }
 0x5eb   :  { %v3142_v12 = vpop.eup %3141  ;;  %v1925_v22 = vmul.f32 0.70710677, %v1909_v18  ;;  %v1882_v21 = vmul.f32 %v3140_v43, %v4052_v29  ;;  %3153 = vrcp.f32 %v1837_v13  ;;  %v1988_v55 = vmul.f32 %v4084_v38, %v1924_v53 }
 0x5ec   :  { %v3144_v58 = vpop.eup %3143  ;;  %v1991_v48 = vmul.f32 %v1951_v44, %v1927_v34  ;;  %v1880_v45 = vmul.f32 %v3142_v12, %v4057_v8  ;;  %v1959_v44 = vpop.permute.xlu1 %1958 }
 0x5ed   :  { %v3146_v36 = vpop.eup %3145  ;;  %v1989_v17 = vmul.f32 %v4086_v2, %v1925_v22  ;;  %v1898_v25 = vmul.f32 1.6666666, %v1882_v21  ;;  %v1883_v37 = vmul.f32 %v3144_v58, %v4062_v41 }
 0x5ee   :  { %v1896_v60 = vmul.f32 1.6666666, %v1880_v45  ;;  %v1881_v33 = vmul.f32 %v3146_v36, %v4065_v52  ;;  %v2007_v15 = vpack.c.bf16 %v1991_v48, %v1990_v54  ;;  %v1961_v51 = vpop.permute.xlu0 %1960 }
 0x5ef   :  { %v1914_v29 = vadd.f32 %v1898_v25, %v3916_v59  ;;  %v1899_v42 = vmul.f32 1.6666666, %v1883_v37  ;;  %v2006_v7 = vpack.c.bf16 %v1989_v17, %v1988_v55 }
 0x5f0   :  { %v1912_v8 = vadd.f32 %v1896_v60, %v3911_v3  ;;  %v1897_v46 = vmul.f32 1.6666666, %v1881_v33  ;;  %v1963_v16 = vpop.permute.xlu1 %1962 }
 0x5f1   :  { %v1930_v30 = vmul.f32 0.70710677, %v1914_v29  ;;  %v1915_v38 = vadd.f32 %v1899_v42, %v3908_v0  ;;  %2783 = vmatprep.mubr.msk.bf16.mxu0 %vm38_vm2, %v2006_v7 }
 0x5f2   :  { %v3148_v2 = vpop.eup %3147  ;;  %v1928_v41 = vmul.f32 0.70710677, %v1912_v8  ;;  %v1913_v57 = vadd.f32 %v1897_v46, %v3913_v1  ;;  %2784 = vmatmul.mubr.msk.bf16.gmra.mrb[56].mxu0 %vm38_vm2, %v2007_v15 }
 0x5f3   :  { %v3150_v52 = vpop.eup %3149  ;;  %v1931_v59 = vmul.f32 0.70710677, %v1915_v38  ;;  %v1886_v26 = vmul.f32 %v3148_v2, %v4068_v28  ;;  %v1994_v23 = vmul.f32 %v1957_v24, %v1930_v30 }
 0x5f4   :  { %v3152_v63 = vpop.eup %3151  ;;  %v1929_v49 = vmul.f32 0.70710677, %v1913_v57  ;;  %v1884_v3 = vmul.f32 %v3150_v52, %v4071_v62  ;;  %v1992_v47 = vmul.f32 %v1953_v61, %v1928_v41  ;;  %v1967_v43 = vpop.permute.xlu1 %1966 }
 0x5f5   :  { %v3154_v14 = vpop.eup %3153  ;;  %v1995_v56 = vmul.f32 %v1959_v44, %v1931_v59  ;;  %v1902_v0 = vmul.f32 1.6666666, %v1886_v26  ;;  %v1887_v10 = vmul.f32 %v3152_v63, %v4075_v39 }
 0x5f6   :  { %v1993_v1 = vmul.f32 %v1955_v50, %v1929_v49  ;;  %v1900_v27 = vmul.f32 1.6666666, %v1884_v3  ;;  %v1885_v32 = vmul.f32 %v3154_v14, %v4079_v20  ;;  %v1965_v20 = vpop.permute.xlu0 %1964 }
 0x5f7   :  { %v1918_v5 = vadd.f32 %v1902_v0, %v3936_v31  ;;  %v1903_v28 = vmul.f32 1.6666666, %v1887_v10  ;;  %v2009_v11 = vpack.c.bf16 %v1995_v56, %v1994_v23 }
 0x5f8   :  { %v1916_v6 = vadd.f32 %v1900_v27, %v3932_v9  ;;  %v1901_v62 = vmul.f32 1.6666666, %v1885_v32  ;;  %v2008_v19 = vpack.c.bf16 %v1993_v1, %v1992_v47 }
 0x5f9   :  { %v1934_v35 = vmul.f32 0.70710677, %v1918_v5  ;;  %v1919_v53 = vadd.f32 %v1903_v28, %v3930_v4 }
 0x5fa   :  { %v1932_v18 = vmul.f32 0.70710677, %v1916_v6  ;;  %v1917_v39 = vadd.f32 %v1901_v62, %v3934_v40  ;;  %2787 = vmatprep.mubr.msk.bf16.mxu0 %vm38_vm2, %v2008_v19 }
 0x5fb   :  { %v1935_v13 = vmul.f32 0.70710677, %v1919_v53  ;;  %2788 = vmatmul.mubr.msk.bf16.gmra.mrb[60].mxu0 %vm38_vm2, %v2009_v11  ;;  %v1998_v61 = vmul.f32 %v1965_v20, %v1934_v35 }
 0x5fc   :  { %v1933_v31 = vmul.f32 0.70710677, %v1917_v39  ;;  %v1996_v34 = vmul.f32 %v1961_v51, %v1932_v18 }
 0x5fd   :  { %v1999_v50 = vmul.f32 %v1967_v43, %v1935_v13 }
 0x5fe   :  { %v1997_v9 = vmul.f32 %v1963_v16, %v1933_v31 }
 0x5ff   :  { %v2011_v12 = vpack.c.bf16 %v1999_v50, %v1998_v61 }
 0x600   :  { %v2010_v22 = vpack.c.bf16 %v1997_v9, %v1996_v34 }
 0x602   :  { %2791 = vmatprep.mubr.msk.bf16.mxu0 %vm38_vm2, %v2010_v22 }
 0x603   :  { %2792 = vmatmul.mubr.msk.bf16.gmra.mrb[64].mxu0 %vm38_vm2, %v2011_v12 }
 0x604   :  { %3166 = shalt.err (!%p3163_p4)
}
 0x605   :  { %s3167_s1 = scalar_lea.hbm %s4175_s9, 128 }
 0x606   :  { %p3168_p5 = scmp.ne.s32.totalorder %s4175_s9, %s3167_s1  ;;  %p3171_p6 = scmp.lt.u32.totalorder %s3167_s1, %s4175_s9 }
 0x608   :  { %p3173_p7 = pnand %p3171_p6, %p3168_p5 }
 0x60a   :  { %3176 = shalt.err (!%p3173_p7)
}
 0x60b   :  { %2246 = dma.vmem_to_hbm [thread:$0]  %s2244_s26, 128, %s4175_s9, [#allocation7]  }
 0x60c   :  { %s3231_s15 = smov [#allocation8]  }
 0x60d   :  { %s2253_s16 = sshll.u32 %s3231_s15, 4  ;;  %s2254_s16 = int_to_ptr.vmem [resolvable:$true] %s2253_s16 }
 0x60e   :  { %s3177_s17 = scalar_lea.vmem %s2254_s16, 128  ;;  %p3182_p9 = scmp.lt.s32.totalorder %s2254_s16, %s2254_s16 }
 0x60f   :  { %p3178_p8 = scmp.ne.s32.totalorder %s2254_s16, %s3177_s17  ;;  %p3183_p10 = scmp.lt.s32.totalorder %s3177_s17, %s3177_s17 }
 0x611   :  { %p3184_p11 = por %p3183_p10, %p3182_p9 }
 0x613   :  { %p3185_p12 = pnand %p3184_p11, %p3178_p8 }
 0x615   :  { %3188 = shalt.err (!%p3185_p12)
}
 0x616   :  { %s3189_s20 = scalar_lea.hbm %s4176_s10, 128 }
 0x617   :  { %p3190_p13 = scmp.ne.s32.totalorder %s4176_s10, %s3189_s20  ;;  %p3193_p0 = scmp.lt.u32.totalorder %s3189_s20, %s4176_s10 }
 0x619   :  { %p3195_p1 = pnand %p3193_p0, %p3190_p13 }
 0x61b   :  { %3198 = shalt.err (!%p3195_p1)
}
 0x61c   :  { %2256 = dma.vmem_to_hbm [thread:$0]  %s2254_s16, 128, %s4176_s10, [#allocation7]  }
 0x61d   :  { %s3232_s10 = smov [#allocation4]  }
 0x61e   :  { %s2230_s6 = sshll.u32 %s3232_s10, 4  ;;  %s2231_s6 = int_to_ptr.vmem [resolvable:$true] %s2230_s6 }
 0x61f   :  { %s3199_s2 = scalar_lea.vmem %s2231_s6, 1024  ;;  %p3204_p3 = scmp.lt.s32.totalorder %s2231_s6, %s2231_s6 }
 0x620   :  { %p3200_p2 = scmp.ne.s32.totalorder %s2231_s6, %s3199_s2  ;;  %p3205_p4 = scmp.lt.s32.totalorder %s3199_s2, %s3199_s2 }
 0x622   :  { %p3206_p5 = por %p3205_p4, %p3204_p3 }
 0x624   :  { %p3207_p6 = pnand %p3206_p5, %p3200_p2 }
 0x6bd   :  { %v2781_v4 = vpop.f32.mrb[52].mxu0 }
 0x6be   :  { %v2082_v40 = vpop.f32.mrb[53].mxu0 }
 0x6bf   :  { %v2782_v21 = vpop.f32.mrb[54].mxu0 }
 0x6c0   :  { %v2491_v58 = vpack.c.bf16 %v2782_v21, %v2781_v4  ;;  %v2085_v54 = vpop.f32.mrb[55].mxu0 }
 0x6c1   :  { %v2486_v48 = vpack.c.bf16 %v2085_v54, %v2082_v40 }
 0x6c2   :  { %2523 = vst [vmem:[#allocation4 + $0x8] sm:$0xff] %v2491_v58  }
 0x6c3   :  { %2487 = vst [vmem:[#allocation4] sm:$0xff] %v2486_v48  }
 0x6c5   :  { %v2785_v45 = vpop.f32.mrb[56].mxu0 }
 0x6c6   :  { %v2098_v36 = vpop.f32.mrb[57].mxu0 }
 0x6c7   :  { %v2786_v55 = vpop.f32.mrb[58].mxu0 }
 0x6c8   :  { %v2501_v17 = vpack.c.bf16 %v2786_v55, %v2785_v45  ;;  %v2101_v25 = vpop.f32.mrb[59].mxu0 }
 0x6c9   :  { %v2496_v37 = vpack.c.bf16 %v2101_v25, %v2098_v36 }
 0x6ca   :  { %2525 = vst [vmem:[#allocation4 + $0x18] sm:$0xff] %v2501_v17  }
 0x6cb   :  { %2524 = vst [vmem:[#allocation4 + $0x10] sm:$0xff] %v2496_v37  }
 0x6ce   :  { %v2789_v60 = vpop.f32.mrb[60].mxu0 }
 0x6cf   :  { %v2114_v33 = vpop.f32.mrb[61].mxu0 }
 0x6d0   :  { %v2790_v15 = vpop.f32.mrb[62].mxu0 }
 0x6d1   :  { %v2511_v29 = vpack.c.bf16 %v2790_v15, %v2789_v60  ;;  %v2117_v42 = vpop.f32.mrb[63].mxu0 }
 0x6d2   :  { %v2506_v7 = vpack.c.bf16 %v2117_v42, %v2114_v33 }
 0x6d3   :  { %2527 = vst [vmem:[#allocation4 + $0x28] sm:$0xff] %v2511_v29  }
 0x6d4   :  { %2526 = vst [vmem:[#allocation4 + $0x20] sm:$0xff] %v2506_v7  }
 0x6d6   :  { %v2793_v24 = vpop.f32.mrb[64].mxu0 }
 0x6d7   :  { %v2130_v44 = vpop.f32.mrb[65].mxu0 }
 0x6d8   :  { %v2794_v8 = vpop.f32.mrb[66].mxu0 }
 0x6d9   :  { %v2521_v46 = vpack.c.bf16 %v2794_v8, %v2793_v24  ;;  %v2133_v30 = vpop.f32.mrb[67].mxu0 }
 0x6da   :  { %v2516_v38 = vpack.c.bf16 %v2133_v30, %v2130_v44 }
 0x6db   :  { %2529 = vst [vmem:[#allocation4 + $0x38] sm:$0xff] %v2521_v46  }
 0x6dc   :  { %2528 = vst [vmem:[#allocation4 + $0x30] sm:$0xff] %v2516_v38  }
 0x6dd   :  { %3210 = shalt.err (!%p3207_p6)
}
 0x6de   :  { %s3211_s7 = scalar_lea.hbm %s4174_s8, 1024 }
 0x6df   :  { %p3212_p7 = scmp.ne.s32.totalorder %s4174_s8, %s3211_s7  ;;  %p3215_p8 = scmp.lt.u32.totalorder %s3211_s7, %s4174_s8 }
 0x6e1   :  { %p3217_p9 = pnand %p3215_p8, %p3212_p7 }
 0x6e3   :  { %3220 = shalt.err (!%p3217_p9)
}
 0x6e4   :  { %s3233_s1 = smov 4  }
 0x6e5   :  { %2236 = dma.vmem_to_hbm [thread:$0]  %s2231_s6, 1024, %s4174_s8, [#allocation5], %s3227_s13, %s3227_s13, %s3233_s1  }
 0x6e6   :  { %3221 = dma.done.wait [#allocation5], 1024  }
 0x6e7   :  { %3222 = vsyncadd [#allocation5], 4294966272 }
 0x6e8   :  { %3223 = dma.done.wait [#allocation7], 256  }
 0x6e9   :  { %3224 = vsyncadd [#allocation7], 4294967040 }
 0x6ea   :  { %2266 = vsyncpa [#allocation5], 1 }
 0x6eb   :  { %2267 = vsyncpa [#allocation7], 1 }

</bundles_post_ra>
